<compile_context>
chip_gen: v6e
topology: v6e:2x2x1
jax: 0.10.0
libtpu: 0.0.40
codegen_flags: <defaults>
</compile_context>

<pallas_src>
import functools

import jax
import jax.numpy as jnp
import numpy as np
from jax.experimental import pallas as pl
from jax.experimental.pallas import tpu as pltpu


# ----------------------------- Pallas kernel --------------------------------
def _conv_bn_kernel(x_ref, w_ref, shift_ref, o_ref, *,
                    kh, kw, stride, dilation, th, wo, cin, cout_p):
    # x_ref:     (1, Hp, Wp, Cin)        padded NHWC input, bf16 (resident per batch)
    # w_ref:     (KH, KW, Cin, Cout_p)   BN-scale-folded weight, bf16
    # shift_ref: (1, Cout_p)             BN shift, f32
    # o_ref:     (1, TH, Wo, Cout_p)     output tile, f32
    t = pl.program_id(1)
    ho0 = t * th
    m = th * wo

    acc = jnp.zeros((m, cout_p), jnp.float32)
    for ikh in range(kh):          # static loops: input tile reused for every tap
        for ikw in range(kw):
            h0 = ho0 * stride + ikh * dilation
            w0 = ikw * dilation
            if stride == 1:
                patch = x_ref[0, pl.ds(h0, th), pl.ds(w0, wo), :]
            else:
                patch = x_ref[0, pl.ds(h0, th, stride=stride),
                              pl.ds(w0, wo, stride=stride), :]
            acc = acc + jnp.dot(patch.reshape(m, cin), w_ref[ikh, ikw],
                                preferred_element_type=jnp.float32)

    out = acc + shift_ref[...]                       # f32 epilogue (BN shift only)
    o_ref[...] = out.reshape(1, th, wo, cout_p).astype(o_ref.dtype)


def _pick_th(ho, wo, cout_p, bytes_budget=2 << 20):
    """Largest divisor of Ho whose f32 output tile fits the VMEM budget."""
    for th in range(ho, 0, -1):
        if ho % th == 0 and th * wo * cout_p * 4 <= bytes_budget:
            return th
    return 1


# ------------------------------ module wrapper -------------------------------
class BasicConv2dPallas:
    """Conv2d(bias=False) + BatchNorm2d (eval mode); forward matches PyTorch."""

    def __init__(self, in_planes, out_planes, kernel_size, stride=1,
                 padding=0, dilation=1, key=None, eps=1e-5):
        if isinstance(kernel_size, int):
            kernel_size = (kernel_size, kernel_size)
        self.in_planes = in_planes
        self.out_planes = out_planes
        self.kh, self.kw = kernel_size
        self.stride = stride
        self.padding = padding
        self.dilation = dilation
        self.eps = eps

        key = jax.random.PRNGKey(0) if key is None else key
        k_w, k_g, k_b, k_m, k_v = jax.random.split(key, 5)
        # Conv weight [Cout, Cin, KH, KW]
        self.weight = (jax.random.normal(
            k_w, (out_planes, in_planes, self.kh, self.kw), jnp.float32) * 0.1)
        # BatchNorm params (deterministic, non-trivial); eval-mode running stats.
        self.gamma = jax.random.uniform(k_g, (out_planes,), jnp.float32, 0.5, 1.5)
        self.beta = jax.random.normal(k_b, (out_planes,), jnp.float32) * 0.1
        self.running_mean = jax.random.normal(k_m, (out_planes,), jnp.float32) * 0.1
        self.running_var = jax.random.uniform(k_v, (out_planes,), jnp.float32, 0.5, 1.5)

    @functools.partial(jax.jit, static_argnums=0)
    def __call__(self, x):
        N, C, H, W = x.shape
        KH, KW = self.kh, self.kw
        s, p, d = self.stride, self.padding, self.dilation
        Ho = (H + 2 * p - d * (KH - 1) - 1) // s + 1
        Wo = (W + 2 * p - d * (KW - 1) - 1) // s + 1
        Cout = self.out_planes
        cout_p = int(np.ceil(Cout / 128) * 128)          # lane-dense output width

        # NCHW -> NHWC, spatial zero-pad, bf16 operands for the MXU.
        x_nhwc = jnp.transpose(x, (0, 2, 3, 1))
        x_pad = jnp.pad(x_nhwc, ((0, 0), (p, p), (p, p), (0, 0))).astype(jnp.bfloat16)
        Hp, Wp = H + 2 * p, W + 2 * p

        # Fold BN (eval mode) scale into the weight; pad Cout to lane width.
        scale = self.gamma / jnp.sqrt(self.running_var + self.eps)       # [Cout]
        shift = self.beta - self.running_mean * scale                    # [Cout]
        w_hwio = jnp.transpose(self.weight, (2, 3, 1, 0)) * scale        # [KH,KW,Cin,Cout]
        w_hwio = jnp.pad(w_hwio, ((0, 0), (0, 0), (0, 0), (0, cout_p - Cout)))
        w_hwio = w_hwio.astype(jnp.bfloat16)
        shift_p = jnp.pad(shift, (0, cout_p - Cout)).reshape(1, cout_p).astype(jnp.float32)

        TH = _pick_th(Ho, Wo, cout_p)
        grid = (N, Ho // TH)

        kernel = functools.partial(
            _conv_bn_kernel, kh=KH, kw=KW, stride=s, dilation=d,
            th=TH, wo=Wo, cin=C, cout_p=cout_p)

        out = pl.pallas_call(
            kernel,
            out_shape=jax.ShapeDtypeStruct((N, Ho, Wo, cout_p), jnp.float32),
            grid_spec=pltpu.PrefetchScalarGridSpec(
                num_scalar_prefetch=0,
                grid=grid,
                in_specs=[
                    # Full padded input for batch n; resident across Ho tiles.
                    pl.BlockSpec((1, Hp, Wp, C), lambda n, t: (n, 0, 0, 0)),
                    # Whole (small) folded weight; grid-invariant.
                    pl.BlockSpec((KH, KW, C, cout_p), lambda n, t: (0, 0, 0, 0)),
                    # BN shift; grid-invariant.
                    pl.BlockSpec((1, cout_p), lambda n, t: (0, 0)),
                ],
                out_specs=pl.BlockSpec((1, TH, Wo, cout_p),
                                       lambda n, t: (n, t, 0, 0)),
            ),
            compiler_params=pltpu.CompilerParams(
                dimension_semantics=("parallel", "arbitrary")),
        )(x_pad, w_hwio, shift_p)

        # Drop Cout lane padding; restore PyTorch NCHW layout.
        # (Keep NHWC downstream if possible to skip this transpose.)
        out = out[..., :Cout]
        return jnp.transpose(out, (0, 3, 1, 2))


# ------------------------------ reference ------------------------------------
def _reference(module, x):
    """Same math as the kernel (bf16 operands, f32 accumulate) via XLA conv."""
    scale = module.gamma / jnp.sqrt(module.running_var + module.eps)
    shift = module.beta - module.running_mean * scale
    w_folded = (module.weight * scale[:, None, None, None]).astype(jnp.bfloat16)
    xb = x.astype(jnp.bfloat16)
    dn = jax.lax.conv_dimension_numbers(x.shape, module.weight.shape,
                                        ("NCHW", "OIHW", "NCHW"))
    y = jax.lax.conv_general_dilated(
        xb, w_folded,
        window_strides=(module.stride, module.stride),
        padding=[(module.padding, module.padding)] * 2,
        rhs_dilation=(module.dilation, module.dilation),
        dimension_numbers=dn,
        preferred_element_type=jnp.float32,
    )
    return y + shift[None, :, None, None]


if __name__ == "__main__":
    key = jax.random.PRNGKey(0)
    k_x, k_p = jax.random.split(key)

    # Small shapes consistent with the module: N=2, Cin=4, H=W=16, Cout=8, 3x3.
    x = jax.random.normal(k_x, (2, 4, 16, 16), jnp.float32)
    module = BasicConv2dPallas(in_planes=4, out_planes=8, kernel_size=3,
                               stride=1, padding=1, dilation=1, key=k_p)

    out = jax.block_until_ready(module(x))

    ref = _reference(module, x)
    np.testing.assert_allclose(np.asarray(out), np.asarray(ref),
                               rtol=2e-3, atol=2e-3)
    print("KERNEL_OK")
</pallas_src>

<mosaic_0001>
module attributes {stable_mosaic.version = 11 : i64} {
  func.func @_conv_bn_kernel(%arg0: i32, %arg1: i32, %arg2: memref<1x18x18x4xbf16, #tpu.memory_space<vmem>>, %arg3: memref<3x3x4x128xbf16, #tpu.memory_space<vmem>>, %arg4: memref<1x128xf32, #tpu.memory_space<vmem>>, %arg5: memref<1x16x16x128xf32, #tpu.memory_space<vmem>>) attributes {dimension_semantics = [#tpu.dimension_semantics<parallel>, #tpu.dimension_semantics<arbitrary>], iteration_bounds = array<i64: 2, 1>, scalar_prefetch = 0 : i64, scratch_operands = 0 : i64, tpu.core_type = #tpu.core_type<tc>, window_params = [{transform_indices = @transform_0, window_bounds = array<i64: 1, 18, 18, 4>}, {pipeline_mode = #tpu.pipeline_mode<synchronous>, transform_indices = @transform_1, window_bounds = array<i64: 3, 3, 4, 128>}, {pipeline_mode = #tpu.pipeline_mode<synchronous>, transform_indices = @transform_2, window_bounds = array<i64: 1, 128>}, {transform_indices = @transform_3, window_bounds = array<i64: 1, 16, 16, 128>}]} {
    %c16_i32 = arith.constant 16 : i32
    %0 = arith.muli %arg1, %c16_i32 : i32
    %cst = arith.constant 0.000000e+00 : f32
    %1 = vector.broadcast %cst : f32 to vector<256x128xf32>
    %c1_i32 = arith.constant 1 : i32
    %2 = arith.muli %0, %c1_i32 : i32
    %c0_i32 = arith.constant 0 : i32
    %3 = arith.addi %2, %c0_i32 : i32
    %c0 = arith.constant 0 : index
    %4 = arith.index_cast %3 : i32 to index
    %c0_0 = arith.constant 0 : index
    %c0_1 = arith.constant 0 : index
    %5 = vector.load %arg2[%c0, %4, %c0_0, %c0_1] : memref<1x18x18x4xbf16, #tpu.memory_space<vmem>>, vector<1x16x16x4xbf16>
    %6 = vector.shape_cast %5 : vector<1x16x16x4xbf16> to vector<16x16x4xbf16>
    %7 = vector.shape_cast %6 : vector<16x16x4xbf16> to vector<256x4xbf16>
    %c0_2 = arith.constant 0 : index
    %c0_3 = arith.constant 0 : index
    %c0_4 = arith.constant 0 : index
    %c0_5 = arith.constant 0 : index
    %8 = vector.load %arg3[%c0_2, %c0_3, %c0_4, %c0_5] : memref<3x3x4x128xbf16, #tpu.memory_space<vmem>>, vector<1x1x4x128xbf16>
    %9 = vector.shape_cast %8 : vector<1x1x4x128xbf16> to vector<4x128xbf16>
    %cst_6 = arith.constant dense<0.000000e+00> : vector<256x128xf32>
    %10 = tpu.matmul %7, %9, %cst_6 {dimension_numbers = #tpu.dot_dimension_numbers<[1], [0], [0], [1], [0, 0, 1, 1], [], []>} : vector<256x4xbf16>, vector<4x128xbf16>, vector<256x128xf32> -> vector<256x128xf32>
    %11 = arith.addf %1, %10 : vector<256x128xf32>
    %c1_i32_7 = arith.constant 1 : i32
    %12 = arith.muli %0, %c1_i32_7 : i32
    %c0_i32_8 = arith.constant 0 : i32
    %13 = arith.addi %12, %c0_i32_8 : i32
    %c0_9 = arith.constant 0 : index
    %14 = arith.index_cast %13 : i32 to index
    %c1 = arith.constant 1 : index
    %c0_10 = arith.constant 0 : index
    %15 = vector.load %arg2[%c0_9, %14, %c1, %c0_10] : memref<1x18x18x4xbf16, #tpu.memory_space<vmem>>, vector<1x16x16x4xbf16>
    %16 = vector.shape_cast %15 : vector<1x16x16x4xbf16> to vector<16x16x4xbf16>
    %17 = vector.shape_cast %16 : vector<16x16x4xbf16> to vector<256x4xbf16>
    %c0_11 = arith.constant 0 : index
    %c1_12 = arith.constant 1 : index
    %c0_13 = arith.constant 0 : index
    %c0_14 = arith.constant 0 : index
    %18 = vector.load %arg3[%c0_11, %c1_12, %c0_13, %c0_14] : memref<3x3x4x128xbf16, #tpu.memory_space<vmem>>, vector<1x1x4x128xbf16>
    %19 = vector.shape_cast %18 : vector<1x1x4x128xbf16> to vector<4x128xbf16>
    %cst_15 = arith.constant dense<0.000000e+00> : vector<256x128xf32>
    %20 = tpu.matmul %17, %19, %cst_15 {dimension_numbers = #tpu.dot_dimension_numbers<[1], [0], [0], [1], [0, 0, 1, 1], [], []>} : vector<256x4xbf16>, vector<4x128xbf16>, vector<256x128xf32> -> vector<256x128xf32>
    %21 = arith.addf %11, %20 : vector<256x128xf32>
    %c1_i32_16 = arith.constant 1 : i32
    %22 = arith.muli %0, %c1_i32_16 : i32
    %c0_i32_17 = arith.constant 0 : i32
    %23 = arith.addi %22, %c0_i32_17 : i32
    %c0_18 = arith.constant 0 : index
    %24 = arith.index_cast %23 : i32 to index
    %c2 = arith.constant 2 : index
    %c0_19 = arith.constant 0 : index
    %25 = vector.load %arg2[%c0_18, %24, %c2, %c0_19] : memref<1x18x18x4xbf16, #tpu.memory_space<vmem>>, vector<1x16x16x4xbf16>
    %26 = vector.shape_cast %25 : vector<1x16x16x4xbf16> to vector<16x16x4xbf16>
    %27 = vector.shape_cast %26 : vector<16x16x4xbf16> to vector<256x4xbf16>
    %c0_20 = arith.constant 0 : index
    %c2_21 = arith.constant 2 : index
    %c0_22 = arith.constant 0 : index
    %c0_23 = arith.constant 0 : index
    %28 = vector.load %arg3[%c0_20, %c2_21, %c0_22, %c0_23] : memref<3x3x4x128xbf16, #tpu.memory_space<vmem>>, vector<1x1x4x128xbf16>
    %29 = vector.shape_cast %28 : vector<1x1x4x128xbf16> to vector<4x128xbf16>
    %cst_24 = arith.constant dense<0.000000e+00> : vector<256x128xf32>
    %30 = tpu.matmul %27, %29, %cst_24 {dimension_numbers = #tpu.dot_dimension_numbers<[1], [0], [0], [1], [0, 0, 1, 1], [], []>} : vector<256x4xbf16>, vector<4x128xbf16>, vector<256x128xf32> -> vector<256x128xf32>
    %31 = arith.addf %21, %30 : vector<256x128xf32>
    %c1_i32_25 = arith.constant 1 : i32
    %32 = arith.muli %0, %c1_i32_25 : i32
    %c1_i32_26 = arith.constant 1 : i32
    %33 = arith.addi %32, %c1_i32_26 : i32
    %c0_27 = arith.constant 0 : index
    %34 = arith.index_cast %33 : i32 to index
    %c0_28 = arith.constant 0 : index
    %c0_29 = arith.constant 0 : index
    %35 = vector.load %arg2[%c0_27, %34, %c0_28, %c0_29] : memref<1x18x18x4xbf16, #tpu.memory_space<vmem>>, vector<1x16x16x4xbf16>
    %36 = vector.shape_cast %35 : vector<1x16x16x4xbf16> to vector<16x16x4xbf16>
    %37 = vector.shape_cast %36 : vector<16x16x4xbf16> to vector<256x4xbf16>
    %c1_30 = arith.constant 1 : index
    %c0_31 = arith.constant 0 : index
    %c0_32 = arith.constant 0 : index
    %c0_33 = arith.constant 0 : index
    %38 = vector.load %arg3[%c1_30, %c0_31, %c0_32, %c0_33] : memref<3x3x4x128xbf16, #tpu.memory_space<vmem>>, vector<1x1x4x128xbf16>
    %39 = vector.shape_cast %38 : vector<1x1x4x128xbf16> to vector<4x128xbf16>
    %cst_34 = arith.constant dense<0.000000e+00> : vector<256x128xf32>
    %40 = tpu.matmul %37, %39, %cst_34 {dimension_numbers = #tpu.dot_dimension_numbers<[1], [0], [0], [1], [0, 0, 1, 1], [], []>} : vector<256x4xbf16>, vector<4x128xbf16>, vector<256x128xf32> -> vector<256x128xf32>
    %41 = arith.addf %31, %40 : vector<256x128xf32>
    %c1_i32_35 = arith.constant 1 : i32
    %42 = arith.muli %0, %c1_i32_35 : i32
    %c1_i32_36 = arith.constant 1 : i32
    %43 = arith.addi %42, %c1_i32_36 : i32
    %c0_37 = arith.constant 0 : index
    %44 = arith.index_cast %43 : i32 to index
    %c1_38 = arith.constant 1 : index
    %c0_39 = arith.constant 0 : index
    %45 = vector.load %arg2[%c0_37, %44, %c1_38, %c0_39] : memref<1x18x18x4xbf16, #tpu.memory_space<vmem>>, vector<1x16x16x4xbf16>
    %46 = vector.shape_cast %45 : vector<1x16x16x4xbf16> to vector<16x16x4xbf16>
    %47 = vector.shape_cast %46 : vector<16x16x4xbf16> to vector<256x4xbf16>
    %c1_40 = arith.constant 1 : index
    %c1_41 = arith.constant 1 : index
    %c0_42 = arith.constant 0 : index
    %c0_43 = arith.constant 0 : index
    %48 = vector.load %arg3[%c1_40, %c1_41, %c0_42, %c0_43] : memref<3x3x4x128xbf16, #tpu.memory_space<vmem>>, vector<1x1x4x128xbf16>
    %49 = vector.shape_cast %48 : vector<1x1x4x128xbf16> to vector<4x128xbf16>
    %cst_44 = arith.constant dense<0.000000e+00> : vector<256x128xf32>
    %50 = tpu.matmul %47, %49, %cst_44 {dimension_numbers = #tpu.dot_dimension_numbers<[1], [0], [0], [1], [0, 0, 1, 1], [], []>} : vector<256x4xbf16>, vector<4x128xbf16>, vector<256x128xf32> -> vector<256x128xf32>
    %51 = arith.addf %41, %50 : vector<256x128xf32>
    %c1_i32_45 = arith.constant 1 : i32
    %52 = arith.muli %0, %c1_i32_45 : i32
    %c1_i32_46 = arith.constant 1 : i32
    %53 = arith.addi %52, %c1_i32_46 : i32
    %c0_47 = arith.constant 0 : index
    %54 = arith.index_cast %53 : i32 to index
    %c2_48 = arith.constant 2 : index
    %c0_49 = arith.constant 0 : index
    %55 = vector.load %arg2[%c0_47, %54, %c2_48, %c0_49] : memref<1x18x18x4xbf16, #tpu.memory_space<vmem>>, vector<1x16x16x4xbf16>
    %56 = vector.shape_cast %55 : vector<1x16x16x4xbf16> to vector<16x16x4xbf16>
    %57 = vector.shape_cast %56 : vector<16x16x4xbf16> to vector<256x4xbf16>
    %c1_50 = arith.constant 1 : index
    %c2_51 = arith.constant 2 : index
    %c0_52 = arith.constant 0 : index
    %c0_53 = arith.constant 0 : index
    %58 = vector.load %arg3[%c1_50, %c2_51, %c0_52, %c0_53] : memref<3x3x4x128xbf16, #tpu.memory_space<vmem>>, vector<1x1x4x128xbf16>
    %59 = vector.shape_cast %58 : vector<1x1x4x128xbf16> to vector<4x128xbf16>
    %cst_54 = arith.constant dense<0.000000e+00> : vector<256x128xf32>
    %60 = tpu.matmul %57, %59, %cst_54 {dimension_numbers = #tpu.dot_dimension_numbers<[1], [0], [0], [1], [0, 0, 1, 1], [], []>} : vector<256x4xbf16>, vector<4x128xbf16>, vector<256x128xf32> -> vector<256x128xf32>
    %61 = arith.addf %51, %60 : vector<256x128xf32>
    %c1_i32_55 = arith.constant 1 : i32
    %62 = arith.muli %0, %c1_i32_55 : i32
    %c2_i32 = arith.constant 2 : i32
    %63 = arith.addi %62, %c2_i32 : i32
    %c0_56 = arith.constant 0 : index
    %64 = arith.index_cast %63 : i32 to index
    %c0_57 = arith.constant 0 : index
    %c0_58 = arith.constant 0 : index
    %65 = vector.load %arg2[%c0_56, %64, %c0_57, %c0_58] : memref<1x18x18x4xbf16, #tpu.memory_space<vmem>>, vector<1x16x16x4xbf16>
    %66 = vector.shape_cast %65 : vector<1x16x16x4xbf16> to vector<16x16x4xbf16>
    %67 = vector.shape_cast %66 : vector<16x16x4xbf16> to vector<256x4xbf16>
    %c2_59 = arith.constant 2 : index
    %c0_60 = arith.constant 0 : index
    %c0_61 = arith.constant 0 : index
    %c0_62 = arith.constant 0 : index
    %68 = vector.load %arg3[%c2_59, %c0_60, %c0_61, %c0_62] : memref<3x3x4x128xbf16, #tpu.memory_space<vmem>>, vector<1x1x4x128xbf16>
    %69 = vector.shape_cast %68 : vector<1x1x4x128xbf16> to vector<4x128xbf16>
    %cst_63 = arith.constant dense<0.000000e+00> : vector<256x128xf32>
    %70 = tpu.matmul %67, %69, %cst_63 {dimension_numbers = #tpu.dot_dimension_numbers<[1], [0], [0], [1], [0, 0, 1, 1], [], []>} : vector<256x4xbf16>, vector<4x128xbf16>, vector<256x128xf32> -> vector<256x128xf32>
    %71 = arith.addf %61, %70 : vector<256x128xf32>
    %c1_i32_64 = arith.constant 1 : i32
    %72 = arith.muli %0, %c1_i32_64 : i32
    %c2_i32_65 = arith.constant 2 : i32
    %73 = arith.addi %72, %c2_i32_65 : i32
    %c0_66 = arith.constant 0 : index
    %74 = arith.index_cast %73 : i32 to index
    %c1_67 = arith.constant 1 : index
    %c0_68 = arith.constant 0 : index
    %75 = vector.load %arg2[%c0_66, %74, %c1_67, %c0_68] : memref<1x18x18x4xbf16, #tpu.memory_space<vmem>>, vector<1x16x16x4xbf16>
    %76 = vector.shape_cast %75 : vector<1x16x16x4xbf16> to vector<16x16x4xbf16>
    %77 = vector.shape_cast %76 : vector<16x16x4xbf16> to vector<256x4xbf16>
    %c2_69 = arith.constant 2 : index
    %c1_70 = arith.constant 1 : index
    %c0_71 = arith.constant 0 : index
    %c0_72 = arith.constant 0 : index
    %78 = vector.load %arg3[%c2_69, %c1_70, %c0_71, %c0_72] : memref<3x3x4x128xbf16, #tpu.memory_space<vmem>>, vector<1x1x4x128xbf16>
    %79 = vector.shape_cast %78 : vector<1x1x4x128xbf16> to vector<4x128xbf16>
    %cst_73 = arith.constant dense<0.000000e+00> : vector<256x128xf32>
    %80 = tpu.matmul %77, %79, %cst_73 {dimension_numbers = #tpu.dot_dimension_numbers<[1], [0], [0], [1], [0, 0, 1, 1], [], []>} : vector<256x4xbf16>, vector<4x128xbf16>, vector<256x128xf32> -> vector<256x128xf32>
    %81 = arith.addf %71, %80 : vector<256x128xf32>
    %c1_i32_74 = arith.constant 1 : i32
    %82 = arith.muli %0, %c1_i32_74 : i32
    %c2_i32_75 = arith.constant 2 : i32
    %83 = arith.addi %82, %c2_i32_75 : i32
    %c0_76 = arith.constant 0 : index
    %84 = arith.index_cast %83 : i32 to index
    %c2_77 = arith.constant 2 : index
    %c0_78 = arith.constant 0 : index
    %85 = vector.load %arg2[%c0_76, %84, %c2_77, %c0_78] : memref<1x18x18x4xbf16, #tpu.memory_space<vmem>>, vector<1x16x16x4xbf16>
    %86 = vector.shape_cast %85 : vector<1x16x16x4xbf16> to vector<16x16x4xbf16>
    %87 = vector.shape_cast %86 : vector<16x16x4xbf16> to vector<256x4xbf16>
    %c2_79 = arith.constant 2 : index
    %c2_80 = arith.constant 2 : index
    %c0_81 = arith.constant 0 : index
    %c0_82 = arith.constant 0 : index
    %88 = vector.load %arg3[%c2_79, %c2_80, %c0_81, %c0_82] : memref<3x3x4x128xbf16, #tpu.memory_space<vmem>>, vector<1x1x4x128xbf16>
    %89 = vector.shape_cast %88 : vector<1x1x4x128xbf16> to vector<4x128xbf16>
    %cst_83 = arith.constant dense<0.000000e+00> : vector<256x128xf32>
    %90 = tpu.matmul %87, %89, %cst_83 {dimension_numbers = #tpu.dot_dimension_numbers<[1], [0], [0], [1], [0, 0, 1, 1], [], []>} : vector<256x4xbf16>, vector<4x128xbf16>, vector<256x128xf32> -> vector<256x128xf32>
    %91 = arith.addf %81, %90 : vector<256x128xf32>
    %c0_84 = arith.constant 0 : index
    %c0_85 = arith.constant 0 : index
    %92 = vector.load %arg4[%c0_84, %c0_85] : memref<1x128xf32, #tpu.memory_space<vmem>>, vector<1x128xf32>
    %93 = vector.broadcast %92 : vector<1x128xf32> to vector<256x128xf32>
    %94 = arith.addf %91, %93 : vector<256x128xf32>
    %95 = vector.shape_cast %94 : vector<256x128xf32> to vector<1x16x16x128xf32>
    %c0_86 = arith.constant 0 : index
    %c0_87 = arith.constant 0 : index
    %c0_88 = arith.constant 0 : index
    %c0_89 = arith.constant 0 : index
    %96 = vector.load %arg5[%c0_86, %c0_87, %c0_88, %c0_89] : memref<1x16x16x128xf32, #tpu.memory_space<vmem>>, vector<1x16x16x128xf32>
    tpu.vector_store %arg5[%c0_86, %c0_87, %c0_88, %c0_89], %95 {strides = array<i32>} : memref<1x16x16x128xf32, #tpu.memory_space<vmem>>, vector<1x16x16x128xf32>,
    return
  }
  func.func @transform_0(%arg0: i32, %arg1: i32) -> (i32, i32, i32, i32) {
    %c0_i32 = arith.constant 0 : i32
    %c0_i32_0 = arith.constant 0 : i32
    %c0_i32_1 = arith.constant 0 : i32
    %c0_i32_2 = arith.constant 0 : i32
    return %arg0, %c0_i32, %c0_i32_0, %c0_i32_1 : i32, i32, i32, i32
  }
  func.func @transform_1(%arg0: i32, %arg1: i32) -> (i32, i32, i32, i32) {
    %c0_i32 = arith.constant 0 : i32
    %c0_i32_0 = arith.constant 0 : i32
    %c0_i32_1 = arith.constant 0 : i32
    %c0_i32_2 = arith.constant 0 : i32
    %c0_i32_3 = arith.constant 0 : i32
    return %c0_i32, %c0_i32_0, %c0_i32_1, %c0_i32_2 : i32, i32, i32, i32
  }
  func.func @transform_2(%arg0: i32, %arg1: i32) -> (i32, i32) {
    %c0_i32 = arith.constant 0 : i32
    %c0_i32_0 = arith.constant 0 : i32
    %c0_i32_1 = arith.constant 0 : i32
    return %c0_i32, %c0_i32_0 : i32, i32
  }
  func.func @transform_3(%arg0: i32, %arg1: i32) -> (i32, i32, i32, i32) {
    %c0_i32 = arith.constant 0 : i32
    %c0_i32_0 = arith.constant 0 : i32
    %c0_i32_1 = arith.constant 0 : i32
    return %arg0, %arg1, %c0_i32, %c0_i32_0 : i32, i32, i32, i32
  }
}

</mosaic_0001>

<bundles_post_ra>
// kernel: a_call__.1
= control target key start
LH: loop header
LB: loop body
LE: loop exit
PB: predicated region body
PF: predicated region fallthrough
CT: control target
= control target key end

     0   :  { %s6072_s12 = smov 0   ;;  %s6074_s13 = smov 0   ;;  %s8733_s0 = inlined_call_operand.vmem [shape: bf16[2,18,18,4], index: 0, kind: input, shape index: {}]   ;;  %s8734_s1 = inlined_call_operand.vmem [shape: bf16[3,3,4,128], index: 1, kind: input, shape index: {}]   ;;  %s8735_s2 = inlined_call_operand.vmem [shape: f32[1,128], index: 2, kind: input, shape index: {}]   ;;  %s8736_s3 = inlined_call_operand.vmem [shape: f32[2,16,16,128], index: 3, kind: output, shape index: {}]  }
   0x1   :  { %s6076_s14 = smov 0  }
   0x2 LB: > { %s25_s15 = sadd.s32 1, %s6046_s13  ;;  %p4938_p0 = scmp.ge.s32.totalorder %s6050_s14, 1  ;;  %s6050_s14 = sphi %s6076_s14, %s13_s14   ;;  %s6046_s13 = sphi %s6074_s13, %s9010_s13   ;;  %s6042_s12 = sphi %s6072_s12, %s9009_s12  }
   0x3   : > { %p27_p1 = scmp.ge.s32.totalorder %s25_s15, 2  ;;  %p151_p2 = scmp.lt.s32.totalorder %s6050_s14, 3 }
   0x5   : > { %s9012_s15 = smov (%p27_p1, %s25_s15), 0  ;;  %p152_p3 = pnand %p4938_p0, %p151_p2 }
   0x7   : > { %155 = sbr.rel (%p152_p3) target bundleno = 555 (0x22b), region = 32 }
   0xc   : > { %v4942_v0 = vld [vmem:[%s8734_s1 + $0x2] sm:$0x3]  ;;  %vm736_vm0 = vcmask 1041408   ;;  %p180_p4 = scmp.lt.s32.totalorder %s6042_s12, 1  ;;  %v233_v2 = vld [vmem:[%s8734_s1] sm:$0x3] }
   0xd   : > { %5944 = vmatprep.subr.msk.bf16.mxu1 %vm736_vm0, %v4942_v0  ;;  %5943 = vmatprep.subr.msk.bf16.mxu0 %vm736_vm0, %v4942_v0  ;;  %v738_v1 = vsel %vm736_vm0, %v4942_v0, 0  ;;  %v5023_v3 = vld [vmem:[%s8734_s1 + $0x4] sm:$0x3]  ;;  %vm250_vm1 = vsmask.f32 3328  ;;  %v6113_v4 = vsel %vm736_vm0, %v233_v2, 0 }
   0xe   : > { %5942 = vmatpush3.bf16.msra.mxu1 %v738_v1  ;;  %5636 = vmatpush3.bf16.msra.mxu0 %v738_v1  ;;  %s9014_s12 = smov (!%p180_p4, %s6042_s12), 1  ;;  %vm251_vm2 = vsmask.f32 7440  ;;  %vm687_vm3 = vcmask 31744   ;;  %v6139_v16 = vsel %vm736_vm0, %v5023_v3, 0  ;;  %vm1241_vm5 = vcmask 1042432  }
   0xf   : > { %5945 = vmatprep.subr.msk.bf16.mxu1 %vm736_vm0, %v233_v2  ;;  %5946 = vmatprep.subr.msk.bf16.mxu0 %vm736_vm0, %v5023_v3  ;;  %s5953_s22 = smul.u32 216, %s9014_s12  ;;  %vm6154_vm4 = vmor %vm250_vm1, %vm251_vm2  ;;  %vm1242_vm6 = vcmask 1046532   ;;  %s5481_s11 = sshll.u32 %s9014_s12, 8 }
  0x10   : > { %vm6440_vm7 = vmor %vm1241_vm5, %vm1242_vm6  ;;  %s8577_s19 = scalar_lea.vmem %s8736_s3, %s5481_s11 }
  0x11   : > { %s6110_s25 = scalar_lea.vmem %s8733_s0, %s5953_s22 }
  0x12   : > { %v6116_v5 = vld [vmem:[%s6110_s25] sm:$0xf]  ;;  %v6119_v6 = vld [vmem:[%s6110_s25 + $0x4] sm:$0xf]  ;;  %v6122_v7 = vld [vmem:[%s6110_s25 + $0x8] sm:$0x1] }
  0x13   : > { %v254_v8 = vshrl.u32 %v6116_v5, 16  ;;  %v257_v9 = vshll.u32 %v6116_v5, 16  ;;  %v263_v10 = vshll.u32 %v6119_v6, 16  ;;  %v267_v11 = vshrl.u32 %v6119_v6, 16  ;;  %v6129_v12 = vld [vmem:[%s6110_s25 + $0x60] sm:$0xf] }
  0x14   : > { %v273_v13 = vshll.u32 %v6122_v7, 16  ;;  %v6133_v14 = vld [vmem:[%s6110_s25 + $0x64] sm:$0xf]  ;;  %v6136_v15 = vld [vmem:[%s6110_s25 + $0x68] sm:$0x1]  ;;  %v446_v22 = vshrl.u32 %v6129_v12, 16 }
  0x15   : > { %v256_v17 = vrot.slane %v254_v8, 4  ;;  %v259_v18 = vrot.slane %v257_v9, 5  ;;  %v265_v19 = vrot.slane %v263_v10, 5  ;;  %v269_v20 = vrot.slane %v267_v11, 4  ;;  %v6147_v29 = vld [vmem:[%s6110_s25 + $0xc] sm:$0xf] }
  0x16   : > { %v275_v21 = vrot.slane %v273_v13, 5  ;;  %v449_v23 = vshll.u32 %v6129_v12, 16  ;;  %v455_v24 = vshll.u32 %v6133_v14, 16  ;;  %v459_v27 = vshrl.u32 %v6133_v14, 16  ;;  %v6150_v30 = vld [vmem:[%s6110_s25 + $0x10] sm:$0xf] }
  0x17   : > { %v260_v25 = vor.u32 %v259_v18, %v256_v17  ;;  %v270_v26 = vor.u32 %v269_v20, %v265_v19  ;;  %v465_v28 = vshll.u32 %v6136_v15, 16  ;;  %v448_v33 = vrot.slane %v446_v22, 4  ;;  %v6160_v41 = vld [vmem:[%s6110_s25 + $0x14] sm:$0x1]  ;;  %v6171_v53 = vld [vmem:[%s6110_s25 + $0x6c] sm:$0xf] }
  0x18   : > { %v451_v34 = vrot.slane %v449_v23, 5  ;;  %v457_v35 = vrot.slane %v455_v24, 5  ;;  %v461_v38 = vrot.slane %v459_v27, 4  ;;  %v278_v42 = vshrl.u32 %v6147_v29, 16  ;;  %v6175_v58 = vld [vmem:[%s6110_s25 + $0x70] sm:$0xf] }
  0x19   : > { %v261_v36 = vrot.slane %v260_v25, 4  ;;  %v271_v37 = vrot.slane %v270_v26, 4  ;;  %v467_v39 = vrot.slane %v465_v28, 5  ;;  %v281_v43 = vshll.u32 %v6147_v29, 16  ;;  %v6183_v63 = vld [vmem:[%s6110_s25 + $0x74] sm:$0x1] }
  0x1a   : > { %v452_v40 = vor.u32 %v451_v34, %v448_v33  ;;  %v287_v44 = vshll.u32 %v6150_v30, 16  ;;  %v462_v47 = vor.u32 %v461_v38, %v457_v35  ;;  %v291_v48 = vshrl.u32 %v6150_v30, 16  ;;  %v6189_v8 = vld [vmem:[%s6110_s25 + $0x18] sm:$0xf]  ;;  %v6202_v25 = vld [vmem:[%s6110_s25 + $0x20] sm:$0x1] }
  0x1b   : > { %v266_v45 = vsel %vm6154_vm4, %v261_v36, %v265_v19  ;;  %v276_v46 = vsel %vm6154_vm4, %v271_v37, %v275_v21  ;;  %v280_v51 = vrot.slane %v278_v42, 4  ;;  %v283_v52 = vrot.slane %v281_v43, 5  ;;  %v6196_v21 = vld [vmem:[%s6110_s25 + $0x1c] sm:$0xf] }
  0x1c   : > { %v4943_v49 = vcombine.low %v266_v45, %v276_v46  ;;  %v453_v50 = vrot.slane %v452_v40, 4  ;;  %v463_v54 = vrot.slane %v462_v47, 4  ;;  %v289_v55 = vrot.slane %v287_v44, 5  ;;  %v6215_v40 = vld [vmem:[%s8734_s1 + $0x8] sm:$0x3] }
  0x1d   : > { %v293_v56 = vrot.slane %v291_v48, 4  ;;  %v297_v57 = vshll.u32 %v6160_v41, 16  ;;  %v284_v60 = vor.u32 %v283_v52, %v280_v51  ;;  %v470_v3 = vshrl.u32 %v6171_v53, 16  ;;  %v6220_v46 = vld [vmem:[%s6110_s25 + $0x7c] sm:$0xf] }
  0x1e   : > { %5637 = vmatprep.mubr.msk.bf16.mxu0 %vm687_vm3, %v4943_v49  ;;  %v458_v59 = vsel %vm6154_vm4, %v453_v50, %v457_v35  ;;  %v468_v0 = vsel %vm6154_vm4, %v463_v54, %v467_v39  ;;  %v473_v11 = vshll.u32 %v6171_v53, 16  ;;  %v479_v13 = vshll.u32 %v6175_v58, 16  ;;  %v6209_v35 = vld [vmem:[%s6110_s25 + $0x78] sm:$0xf] }
  0x1f   : > { %v294_v1 = vor.u32 %v293_v56, %v289_v55  ;;  %v299_v2 = vrot.slane %v297_v57, 5  ;;  %v4951_v9 = vcombine.low %v458_v59, %v468_v0  ;;  %v285_v10 = vrot.slane %v284_v60, 4  ;;  %v6227_v56 = vld [vmem:[%s6110_s25 + $0x80] sm:$0x1] }
  0x20   : > { %v472_v18 = vrot.slane %v470_v3, 4  ;;  %v483_v19 = vshrl.u32 %v6175_v58, 16  ;;  %v489_v20 = vshll.u32 %v6183_v63, 16  ;;  %v475_v23 = vrot.slane %v473_v11, 5  ;;  %8772 = vst [vmem:[#allocation2_spill] sm:$0xff] %v6227_v56 }
  0x21   : > { %v295_v17 = vrot.slane %v294_v1, 4  ;;  %5653 = vmatprep.mubr.msk.bf16.mxu1 %vm687_vm3, %v4951_v9  ;;  %v290_v22 = vsel %vm6154_vm4, %v285_v10, %v289_v55  ;;  %v481_v24 = vrot.slane %v479_v13, 5  ;;  %v302_v26 = vshrl.u32 %v6189_v8, 16  ;;  %v6233_v1 = vld [vmem:[%s6110_s25 + $0x24] sm:$0xf] }
  0x22   : > { %v485_v28 = vrot.slane %v483_v19, 4  ;;  %v491_v33 = vrot.slane %v489_v20, 5  ;;  %v305_v34 = vshll.u32 %v6189_v8, 16  ;;  %v476_v37 = vor.u32 %v475_v23, %v472_v18  ;;  %v6241_v10 = vld [vmem:[%s6110_s25 + $0x28] sm:$0xf] }
  0x23   : > { %v300_v27 = vsel %vm6154_vm4, %v295_v17, %v299_v2  ;;  %v304_v38 = vrot.slane %v302_v26, 4  ;;  %v311_v39 = vshll.u32 %v6196_v21, 16  ;;  %v315_v44 = vshrl.u32 %v6196_v21, 16  ;;  %v6247_v19 = vld [vmem:[%s8734_s1 + $0x6] sm:$0x3] }
  0x24   : > { %v4944_v36 = vcombine.low %v290_v22, %v300_v27  ;;  %v486_v42 = vor.u32 %v485_v28, %v481_v24  ;;  %v307_v43 = vrot.slane %v305_v34, 5  ;;  %v321_v45 = vshll.u32 %v6202_v25, 16 }
  0x25   : > { %v477_v47 = vrot.slane %v476_v37, 4  ;;  %v313_v48 = vrot.slane %v311_v39, 5  ;;  %v494_v49 = vshrl.u32 %v6209_v35, 16  ;;  %v497_v50 = vshll.u32 %v6209_v35, 16 }
  0x26   : > { %5638 = vmatmul.mubr.msk.bf16.vlgmr.msra.gmra.mxu0 %vm687_vm3, %v4944_v36  ;;  %v487_v51 = vrot.slane %v486_v42, 4  ;;  %v308_v52 = vor.u32 %v307_v43, %v304_v38  ;;  %v317_v54 = vrot.slane %v315_v44, 4  ;;  %v323_v55 = vrot.slane %v321_v45, 5  ;;  %v6259_v36 = vld [vmem:[%s6110_s25 + $0x84] sm:$0xf] }
  0x27   : > { %5704 = vmatpush3.bf16.msra.mxu0 %v6139_v16  ;;  %v482_v57 = vsel %vm6154_vm4, %v477_v47, %v481_v24  ;;  %v496_v59 = vrot.slane %v494_v49, 4  ;;  %v499_v60 = vrot.slane %v497_v50, 5  ;;  %v503_v0 = vshll.u32 %v6220_v46, 16  ;;  %v6252_v24 = vld [vmem:[%s6110_s25 + $0x2c] sm:$0x1] }
  0x28   : > { %5948 = vmatprep.subr.msk.bf16.mxu0 %vm736_vm0, %v6215_v40  ;;  %v492_v16 = vsel %vm6154_vm4, %v487_v51, %v491_v33  ;;  %v309_v2 = vrot.slane %v308_v52, 4  ;;  %v318_v3 = vor.u32 %v317_v54, %v313_v48  ;;  %v507_v9 = vshrl.u32 %v6220_v46, 16  ;;  %v6266_v43 = vld [vmem:[%s6110_s25 + $0x88] sm:$0xf]  ;;  %v6274_v51 = vld [vmem:[%s6110_s25 + $0x8c] sm:$0x1] }
  0x29   : > { %v4952_v11 = vcombine.low %v482_v57, %v492_v16  ;;  %v500_v13 = vor.u32 %v499_v60, %v496_v59  ;;  %v505_v17 = vrot.slane %v503_v0, 5  ;;  %v513_v18 = vshll.u32 %v6227_v56, 16  ;;  %8773 = vst [vmem:[#allocation3_spill] sm:$0xff] %v6274_v51  ;;  %v6282_v60 = vld [vmem:[%s6110_s25 + $0x30] sm:$0xf] }
  0x2a   : > { %v314_v20 = vsel %vm6154_vm4, %v309_v2, %v313_v48  ;;  %v319_v22 = vrot.slane %v318_v3, 4  ;;  %v509_v23 = vrot.slane %v507_v9, 4  ;;  %v326_v26 = vshrl.u32 %v6233_v1, 16  ;;  %v6287_v9 = vld [vmem:[%s6110_s25 + $0x34] sm:$0xf] }
  0x2b   : > { %5654 = vmatmul.mubr.msk.bf16.vlgmr.msra.gmra.mxu1 %vm687_vm3, %v4952_v11  ;;  %v501_v27 = vrot.slane %v500_v13, 4  ;;  %v515_v28 = vrot.slane %v513_v18, 5  ;;  %v329_v33 = vshll.u32 %v6233_v1, 16  ;;  %v335_v34 = vshll.u32 %v6241_v10, 16 }
  0x2c   : > { %5670 = vmatpush3.bf16.msra.mxu1 %v6113_v4  ;;  %v324_v37 = vsel %vm6154_vm4, %v319_v22, %v323_v55  ;;  %v510_v38 = vor.u32 %v509_v23, %v505_v17  ;;  %v328_v39 = vrot.slane %v326_v26, 4  ;;  %v339_v42 = vshrl.u32 %v6241_v10, 16 }
  0x2d   : > { %v4945_v44 = vcombine.low %v314_v20, %v324_v37  ;;  %v506_v45 = vsel %vm6154_vm4, %v501_v27, %v505_v17  ;;  %v331_v47 = vrot.slane %v329_v33, 5  ;;  %v337_v48 = vrot.slane %v335_v34, 5  ;;  %5947 = vmatprep.subr.msk.bf16.mxu1 %vm736_vm0, %v6247_v19  ;;  %v6295_v33 = vld [vmem:[%s6110_s25 + $0x38] sm:$0x1] }
  0x2e   : > { %v511_v4 = vrot.slane %v510_v38, 4  ;;  %v341_v49 = vrot.slane %v339_v42, 4  ;;  %v345_v50 = vshll.u32 %v6252_v24, 16  ;;  %v518_v52 = vshrl.u32 %v6259_v36, 16  ;;  %v6300_v38 = vld [vmem:[%s6110_s25 + $0x90] sm:$0xf] }
  0x2f   : > { %5641 = vmatprep.mubr.msk.bf16.mxu0 %vm687_vm3, %v4945_v44  ;;  %v332_v54 = vor.u32 %v331_v47, %v328_v39  ;;  %v521_v55 = vshll.u32 %v6259_v36, 16  ;;  %v527_v57 = vshll.u32 %v6266_v43, 16  ;;  %v531_v59 = vshrl.u32 %v6266_v43, 16  ;;  %8774 = vst [vmem:[#allocation4_spill] sm:$0xff] %v6300_v38  ;;  %v6305_v47 = vld [vmem:[%s6110_s25 + $0x94] sm:$0xf] }
  0x30   : > { %v516_v0 = vsel %vm6154_vm4, %v511_v4, %v515_v28  ;;  %v342_v16 = vor.u32 %v341_v49, %v337_v48  ;;  %v347_v2 = vrot.slane %v345_v50, 5  ;;  %v520_v3 = vrot.slane %v518_v52, 4  ;;  %8775 = vst [vmem:[#allocation5_spill] sm:$0xff] %v6305_v47 }
  0x31   : > { %v4953_v11 = vcombine.low %v506_v45, %v516_v0  ;;  %v333_v13 = vrot.slane %v332_v54, 4  ;;  %v523_v17 = vrot.slane %v521_v55, 5  ;;  %v529_v18 = vrot.slane %v527_v57, 5 }
  0x32   : > { %v343_v20 = vrot.slane %v342_v16, 4  ;;  %v533_v22 = vrot.slane %v531_v59, 4  ;;  %v537_v23 = vshll.u32 %v6274_v51, 16  ;;  %v350_v26 = vshrl.u32 %v6282_v60, 16  ;;  %v6314_v16 = vld [vmem:[%s6110_s25 + $0x98] sm:$0x1] }
  0x33   : > { %5657 = vmatprep.mubr.msk.bf16.mxu1 %vm687_vm3, %v4953_v11  ;;  %v338_v27 = vsel %vm6154_vm4, %v333_v13, %v337_v48  ;;  %v524_v28 = vor.u32 %v523_v17, %v520_v3  ;;  %v353_v34 = vshll.u32 %v6282_v60, 16  ;;  %v359_v37 = vshll.u32 %v6287_v9, 16  ;;  %8776 = vst [vmem:[#allocation6_spill] sm:$0xff] %v6314_v16  ;;  %v6319_v11 = vld [vmem:[%s6110_s25 + $0x3c] sm:$0xf] }
  0x34   : > { %v348_v39 = vsel %vm6154_vm4, %v343_v20, %v347_v2  ;;  %v534_v42 = vor.u32 %v533_v22, %v529_v18  ;;  %v539_v44 = vrot.slane %v537_v23, 5  ;;  %v352_v45 = vrot.slane %v350_v26, 4  ;;  %v6324_v23 = vld [vmem:[%s6110_s25 + $0x40] sm:$0xf]  ;;  %v1194_v51 = vld [vmem:[%s6110_s25 + $0xc] sm:$0xe] }
  0x35   : > { %v4946_v48 = vcombine.low %v338_v27, %v348_v39  ;;  %v525_v4 = vrot.slane %v524_v28, 4  ;;  %v355_v49 = vrot.slane %v353_v34, 5  ;;  %v361_v50 = vrot.slane %v359_v37, 5 }
  0x36   : > { %v535_v52 = vrot.slane %v534_v42, 4  ;;  %v363_v54 = vshrl.u32 %v6287_v9, 16  ;;  %v369_v55 = vshll.u32 %v6295_v33, 16  ;;  %v542_v57 = vshrl.u32 %v6300_v38, 16 }
  0x37   : > { %5642 = vmatmul.mubr.msk.bf16.gmra.mxu0 %vm687_vm3, %v4946_v48  ;;  %v530_v59 = vsel %vm6154_vm4, %v525_v4, %v529_v18  ;;  %v356_v0 = vor.u32 %v355_v49, %v352_v45  ;;  %v545_v2 = vshll.u32 %v6300_v38, 16  ;;  %v551_v3 = vshll.u32 %v6305_v47, 16  ;;  %v6333_v48 = vld [vmem:[%s6110_s25 + $0x44] sm:$0x1] }
  0x38   : > { %v540_v13 = vsel %vm6154_vm4, %v535_v52, %v539_v44  ;;  %v365_v17 = vrot.slane %v363_v54, 4  ;;  %v371_v20 = vrot.slane %v369_v55, 5  ;;  %v544_v22 = vrot.slane %v542_v57, 4  ;;  %v6338_v52 = vld [vmem:[%s6110_s25 + $0x9c] sm:$0xf] }
  0x39   : > { %v4954_v18 = vcombine.low %v530_v59, %v540_v13  ;;  %v357_v26 = vrot.slane %v356_v0, 4  ;;  %v547_v27 = vrot.slane %v545_v2, 5  ;;  %v553_v28 = vrot.slane %v551_v3, 5  ;;  %8777 = vst [vmem:[#allocation7_spill] sm:$0xff] %v6338_v52  ;;  %v6342_v13 = vld [vmem:[%s6110_s25 + $0xa0] sm:$0xf] }
  0x3a   : > { %v366_v34 = vor.u32 %v365_v17, %v361_v50  ;;  %v555_v37 = vshrl.u32 %v6305_v47, 16  ;;  %v561_v39 = vshll.u32 %v6314_v16, 16  ;;  %v374_v42 = vshrl.u32 %v6319_v11, 16  ;;  %8778 = vst [vmem:[#allocation8_spill] sm:$0xff] %v6342_v13 }
  0x3b   : > { %5658 = vmatmul.mubr.msk.bf16.gmra.mxu1 %vm687_vm3, %v4954_v18  ;;  %v362_v44 = vsel %vm6154_vm4, %v357_v26, %v361_v50  ;;  %v548_v45 = vor.u32 %v547_v27, %v544_v22  ;;  %v377_v4 = vshll.u32 %v6319_v11, 16  ;;  %v383_v49 = vshll.u32 %v6324_v23, 16  ;;  %v6348_v26 = vld [vmem:[%s6110_s25 + $0xa4] sm:$0x1] }
  0x3c   : > { %v367_v54 = vrot.slane %v366_v34, 4  ;;  %v557_v55 = vrot.slane %v555_v37, 4  ;;  %v563_v57 = vrot.slane %v561_v39, 5  ;;  %v376_v59 = vrot.slane %v374_v42, 4  ;;  %8779 = vst [vmem:[#allocation9_spill] sm:$0xff] %v6348_v26 }
  0x3d   : > { %v549_v0 = vrot.slane %v548_v45, 4  ;;  %v379_v2 = vrot.slane %v377_v4, 5  ;;  %v385_v3 = vrot.slane %v383_v49, 5  ;;  %v387_v50 = vshrl.u32 %v6324_v23, 16  ;;  %v6352_v34 = vld [vmem:[%s6110_s25 + $0x48] sm:$0xf] }
  0x3e   : > { %v372_v17 = vsel %vm6154_vm4, %v367_v54, %v371_v20  ;;  %v558_v22 = vor.u32 %v557_v55, %v553_v28  ;;  %v393_v18 = vshll.u32 %v6333_v48, 16  ;;  %v566_v27 = vshrl.u32 %v6338_v52, 16 }
  0x3f   : > { %v4947_v37 = vcombine.low %v362_v44, %v372_v17  ;;  %v554_v39 = vsel %vm6154_vm4, %v549_v0, %v553_v28  ;;  %v380_v42 = vor.u32 %v379_v2, %v376_v59  ;;  %v389_v45 = vrot.slane %v387_v50, 4  ;;  %v6361_v17 = vld [vmem:[%s6110_s25 + $0x4c] sm:$0xf]  ;;  %v6367_v2 = vld [vmem:[%s6110_s25 + $0x50] sm:$0x1] }
  0x40   : > { %v559_v4 = vrot.slane %v558_v22, 4  ;;  %v395_v49 = vrot.slane %v393_v18, 5  ;;  %v568_v20 = vrot.slane %v566_v27, 4  ;;  %v569_v54 = vshll.u32 %v6338_v52, 16 }
  0x41   : > { %5645 = vmatprep.mubr.msk.bf16.mxu0 %vm687_vm3, %v4947_v37  ;;  %v381_v55 = vrot.slane %v380_v42, 4  ;;  %v390_v62 = vor.u32 %v389_v45, %v385_v3  ;;  %v575_v32 = vshll.u32 %v6342_v13, 16  ;;  %v579_v44 = vshrl.u32 %v6342_v13, 16  ;;  %v6373_v42 = vld [vmem:[%s6110_s25 + $0xa8] sm:$0xf] }
  0x42   : > { %v564_v28 = vsel %vm6154_vm4, %v559_v4, %v563_v57  ;;  %v571_v59 = vrot.slane %v569_v54, 5  ;;  %v585_v0 = vshll.u32 %v6348_v26, 16  ;;  %v398_v50 = vshrl.u32 %v6352_v34, 16  ;;  %8780 = vst [vmem:[#allocation10_spill] sm:$0xff] %v6373_v42 }
  0x43   : > { %v4955_v22 = vcombine.low %v554_v39, %v564_v28  ;;  %v386_v18 = vsel %vm6154_vm4, %v381_v55, %v385_v3  ;;  %v391_v27 = vrot.slane %v390_v62, 4  ;;  %v577_v37 = vrot.slane %v575_v32, 5 }
  0x44   : > { %v572_v45 = vor.u32 %v571_v59, %v568_v20  ;;  %v581_v61 = vrot.slane %v579_v44, 4  ;;  %v587_v57 = vrot.slane %v585_v0, 5  ;;  %v400_v4 = vrot.slane %v398_v50, 4  ;;  %v6383_v44 = vld [vmem:[%s6110_s25 + $0xac] sm:$0xf] }
  0x45   : > { %5661 = vmatprep.mubr.msk.bf16.mxu1 %vm687_vm3, %v4955_v22  ;;  %v396_v54 = vsel %vm6154_vm4, %v391_v27, %v395_v49  ;;  %v401_v39 = vshll.u32 %v6352_v34, 16  ;;  %v407_v28 = vshll.u32 %v6361_v17, 16  ;;  %v411_v62 = vshrl.u32 %v6361_v17, 16  ;;  %8781 = vst [vmem:[#allocation11_spill] sm:$0xff] %v6383_v44  ;;  %v6386_v22 = vld [vmem:[%s6110_s25 + $0xb0] sm:$0x1] }
  0x46   : > { %v4948_v3 = vcombine.low %v386_v18, %v396_v54  ;;  %v573_v32 = vrot.slane %v572_v45, 4  ;;  %v582_v55 = vor.u32 %v581_v61, %v577_v37  ;;  %v417_v20 = vshll.u32 %v6367_v2, 16  ;;  %8782 = vst [vmem:[#allocation12_spill] sm:$0xff] %v6386_v22 }
  0x47   : > { %v403_v59 = vrot.slane %v401_v39, 5  ;;  %v409_v0 = vrot.slane %v407_v28, 5  ;;  %v413_v50 = vrot.slane %v411_v62, 4  ;;  %v590_v49 = vshrl.u32 %v6373_v42, 16  ;;  %v6395_v62 = vld [vmem:[%s6110_s25 + $0x54] sm:$0xf] }
  0x48   : > { %5646 = vmatmul.mubr.msk.bf16.gmra.mxu0 %vm687_vm3, %v4948_v3  ;;  %v578_v18 = vsel %vm6154_vm4, %v573_v32, %v577_v37  ;;  %v583_v27 = vrot.slane %v582_v55, 4  ;;  %v419_v61 = vrot.slane %v417_v20, 5  ;;  %v593_v45 = vshll.u32 %v6373_v42, 16  ;;  %v6402_v55 = vld [vmem:[%s6110_s25 + $0x58] sm:$0xf] }
  0x49   : > { %v404_v54 = vor.u32 %v403_v59, %v400_v4  ;;  %v414_v56 = vor.u32 %v413_v50, %v409_v0  ;;  %v592_v39 = vrot.slane %v590_v49, 4  ;;  %v599_v28 = vshll.u32 %v6383_v44, 16  ;;  %v6405_v49 = vld [vmem:[%s6110_s25 + $0x5c] sm:$0x1] }
  0x4a   : > { %v588_v3 = vsel %vm6154_vm4, %v583_v27, %v587_v57  ;;  %v595_v26 = vrot.slane %v593_v45, 5  ;;  %v603_v37 = vshrl.u32 %v6383_v44, 16  ;;  %v609_v32 = vshll.u32 %v6386_v22, 16  ;;  %v1193_v22 = vld [vmem:[%s6110_s25] sm:$0xe] }
  0x4b   : > { %v4956_v4 = vcombine.low %v578_v18, %v588_v3  ;;  %v405_v20 = vrot.slane %v404_v54, 4  ;;  %v415_v59 = vrot.slane %v414_v56, 4  ;;  %v601_v50 = vrot.slane %v599_v28, 5  ;;  %v6416_v54 = vld [vmem:[%s6110_s25 + $0xb4] sm:$0xf] }
  0x4c   : > { %v596_v42 = vor.u32 %v595_v26, %v592_v39  ;;  %v605_v52 = vrot.slane %v603_v37, 4  ;;  %v611_v13 = vrot.slane %v609_v32, 5  ;;  %v422_v57 = vshrl.u32 %v6395_v62, 16  ;;  %8783 = vst [vmem:[#allocation13_spill] sm:$0xff] %v6416_v54  ;;  %v6419_v37 = vld [vmem:[%s6110_s25 + $0xb8] sm:$0xf] }
  0x4d   : > { %5662 = vmatmul.mubr.msk.bf16.gmra.mxu1 %vm687_vm3, %v4956_v4  ;;  %v410_v27 = vsel %vm6154_vm4, %v405_v20, %v409_v0  ;;  %v420_v18 = vsel %vm6154_vm4, %v415_v59, %v419_v61  ;;  %v425_v56 = vshll.u32 %v6395_v62, 16  ;;  %v431_v45 = vshll.u32 %v6402_v55, 16  ;;  %v6424_v61 = vld [vmem:[%s6110_s25 + $0xbc] sm:$0x1] }
  0x4e   : > { %v4949_v26 = vcombine.low %v410_v27, %v420_v18  ;;  %v597_v39 = vrot.slane %v596_v42, 4  ;;  %v606_v28 = vor.u32 %v605_v52, %v601_v50  ;;  %v424_v3 = vrot.slane %v422_v57, 4 }
  0x4f   : > { %v427_v32 = vrot.slane %v425_v56, 5  ;;  %v433_v4 = vrot.slane %v431_v45, 5  ;;  %v435_v0 = vshrl.u32 %v6402_v55, 16  ;;  %v441_v20 = vshll.u32 %v6405_v49, 16 }
  0x50   : > { %5649 = vmatprep.mubr.msk.bf16.mxu0 %vm687_vm3, %v4949_v26  ;;  %v602_v59 = vsel %vm6154_vm4, %v597_v39, %v601_v50  ;;  %v607_v27 = vrot.slane %v606_v28, 4  ;;  %v614_v52 = vshrl.u32 %v6416_v54, 16  ;;  %v617_v42 = vshll.u32 %v6416_v54, 16 }
  0x51   : > { %v428_v57 = vor.u32 %v427_v32, %v424_v3  ;;  %v437_v18 = vrot.slane %v435_v0, 4  ;;  %v443_v56 = vrot.slane %v441_v20, 5  ;;  %v623_v45 = vshll.u32 %v6419_v37, 16 }
  0x52   : > { %v612_v44 = vsel %vm6154_vm4, %v607_v27, %v611_v13  ;;  %v616_v16 = vrot.slane %v614_v52, 4  ;;  %v619_v26 = vrot.slane %v617_v42, 5  ;;  %v627_v38 = vshrl.u32 %v6419_v37, 16 }
  0x53   : > { %v4957_v50 = vcombine.low %v602_v59, %v612_v44  ;;  %v429_v39 = vrot.slane %v428_v57, 4  ;;  %v438_v28 = vor.u32 %v437_v18, %v433_v4  ;;  %v625_v47 = vrot.slane %v623_v45, 5  ;;  %v1195_v57 = vld [vmem:[%s6110_s25 + $0x18] sm:$0xe] }
  0x54   : > { %v620_v54 = vor.u32 %v619_v26, %v616_v16  ;;  %v629_v3 = vrot.slane %v627_v38, 4  ;;  %v633_v32 = vshll.u32 %v6424_v61, 16  ;;  %v5007_v13 = vrot.slane %v1193_v22, 9 }
  0x55   : > { %5665 = vmatprep.mubr.msk.bf16.mxu1 %vm687_vm3, %v4957_v50  ;;  %v434_v44 = vsel %vm6154_vm4, %v429_v39, %v433_v4  ;;  %v439_v20 = vrot.slane %v438_v28, 4  ;;  %v1246_v59 = vrot.slane %v6119_v6, 5  ;;  %v4976_v38 = vcombine.low %v6147_v29, %v6150_v30 }
  0x56   : > { %v621_v16 = vrot.slane %v620_v54, 4  ;;  %v630_v27 = vor.u32 %v629_v3, %v625_v47  ;;  %v635_v52 = vrot.slane %v633_v32, 5  ;;  %v5008_v42 = vrot.slane %v1194_v51, 9 }
  0x57   : > { %v444_v18 = vsel %vm6154_vm4, %v439_v20, %v443_v56  ;;  %v1247_v22 = vsel %vm6440_vm7, %v5007_v13, %v1246_v59  ;;  %v1248_v45 = vrot.slane %v1246_v59, 4  ;;  %v8786_v4 = vrot.slane %v6150_v30, 5 }
  0x58   : > { %v4950_v50 = vcombine.low %v434_v44, %v444_v18  ;;  %v626_v54 = vsel %vm6154_vm4, %v621_v16, %v625_v47  ;;  %v631_v39 = vrot.slane %v630_v27, 4  ;;  %v4975_v51 = vcombine.low %v6116_v5, %v6119_v6  ;;  %v1196_v27 = vld [vmem:[%s6110_s25 + $0x24] sm:$0xe] }
  0x59   : > { %v1255_v26 = vrot.slane %v8786_v4, 4  ;;  %v8787_v28 = vrot.slane %v6122_v7, 5  ;;  %v8788_v3 = vmov %v8786_v4  ;;  %v4977_v13 = vcombine.low %v6189_v8, %v6196_v21  ;;  %v1198_v4 = vld [vmem:[%s6110_s25 + $0x3c] sm:$0xe] }
  0x5a   : > { %v1254_v32 = vsel %vm6440_vm7, %v5008_v42, %v8788_v3  ;;  %v5009_v44 = vrot.slane %v1195_v57, 9  ;;  %5650 = vmatmul.mubr.msk.bf16.gmra.mxu0 %vm687_vm3, %v4950_v50  ;;  %v636_v47 = vsel %vm6154_vm4, %v631_v39, %v635_v52  ;;  %v8789_v6 = vrot.slane %v6160_v41, 5  ;;  %v1197_v42 = vld [vmem:[%s6110_s25 + $0x30] sm:$0xe]  ;;  %v1199_v39 = vld [vmem:[%s6110_s25 + $0x48] sm:$0xe] }
  0x5b   : > { %v1250_v56 = vsel %vm6440_vm7, %v1248_v45, %v8787_v28  ;;  %v1260_v20 = vrot.slane %v6196_v21, 5  ;;  %v4958_v59 = vcombine.low %v626_v54, %v636_v47  ;;  %v1263_v16 = vrot.slane %v6202_v25, 5  ;;  %v1200_v47 = vld [vmem:[%s6110_s25 + $0x54] sm:$0xe]  ;;  %v6735_v21 = vld [vmem:[%s6110_s25 + $0x2c] sm:$0x1] }
  0x5c   : > { %v5024_v5 = vcombine.low %v1247_v22, %v1250_v56  ;;  %v1257_v7 = vsel %vm6440_vm7, %v1255_v26, %v8789_v6  ;;  %v1817_v52 = vsel %vm736_vm0, %v6247_v19, 0  ;;  %v1267_v18 = vrot.slane %v6241_v10, 5 }
  0x5d   : > { %v1261_v41 = vsel %vm6440_vm7, %v5009_v44, %v1260_v20  ;;  %v1262_v57 = vrot.slane %v1260_v20, 4  ;;  %5666 = vmatmul.mubr.msk.bf16.gmra.mxu1 %vm687_vm3, %v4958_v59  ;;  %v5025_v22 = vcombine.low %v1254_v32, %v1257_v7  ;;  %v2543_v25 = vsel %vm736_vm0, %v6215_v40, 0 }
  0x5e   : > { %5705 = vmatprep.mubr.msk.bf16.mxu0 %vm687_vm3, %v5024_v5  ;;  %v1274_v45 = vrot.slane %v6287_v9, 5  ;;  %5671 = vmatprep.mubr.msk.bf16.mxu1 %vm687_vm3, %v4975_v51  ;;  %v5010_v26 = vrot.slane %v1196_v27, 9  ;;  %v1270_v50 = vrot.slane %v6252_v24, 5  ;;  %v5011_v54 = vrot.slane %v1197_v42, 9  ;;  %v6507_v24 = vld [vmem:[%s8734_s1 + $0xc] sm:$0x3] }
  0x5f   : > { %v1264_v19 = vsel %vm6440_vm7, %v1262_v57, %v1263_v16  ;;  %v1269_v56 = vrot.slane %v1267_v18, 4  ;;  %v1277_v32 = vrot.slane %v6295_v33, 5  ;;  %v5012_v44 = vrot.slane %v1198_v4, 9 }
  0x60   : > { %v5026_v28 = vcombine.low %v1261_v41, %v1264_v19  ;;  %v1276_v3 = vrot.slane %v1274_v45, 4  ;;  %v1281_v40 = vrot.slane %v6324_v23, 5  ;;  %v1305_v5 = vrot.slane %v6136_v15, 5 }
  0x61   : > { %v1284_v51 = vrot.slane %v6333_v48, 5  ;;  %v5013_v6 = vrot.slane %v1199_v39, 9  ;;  %v1288_v7 = vrot.slane %v6361_v17, 5  ;;  %v4978_v33 = vcombine.low %v6233_v1, %v6241_v10  ;;  %v1201_v1 = vld [vmem:[%s6110_s25 + $0x60] sm:$0xe] }
  0x62   : > { %5706 = vmatmul.mubr.msk.bf16.vlgmr.msra.gmra.mxu0 %vm687_vm3, %v5025_v22  ;;  %v1268_v20 = vsel %vm6440_vm7, %v5010_v26, %v1267_v18  ;;  %v1283_v59 = vrot.slane %v1281_v40, 4  ;;  %v1291_v16 = vrot.slane %v6367_v2, 5  ;;  %v1271_v48 = vsel %vm6440_vm7, %v1269_v56, %v1270_v50  ;;  %v6535_v22 = vld [vmem:[%s8734_s1 + $0xa] sm:$0x3]  ;;  %v6560_v50 = vld [vmem:[%s6110_s25 + $0x6c] sm:$0xe] }
  0x63   : > { %5772 = vmatpush3.bf16.msra.mxu0 %v2543_v25  ;;  %5709 = vmatprep.mubr.msk.bf16.mxu0 %vm687_vm3, %v5026_v28  ;;  %v1275_v27 = vsel %vm6440_vm7, %v5011_v54, %v1274_v45  ;;  %v1278_v42 = vsel %vm6440_vm7, %v1276_v3, %v1277_v32  ;;  %v1290_v41 = vrot.slane %v1288_v7, 4  ;;  %v6525_v10 = vsel %vm6440_vm7, %v5012_v44, %v1281_v40  ;;  %v1204_v39 = vld [vmem:[%s6110_s25 + $0x84] sm:$0xe]  ;;  %v6589_v44 = vld [vmem:[%s6110_s25 + $0x78] sm:$0xe] }
  0x64   : > { %v6529_v2 = vsel %vm6440_vm7, %v5013_v6, %v1288_v7  ;;  %v5014_v57 = vrot.slane %v1200_v47, 9  ;;  %v1295_v18 = vrot.slane %v6402_v55, 5  ;;  %5950 = vmatprep.subr.msk.bf16.mxu0 %vm736_vm0, %v6507_v24  ;;  %v6545_v25 = vsel %vm6440_vm7, %v1283_v59, %v1284_v51  ;;  %v1205_v40 = vld [vmem:[%s6110_s25 + $0x90] sm:$0xe] }
  0x65   : > { %5672 = vmatmul.mubr.msk.bf16.vlgmr.msra.gmra.mxu1 %vm687_vm3, %v4976_v38  ;;  %v6549_v45 = vsel %vm6440_vm7, %v1290_v41, %v1291_v16  ;;  %v1298_v4 = vrot.slane %v6405_v49, 5  ;;  %v1302_v19 = vrot.slane %v6133_v14, 5  ;;  %v5027_v29 = vcombine.low %v1268_v20, %v1271_v48  ;;  %v8790_v48 = vld [vmem:[#allocation3_spill] sm:$0xff] }
  0x66   : > { %5738 = vmatpush3.bf16.msra.mxu1 %v1817_v52  ;;  %5675 = vmatprep.mubr.msk.bf16.mxu1 %vm687_vm3, %v4977_v13  ;;  %v4979_v30 = vcombine.low %v6282_v60, %v6287_v9  ;;  %v1297_v38 = vrot.slane %v1295_v18, 4  ;;  %v5015_v26 = vrot.slane %v1201_v1, 9  ;;  %v5028_v49 = vcombine.low %v1275_v27, %v1278_v42  ;;  %v1206_v42 = vld [vmem:[%s6110_s25 + $0x9c] sm:$0xe] }
  0x67   : > { %v4980_v52 = vcombine.low %v6319_v11, %v6324_v23  ;;  %v4981_v8 = vcombine.low %v6352_v34, %v6361_v17  ;;  %5949 = vmatprep.subr.msk.bf16.mxu1 %vm736_vm0, %v6535_v22  ;;  %v5029_v60 = vcombine.low %v6525_v10, %v6545_v25  ;;  %v5030_v9 = vcombine.low %v6529_v2, %v6549_v45  ;;  %v8791_v10 = vld [vmem:[#allocation5_spill] sm:$0xff]  ;;  %v8792_v2 = vld [vmem:[#allocation4_spill] sm:$0xff] }
  0x68   : > { %v1304_v54 = vrot.slane %v1302_v19, 4  ;;  %v6579_v28 = vsel %vm6440_vm7, %v5014_v57, %v1295_v18  ;;  %v6583_v56 = vsel %vm6440_vm7, %v1297_v38, %v1298_v4  ;;  %v5016_v32 = vrot.slane %v6560_v50, 9  ;;  %v1207_v18 = vld [vmem:[%s6110_s25 + $0xa8] sm:$0xe]  ;;  %v8794_v38 = vld [vmem:[#allocation8_spill] sm:$0xff] }
  0x69   : > { %v6595_v47 = vsel %vm6440_vm7, %v5015_v26, %v1302_v19  ;;  %v1309_v51 = vrot.slane %v6175_v58, 5  ;;  %v1312_v6 = vrot.slane %v6183_v63, 5  ;;  %v5018_v59 = vrot.slane %v1204_v39, 9  ;;  %v8793_v19 = vld [vmem:[#allocation6_spill] sm:$0xff]  ;;  %v8795_v26 = vld [vmem:[#allocation7_spill] sm:$0xff] }
  0x6a   : > { %5710 = vmatmul.mubr.msk.bf16.gmra.mxu0 %vm687_vm3, %v5027_v29  ;;  %v1323_v16 = vrot.slane %v6266_v43, 5  ;;  %v1326_v27 = vrot.slane %v8790_v48, 5  ;;  %v5031_v41 = vcombine.low %v6579_v28, %v6583_v56  ;;  %v6613_v63 = vsel %vm6440_vm7, %v1304_v54, %v1305_v5  ;;  %v8797_v48 = vld [vmem:[#allocation11_spill] sm:$0xff] }
  0x6b   : > { %5713 = vmatprep.mubr.msk.bf16.mxu0 %vm687_vm3, %v5028_v49  ;;  %v5017_v1 = vrot.slane %v6589_v44, 9  ;;  %v5019_v4 = vrot.slane %v1205_v40, 9  ;;  %v1330_v15 = vrot.slane %v8791_v10, 5  ;;  %v1311_v5 = vrot.slane %v1309_v51, 4  ;;  %v5121_v57 = vld [vmem:[%s6110_s25 + $0xc] sm:$0xf] }
  0x6c   : > { %v6622_v25 = vsel %vm6440_vm7, %v5018_v59, %v1323_v16  ;;  %v1325_v45 = vrot.slane %v1323_v16, 4  ;;  %v1333_v29 = vrot.slane %v8793_v19, 5  ;;  %v5020_v49 = vrot.slane %v1206_v42, 9  ;;  %v8796_v59 = vld [vmem:[#allocation9_spill] sm:$0xff]  ;;  %v8798_v42 = vld [vmem:[#allocation10_spill] sm:$0xff] }
  0x6d   : > { %5676 = vmatmul.mubr.msk.bf16.gmra.mxu1 %vm687_vm3, %v4978_v33  ;;  %v1316_v33 = vrot.slane %v6220_v46, 5  ;;  %v6636_v39 = vsel %vm6440_vm7, %v5019_v4, %v1330_v15  ;;  %v1332_v44 = vrot.slane %v1330_v15, 4  ;;  %v1337_v40 = vrot.slane %v8794_v38, 5  ;;  %v8799_v15 = vld [vmem:[#allocation12_spill] sm:$0xff] }
  0x6e   : > { %5679 = vmatprep.mubr.msk.bf16.mxu1 %vm687_vm3, %v4979_v30  ;;  %v6632_v54 = vsel %vm6440_vm7, %v1325_v45, %v1326_v27  ;;  %v1340_v16 = vrot.slane %v8796_v59, 5  ;;  %v5021_v45 = vrot.slane %v1207_v18, 9  ;;  %v1344_v4 = vrot.slane %v8797_v48, 5 }
  0x6f   : > { %v6646_v27 = vsel %vm6440_vm7, %v1332_v44, %v1333_v29  ;;  %v1347_v50 = vrot.slane %v8799_v15, 5  ;;  %v6656_v19 = vsel %vm6440_vm7, %v5020_v49, %v1337_v40  ;;  %v1339_v7 = vrot.slane %v1337_v40, 4  ;;  %v8800_v29 = vld [vmem:[#allocation13_spill] sm:$0xff]  ;;  %v8801_v15 = vld [vmem:[#allocation2_spill] sm:$0xff]  ;;  %v6671_v49 = vld [vmem:[%s6110_s25 + $0x10] sm:$0xf] }
  0x70   : > { %v6663_v18 = vsel %vm6440_vm7, %v5016_v32, %v1309_v51  ;;  %v6668_v59 = vsel %vm6440_vm7, %v5021_v45, %v1344_v4  ;;  %v1346_v30 = vrot.slane %v1344_v4, 4  ;;  %v5124_v40 = vld [vmem:[%s6110_s25 + $0x18] sm:$0xf]  ;;  %v1318_v20 = vrot.slane %v1316_v33, 4 }
  0x71   : > { %v2061_v44 = vshrl.u32 %v5121_v57, 16  ;;  %v2064_v32 = vshll.u32 %v5121_v57, 16  ;;  %v5032_v51 = vcombine.low %v6595_v47, %v6613_v63  ;;  %v6686_v45 = vsel %vm6440_vm7, %v1311_v5, %v1312_v6  ;;  %v1208_v57 = vld [vmem:[%s6110_s25 + $0xb4] sm:$0xe]  ;;  %v6707_v47 = vld [vmem:[%s6110_s25 + $0x14] sm:$0x1] }
  0x72   : > { %5714 = vmatmul.mubr.msk.bf16.gmra.mxu0 %vm687_vm3, %v5029_v60  ;;  %v1319_v60 = vrot.slane %v8801_v15, 5  ;;  %v6701_v11 = vsel %vm6440_vm7, %v5017_v1, %v1316_v33  ;;  %v2070_v6 = vshll.u32 %v6671_v49, 16  ;;  %v5125_v63 = vld [vmem:[%s6110_s25 + $0x1c] sm:$0xf]  ;;  %v2074_v17 = vshrl.u32 %v6671_v49, 16 }
  0x73   : > { %5717 = vmatprep.mubr.msk.bf16.mxu0 %vm687_vm3, %v5030_v9  ;;  %v6676_v9 = vsel %vm6440_vm7, %v1339_v7, %v1340_v16  ;;  %v6692_v7 = vsel %vm6440_vm7, %v1346_v30, %v1347_v50  ;;  %v2063_v5 = vrot.slane %v2061_v44, 4  ;;  %v2066_v34 = vrot.slane %v2064_v32, 5  ;;  %v5127_v15 = vld [vmem:[%s6110_s25 + $0x24] sm:$0xf]  ;;  %v6720_v44 = vld [vmem:[%s6110_s25 + $0x28] sm:$0xf] }
  0x74   : > { %v2085_v50 = vshrl.u32 %v5124_v40, 16  ;;  %v1320_v1 = vsel %vm6440_vm7, %v1318_v20, %v1319_v60  ;;  %v5022_v33 = vrot.slane %v1208_v57, 9  ;;  %v6715_v30 = vrot.slane %v2070_v6, 5 }
  0x75   : > { %5680 = vmatmul.mubr.msk.bf16.gmra.mxu1 %vm687_vm3, %v4980_v52  ;;  %v1351_v52 = vrot.slane %v6419_v37, 5  ;;  %v2088_v16 = vshll.u32 %v5124_v40, 16  ;;  %v1354_v23 = vrot.slane %v6424_v61, 5  ;;  %v2076_v4 = vrot.slane %v2074_v17, 4 }
  0x76   : > { %5683 = vmatprep.mubr.msk.bf16.mxu1 %vm687_vm3, %v4981_v8  ;;  %v5126_v8 = vld [vmem:[%s6110_s25 + $0x20] sm:$0x1]  ;;  %v2087_v3 = vrot.slane %v2085_v50, 4  ;;  %v2094_v13 = vshll.u32 %v5125_v63, 16  ;;  %v2080_v20 = vshll.u32 %v6707_v47, 16  ;;  %v2098_v57 = vshrl.u32 %v5125_v63, 16 }
  0x77   : > { %v1353_v32 = vrot.slane %v1351_v52, 4  ;;  %v2090_v60 = vrot.slane %v2088_v16, 5  ;;  %v5033_v61 = vcombine.low %v6663_v18, %v6686_v45  ;;  %v5034_v40 = vcombine.low %v6701_v11, %v1320_v1 }
  0x78   : > { %v2067_v6 = vor.u32 %v2066_v34, %v2063_v5  ;;  %v6731_v17 = vrot.slane %v2094_v13, 5  ;;  %v2077_v28 = vor.u32 %v2076_v4, %v6715_v30  ;;  %v2104_v50 = vshll.u32 %v5126_v8, 16  ;;  %v6758_v5 = vld [vmem:[%s6110_s25 + $0x34] sm:$0xf] }
  0x79   : > { %v2091_v56 = vor.u32 %v2090_v60, %v2087_v3  ;;  %v6743_v18 = vsel %vm6440_vm7, %v5022_v33, %v1351_v52  ;;  %v2109_v13 = vshrl.u32 %v5127_v15, 16  ;;  %v2112_v45 = vshll.u32 %v5127_v15, 16  ;;  %v5130_v52 = vld [vmem:[%s6110_s25 + $0x30] sm:$0xf] }
  0x7a   : > { %5718 = vmatmul.mubr.msk.bf16.gmra.mxu0 %vm687_vm3, %v5031_v41  ;;  %v2100_v41 = vrot.slane %v2098_v57, 4  ;;  %v2118_v11 = vshll.u32 %v6720_v44, 16  ;;  %v8803_v3 = vcombine.low %v6129_v12, %v6133_v14  ;;  %v6752_v4 = vsel %vm6440_vm7, %v1353_v32, %v1354_v23 }
  0x7b   : > { %5721 = vmatprep.mubr.msk.bf16.mxu0 %vm687_vm3, %v5032_v51  ;;  %v8802_v51 = vcombine.low %v6395_v62, %v6402_v55  ;;  %v2082_v62 = vrot.slane %v2080_v20, 5  ;;  %v2122_v63 = vshrl.u32 %v6720_v44, 16  ;;  %v2068_v34 = vrot.slane %v2067_v6, 4 }
  0x7c   : > { %v2101_v55 = vor.u32 %v2100_v41, %v6731_v17  ;;  %v2111_v8 = vrot.slane %v2109_v13, 4  ;;  %v2114_v1 = vrot.slane %v2112_v45, 5  ;;  %v6760_v33 = vrot.slane %v2118_v11, 5  ;;  %v6766_v41 = vld [vmem:[%s6110_s25 + $0x38] sm:$0x1] }
  0x7d   : > { %5684 = vmatmul.mubr.msk.bf16.gmra.mxu1 %vm687_vm3, %v8802_v51  ;;  %v2078_v12 = vrot.slane %v2077_v28, 4  ;;  %v2092_v14 = vrot.slane %v2091_v56, 4  ;;  %v2106_v16 = vrot.slane %v2104_v50, 5  ;;  %v2124_v23 = vrot.slane %v2122_v63, 4  ;;  %v5133_v13 = vld [vmem:[%s6110_s25 + $0x3c] sm:$0xf] }
  0x7e   : > { %5687 = vmatprep.mubr.msk.bf16.mxu1 %vm687_vm3, %v8803_v3  ;;  %v2102_v15 = vrot.slane %v2101_v55, 4  ;;  %v2128_v32 = vshll.u32 %v6735_v21, 16  ;;  %v2133_v20 = vshrl.u32 %v5130_v52, 16  ;;  %v2136_v60 = vshll.u32 %v5130_v52, 16 }
  0x7f   : > { %v2115_v57 = vor.u32 %v2114_v1, %v2111_v8  ;;  %v2125_v6 = vor.u32 %v2124_v23, %v6760_v33  ;;  %v2142_v28 = vshll.u32 %v6758_v5, 16  ;;  %v2146_v56 = vshrl.u32 %v6758_v5, 16  ;;  %v5136_v8 = vld [vmem:[%s6110_s25 + $0x48] sm:$0xf]  ;;  %v6793_v1 = vld [vmem:[%s6110_s25 + $0x4c] sm:$0xf] }
  0x80   : > { %v2135_v50 = vrot.slane %v2133_v20, 4  ;;  %v2138_v51 = vrot.slane %v2136_v60, 5  ;;  %v8804_v3 = vcombine.low %v6171_v53, %v6175_v58  ;;  %v5039_v55 = vcombine.low %v6743_v18, %v6752_v4 }
  0x81   : > { %v6772_v45 = vrot.slane %v2142_v28, 5  ;;  %v2148_v11 = vrot.slane %v2146_v56, 4  ;;  %v2083_v63 = vsel %vm6154_vm4, %v2078_v12, %v2082_v62  ;;  %v2097_v52 = vsel %vm6154_vm4, %v2092_v14, %v6731_v17 }
  0x82   : > { %5722 = vmatmul.mubr.msk.bf16.gmra.mxu0 %vm687_vm3, %v5033_v61  ;;  %v6775_v61 = vld [vmem:[%s6110_s25 + $0x40] sm:$0xf]  ;;  %v8805_v53 = vcombine.low %v6209_v35, %v6220_v46  ;;  %v2107_v58 = vsel %vm6154_vm4, %v2102_v15, %v2106_v16  ;;  %v2116_v23 = vrot.slane %v2115_v57, 4  ;;  %v2139_v20 = vor.u32 %v2138_v51, %v2135_v50  ;;  %v6827_v50 = vld [vmem:[%s6110_s25 + $0x44] sm:$0x1] }
  0x83   : > { %5725 = vmatprep.mubr.msk.bf16.mxu0 %vm687_vm3, %v5034_v40  ;;  %v2073_v40 = vsel %vm6154_vm4, %v2068_v34, %v6715_v30  ;;  %v2126_v30 = vrot.slane %v2125_v6, 4  ;;  %v2130_v34 = vrot.slane %v2128_v32, 5  ;;  %v2152_v62 = vshll.u32 %v6766_v41, 16  ;;  %v5139_v51 = vld [vmem:[%s6110_s25 + $0x54] sm:$0xf] }
  0x84   : > { %v2157_v12 = vshrl.u32 %v5133_v13, 16  ;;  %v2160_v17 = vshll.u32 %v5133_v13, 16  ;;  %v6804_v14 = vsel %vm736_vm0, %v6535_v22, 0  ;;  %v2149_v35 = vor.u32 %v2148_v11, %v6772_v45 }
  0x85   : > { %5688 = vmatmul.mubr.msk.bf16.gmra.mxu1 %vm687_vm3, %v8804_v3  ;;  %v2166_v46 = vshll.u32 %v6775_v61, 16  ;;  %v2170_v16 = vshrl.u32 %v6775_v61, 16  ;;  %v6809_v15 = vcombine.low %v2073_v40, %v2083_v63  ;;  %v6813_v32 = vsel %vm736_vm0, %v6507_v24, 0  ;;  %v6836_v40 = vld [vmem:[%s6110_s25 + $0x58] sm:$0xf] }
  0x86   : > { %5691 = vmatprep.mubr.msk.bf16.mxu1 %vm687_vm3, %v8805_v53  ;;  %v2181_v60 = vshrl.u32 %v5136_v8, 16  ;;  %v2184_v57 = vshll.u32 %v5136_v8, 16  ;;  %v8806_v6 = vcombine.low %v6622_v25, %v6632_v54  ;;  %v6819_v22 = vcombine.low %v2097_v52, %v2107_v58  ;;  %v6841_v8 = vld [vmem:[%s6110_s25 + $0x50] sm:$0x1] }
  0x87   : > { %v2121_v28 = vsel %vm6154_vm4, %v2116_v23, %v6760_v33  ;;  %v2131_v56 = vsel %vm6154_vm4, %v2126_v30, %v2130_v34  ;;  %v2190_v24 = vshll.u32 %v6793_v1, 16  ;;  %v8807_v25 = vcombine.low %v6636_v39, %v6646_v27  ;;  %v5142_v34 = vld [vmem:[%s6110_s25 + $0x60] sm:$0xf] }
  0x88   : > { %v2140_v54 = vrot.slane %v2139_v20, 4  ;;  %v2154_v13 = vrot.slane %v2152_v62, 5  ;;  %v2159_v11 = vrot.slane %v2157_v12, 4  ;;  %v2162_v3 = vrot.slane %v2160_v17, 5 }
  0x89   : > { %v2150_v33 = vrot.slane %v2149_v35, 4  ;;  %v6838_v63 = vrot.slane %v2166_v46, 5  ;;  %v2172_v52 = vrot.slane %v2170_v16, 4  ;;  %v2194_v53 = vshrl.u32 %v6793_v1, 16  ;;  %v6858_v35 = vld [vmem:[%s6110_s25 + $0x5c] sm:$0x1] }
  0x8a   : > { %5726 = vmatmul.mubr.msk.bf16.gmra.mxu0 %vm687_vm3, %v8806_v6  ;;  %v8808_v39 = vcombine.low %v6259_v36, %v6266_v43  ;;  %v2183_v27 = vrot.slane %v2181_v60, 4  ;;  %v2186_v58 = vrot.slane %v2184_v57, 5  ;;  %v2205_v23 = vshrl.u32 %v5139_v51, 16 }
  0x8b   : > { %5729 = vmatprep.mubr.msk.bf16.mxu0 %vm687_vm3, %v8807_v25  ;;  %v2208_v30 = vshll.u32 %v5139_v51, 16  ;;  %v8809_v20 = vcombine.low %v8792_v2, %v8791_v10  ;;  %v6853_v62 = vcombine.low %v2121_v28, %v2131_v56  ;;  %v6855_v12 = vrot.slane %v2190_v24, 5  ;;  %v6871_v28 = vld [vmem:[%s6110_s25 + $0x64] sm:$0xf] }
  0x8c   : > { %v2196_v17 = vrot.slane %v2194_v53, 4  ;;  %v2214_v36 = vshll.u32 %v6836_v40, 16  ;;  %v2176_v43 = vshll.u32 %v6827_v50, 16  ;;  %v2207_v46 = vrot.slane %v2205_v23, 4 }
  0x8d   : > { %5692 = vmatmul.mubr.msk.bf16.gmra.mxu1 %vm687_vm3, %v8808_v39  ;;  %v2210_v16 = vrot.slane %v2208_v30, 5  ;;  %v2218_v60 = vshrl.u32 %v6836_v40, 16  ;;  %v2145_v10 = vsel %vm6154_vm4, %v2140_v54, %v6772_v45  ;;  %v2155_v2 = vsel %vm6154_vm4, %v2150_v33, %v2154_v13  ;;  %v6893_v30 = vld [vmem:[%s6110_s25 + $0x68] sm:$0x1] }
  0x8e   : > { %5695 = vmatprep.mubr.msk.bf16.mxu1 %vm687_vm3, %v8809_v20  ;;  %v2163_v57 = vor.u32 %v2162_v3, %v2159_v11  ;;  %v6868_v6 = vrot.slane %v2214_v36, 5  ;;  %v2173_v56 = vor.u32 %v2172_v52, %v6838_v63  ;;  %v2187_v24 = vor.u32 %v2186_v58, %v2183_v27  ;;  %v5145_v3 = vld [vmem:[%s6110_s25 + $0x6c] sm:$0xf]  ;;  %v6890_v27 = vld [vmem:[%s6110_s25 + $0x70] sm:$0xf] }
  0x8f   : > { %v2200_v51 = vshll.u32 %v6841_v8, 16  ;;  %v2220_v25 = vrot.slane %v2218_v60, 4  ;;  %v8810_v53 = vcombine.low %v6656_v19, %v6676_v9  ;;  %v2197_v45 = vor.u32 %v2196_v17, %v6855_v12 }
  0x90   : > { %v2211_v54 = vor.u32 %v2210_v16, %v2207_v46  ;;  %v2229_v13 = vshrl.u32 %v5142_v34, 16  ;;  %v2232_v11 = vshll.u32 %v5142_v34, 16  ;;  %v8811_v33 = vcombine.low %v6668_v59, %v6692_v7  ;;  %v5148_v16 = vld [vmem:[%s6110_s25 + $0x78] sm:$0xf] }
  0x91   : > { %v2221_v52 = vor.u32 %v2220_v25, %v6868_v6  ;;  %v2224_v39 = vshll.u32 %v6858_v35, 16  ;;  %v2238_v19 = vshll.u32 %v6871_v28, 16  ;;  %v2242_v9 = vshrl.u32 %v6871_v28, 16 }
  0x92   : > { %5730 = vmatmul.mubr.msk.bf16.gmra.mxu0 %vm687_vm3, %v8810_v53  ;;  %v2164_v58 = vrot.slane %v2163_v57, 4  ;;  %v2178_v23 = vrot.slane %v2176_v43, 5  ;;  %v2231_v34 = vrot.slane %v2229_v13, 4  ;;  %v2234_v20 = vrot.slane %v2232_v11, 5 }
  0x93   : > { %5733 = vmatprep.mubr.msk.bf16.mxu0 %vm687_vm3, %v8811_v33  ;;  %v8812_v59 = vcombine.low %v8795_v26, %v8794_v38  ;;  %v6899_v7 = vcombine.low %v2145_v10, %v2155_v2  ;;  %v2174_v17 = vrot.slane %v2173_v56, 4  ;;  %v2188_v36 = vrot.slane %v2187_v24, 4  ;;  %v6909_v2 = vld [vmem:[%s6110_s25 + $0x7c] sm:$0xf] }
  0x94   : > { %v6901_v46 = vrot.slane %v2238_v19, 5  ;;  %v8813_v43 = vcombine.low %v8798_v42, %v8797_v48  ;;  %v2198_v60 = vrot.slane %v2197_v45, 4  ;;  %v2202_v57 = vrot.slane %v2200_v51, 5  ;;  %8814 = vst [vmem:[#allocation3_spill] sm:$0xff] %v6909_v2  ;;  %v5151_v19 = vld [vmem:[%s6110_s25 + $0x84] sm:$0xf] }
  0x95   : > { %5696 = vmatmul.mubr.msk.bf16.gmra.mxu1 %vm687_vm3, %v8812_v59  ;;  %v2212_v25 = vrot.slane %v2211_v54, 4  ;;  %v2244_v38 = vrot.slane %v2242_v9, 4  ;;  %v2222_v26 = vrot.slane %v2221_v52, 4  ;;  %v2226_v53 = vrot.slane %v2224_v39, 5 }
  0x96   : > { %5699 = vmatprep.mubr.msk.bf16.mxu1 %vm687_vm3, %v8813_v43  ;;  %v2235_v13 = vor.u32 %v2234_v20, %v2231_v34  ;;  %v2253_v10 = vshrl.u32 %v5145_v3, 16  ;;  %v2169_v56 = vsel %vm6154_vm4, %v2164_v58, %v6838_v63  ;;  %v2256_v24 = vshll.u32 %v5145_v3, 16  ;;  %v5994_v63 = vld [vmem:[%s6110_s25 + $0xc] sm:$0xff]   ;;  %v6943_v34 = vld [vmem:[%s6110_s25 + $0x88] sm:$0xf] }
  0x97   : > { %v2262_v48 = vshll.u32 %v6890_v27, 16  ;;  %v2266_v42 = vshrl.u32 %v6890_v27, 16  ;;  %v2179_v51 = vsel %vm6154_vm4, %v2174_v17, %v2178_v23  ;;  %v2193_v45 = vsel %vm6154_vm4, %v2188_v36, %v6855_v12  ;;  %8815 = vst [vmem:[#allocation5_spill] sm:$0xff] %v6943_v34  ;;  %v6952_v36 = vld [vmem:[%s6110_s25 + $0x74] sm:$0x1] }
  0x98   : > { %v2245_v54 = vor.u32 %v2244_v38, %v6901_v46  ;;  %v2248_v11 = vshll.u32 %v6893_v30, 16  ;;  %v2203_v3 = vsel %vm6154_vm4, %v2198_v60, %v2202_v57  ;;  %v2217_v33 = vsel %vm6154_vm4, %v2212_v25, %v6868_v6  ;;  %8817 = vst [vmem:[#allocation4_spill] sm:$0xff] %v6952_v36  ;;  %v6962_v38 = vld [vmem:[%s6110_s25 + $0x80] sm:$0x1] }
  0x99   : > { %v2277_v52 = vshrl.u32 %v5148_v16, 16  ;;  %v2280_v12 = vshll.u32 %v5148_v16, 16  ;;  %v2227_v18 = vsel %vm6154_vm4, %v2222_v26, %v2226_v53  ;;  %v2236_v4 = vrot.slane %v2235_v13, 4  ;;  %8818 = vst [vmem:[#allocation6_spill] sm:$0xff] %v6962_v38  ;;  %v6965_v26 = vld [vmem:[%s6110_s25 + $0x8c] sm:$0x1] }
  0x9a   : > { %5734 = vmatmul.mubr.msk.bf16.gmra.mxu0 %vm687_vm3, %v5039_v55  ;;  %v2255_v55 = vrot.slane %v2253_v10, 4  ;;  %v2286_v39 = vshll.u32 %v6909_v2, 16  ;;  %v2258_v9 = vrot.slane %v2256_v24, 5  ;;  %v6939_v58 = vrot.slane %v2262_v48, 5  ;;  %8819 = vst [vmem:[#allocation8_spill] sm:$0xff] %v6965_v26  ;;  %v5995_v10 = vld [vmem:[%s6110_s25 + $0x18] sm:$0xff]  }
  0x9b   : > { %5773 = vmatprep.mubr.msk.bf16.mxu0 %vm687_vm3, %v6809_v15  ;;  %v2268_v23 = vrot.slane %v2266_v42, 4  ;;  %v2290_v6 = vshrl.u32 %v6909_v2, 16  ;;  %v8816_v15 = vcombine.low %v8800_v29, %v6419_v37  ;;  %v6949_v20 = vcombine.low %v2169_v56, %v2179_v51  ;;  %v5154_v51 = vld [vmem:[%s6110_s25 + $0x90] sm:$0xf] }
  0x9c   : > { %v2246_v59 = vrot.slane %v2245_v54, 4  ;;  %v2250_v17 = vrot.slane %v2248_v11, 5  ;;  %v2279_v16 = vrot.slane %v2277_v52, 4  ;;  %v2282_v43 = vrot.slane %v2280_v12, 5 }
  0x9d   : > { %5700 = vmatmul.mubr.msk.bf16.gmra.mxu1 %vm687_vm3, %v8816_v15  ;;  %v6955_v60 = vrot.slane %v2286_v39, 5  ;;  %v2292_v57 = vrot.slane %v2290_v6, 4  ;;  %v2301_v25 = vshrl.u32 %v5151_v19, 16  ;;  %v6957_v37 = vcombine.low %v2193_v45, %v2203_v3  ;;  %v6976_v45 = vld [vmem:[%s6110_s25 + $0x94] sm:$0xf] }
  0x9e   : > { %5739 = vmatprep.mubr.msk.bf16.mxu1 %vm687_vm3, %v5994_v63  ;;  %v6959_v29 = vcombine.low %v2217_v33, %v2227_v18  ;;  %v2304_v53 = vshll.u32 %v5151_v19, 16  ;;  %v2310_v13 = vshll.u32 %v6943_v34, 16  ;;  %v2241_v56 = vsel %vm6154_vm4, %v2236_v4, %v6901_v46  ;;  %8820 = vst [vmem:[#allocation7_spill] sm:$0xff] %v6976_v45  ;;  %v6984_v33 = vld [vmem:[%s8734_s1 + $0x10] sm:$0x3]  ;;  %v5996_v46 = vld [vmem:[%s6110_s25 + $0x24] sm:$0xff]  }
  0x9f   : > { %v2259_v24 = vor.u32 %v2258_v9, %v2255_v55  ;;  %v2269_v48 = vor.u32 %v2268_v23, %v6939_v58  ;;  %v2272_v42 = vshll.u32 %v6952_v36, 16  ;;  %v2303_v54 = vrot.slane %v2301_v25, 4  ;;  %8821 = vst [vmem:[#allocation9_spill] sm:$0xff] %v6984_v33 }
  0xa0   : > { %v2306_v11 = vrot.slane %v2304_v53, 5  ;;  %v6978_v63 = vrot.slane %v2310_v13, 5  ;;  %v2314_v3 = vshrl.u32 %v6943_v34, 16  ;;  %v2251_v52 = vsel %vm6154_vm4, %v2246_v59, %v2250_v17 }
  0xa1   : > { %v2283_v12 = vor.u32 %v2282_v43, %v2279_v16  ;;  %v2293_v18 = vor.u32 %v2292_v57, %v6955_v60  ;;  %v2296_v4 = vshll.u32 %v6962_v38, 16  ;;  %v2325_v19 = vshrl.u32 %v5154_v51, 16  ;;  %v7018_v57 = vld [vmem:[%s6110_s25 + $0xa0] sm:$0xf] }
  0xa2   : > { %5774 = vmatmul.mubr.msk.bf16.vlgmr.msra.gmra.mxu0 %vm687_vm3, %v6819_v22  ;;  %v2307_v55 = vor.u32 %v2306_v11, %v2303_v54  ;;  %v2316_v39 = vrot.slane %v2314_v3, 4  ;;  %v2328_v9 = vshll.u32 %v5154_v51, 16  ;;  %v5157_v22 = vld [vmem:[%s6110_s25 + $0x9c] sm:$0xf]  ;;  %v6997_v23 = vrot.slane %v2259_v24, 4  ;;  %8823 = vst [vmem:[#allocation10_spill] sm:$0xff] %v7018_v57 }
  0xa3   : > { %5840 = vmatpush3.bf16.msra.mxu0 %v6813_v32  ;;  %5777 = vmatprep.mubr.msk.bf16.mxu0 %vm687_vm3, %v6853_v62  ;;  %v6999_v6 = vrot.slane %v2272_v42, 5  ;;  %v2320_v15 = vshll.u32 %v6965_v26, 16  ;;  %v2334_v59 = vshll.u32 %v6976_v45, 16  ;;  %v7006_v32 = vld [vmem:[%s8734_s1 + $0xe] sm:$0x3]  ;;  %v7011_v62 = vcombine.low %v2241_v56, %v2251_v52 }
  0xa4   : > { %8822 = vst [vmem:[#allocation11_spill] sm:$0xff] %v7006_v32  ;;  %5952 = vmatprep.subr.msk.bf16.mxu0 %vm736_vm0, %v6984_v33  ;;  %v7013_v17 = vrot.slane %v2269_v48, 4  ;;  %v2317_v16 = vor.u32 %v2316_v39, %v6978_v63  ;;  %v2338_v43 = vshrl.u32 %v6976_v45, 16  ;;  %v7022_v25 = vrot.slane %v2283_v12, 4  ;;  %v7031_v56 = vld [vmem:[%s6110_s25 + $0x98] sm:$0x1] }
  0xa5   : > { %5740 = vmatmul.mubr.msk.bf16.vlgmr.msra.gmra.mxu1 %vm687_vm3, %v5995_v10  ;;  %v7024_v53 = vrot.slane %v2293_v18, 4  ;;  %v7026_v13 = vrot.slane %v2296_v4, 5  ;;  %v7028_v10 = vrot.slane %v2307_v55, 4  ;;  %8824 = vst [vmem:[#allocation12_spill] sm:$0xff] %v7031_v56  ;;  %v2327_v24 = vrot.slane %v2325_v19, 4  ;;  %v5998_v19 = vld [vmem:[%s6110_s25 + $0x3c] sm:$0xff]  }
  0xa6   : > { %5806 = vmatpush3.bf16.msra.mxu1 %v6804_v14  ;;  %5743 = vmatprep.mubr.msk.bf16.mxu1 %vm687_vm3, %v5996_v46  ;;  %v2330_v48 = vrot.slane %v2328_v9, 5  ;;  %v2349_v42 = vshrl.u32 %v5157_v22, 16  ;;  %v2352_v51 = vshll.u32 %v5157_v22, 16  ;;  %v5997_v14 = vld [vmem:[%s6110_s25 + $0x30] sm:$0xff]   ;;  %v7040_v11 = vrot.slane %v2320_v15, 5 }
  0xa7   : > { %5951 = vmatprep.subr.msk.bf16.mxu1 %vm736_vm0, %v7006_v32  ;;  %v7042_v3 = vrot.slane %v2334_v59, 5  ;;  %v2358_v46 = vshll.u32 %v7018_v57, 16  ;;  %v5160_v52 = vld [vmem:[%s6110_s25 + $0xa8] sm:$0xf]  ;;  %v7046_v12 = vrot.slane %v2317_v16, 4  ;;  %v2340_v18 = vrot.slane %v2338_v43, 4 }
  0xa8   : > { %v2344_v4 = vshll.u32 %v7031_v56, 16  ;;  %v2362_v55 = vshrl.u32 %v7018_v57, 16  ;;  %v7051_v39 = vld [vmem:[%s6110_s25 + $0xac] sm:$0xf]  ;;  %v2331_v59 = vor.u32 %v2330_v48, %v2327_v24  ;;  %v7075_v16 = vld [vmem:[%s6110_s25 + $0xa4] sm:$0x1] }
  0xa9   : > { %8825 = vst [vmem:[#allocation13_spill] sm:$0xff] %v7051_v39  ;;  %8826 = vst [vmem:[#allocation2_spill] sm:$0xff] %v7075_v16  ;;  %v2351_v43 = vrot.slane %v2349_v42, 4  ;;  %v2354_v22 = vrot.slane %v2352_v51, 5  ;;  %v2373_v54 = vshrl.u32 %v5160_v52, 16  ;;  %v7077_v9 = vrot.slane %v2358_v46, 5 }
  0xaa   : > { %5778 = vmatmul.mubr.msk.bf16.gmra.mxu0 %vm687_vm3, %v6899_v7  ;;  %v2364_v32 = vrot.slane %v2362_v55, 4  ;;  %v2376_v15 = vshll.u32 %v5160_v52, 16  ;;  %v2382_v33 = vshll.u32 %v7051_v39, 16  ;;  %v5163_v57 = vld [vmem:[%s6110_s25 + $0xb4] sm:$0xf]  ;;  %v2341_v24 = vor.u32 %v2340_v18, %v7042_v3 }
  0xab   : > { %5781 = vmatprep.mubr.msk.bf16.mxu0 %vm687_vm3, %v6949_v20  ;;  %v2323_v20 = vsel %vm6154_vm4, %v7046_v12, %v7040_v11  ;;  %v7087_v48 = vrot.slane %v2344_v4, 5  ;;  %v7090_v42 = vld [vmem:[%s6110_s25 + $0xb0] sm:$0x1]  ;;  %v2375_v51 = vrot.slane %v2373_v54, 4  ;;  %v7093_v46 = vld [vmem:[%s6110_s25 + $0xb8] sm:$0xf]  ;;  %v2355_v18 = vor.u32 %v2354_v22, %v2351_v43 }
  0xac   : > { %8827 = vst [vmem:[#allocation14_spill] sm:$0xff] %v7090_v42  ;;  %8828 = vst [vmem:[#allocation15_spill] sm:$0xff] %v7093_v46  ;;  %v2378_v52 = vrot.slane %v2376_v15, 5  ;;  %v7097_v55 = vrot.slane %v2382_v33, 5  ;;  %v2386_v11 = vshrl.u32 %v7051_v39, 16  ;;  %v7100_v12 = vrot.slane %v2331_v59, 4 }
  0xad   : > { %5744 = vmatmul.mubr.msk.bf16.gmra.mxu1 %vm687_vm3, %v5997_v14  ;;  %v2368_v14 = vshll.u32 %v7075_v16, 16  ;;  %v7103_v4 = vld [vmem:[%s6110_s25 + $0xbc] sm:$0x1]  ;;  %v2397_v54 = vshrl.u32 %v5163_v57, 16  ;;  %v2400_v7 = vshll.u32 %v5163_v57, 16  ;;  %v2365_v56 = vor.u32 %v2364_v32, %v7077_v9  ;;  %v5999_v16 = vld [vmem:[%s6110_s25 + $0x48] sm:$0xff]  }
  0xae   : > { %5747 = vmatprep.mubr.msk.bf16.mxu1 %vm687_vm3, %v5998_v19  ;;  %v2388_v45 = vrot.slane %v2386_v11, 4  ;;  %v2392_v19 = vshll.u32 %v7090_v42, 16  ;;  %v2406_v15 = vshll.u32 %v7093_v46, 16  ;;  %v5166_v33 = vld [vmem:[%s6110_s25 + $0xc0] sm:$0xf]  ;;  %v2379_v26 = vor.u32 %v2378_v52, %v2375_v51  ;;  %v6000_v57 = vld [vmem:[%s6110_s25 + $0x54] sm:$0xff]  }
  0xaf   : > { %v2399_v39 = vrot.slane %v2397_v54, 4  ;;  %v2402_v34 = vrot.slane %v2400_v7, 5  ;;  %v2410_v59 = vshrl.u32 %v7093_v46, 16  ;;  %v7112_v22 = vld [vmem:[%s6110_s25 + $0xc4] sm:$0xf]  ;;  %v2342_v43 = vrot.slane %v2341_v24, 4 }
  0xb0   : > { %v2370_v32 = vrot.slane %v2368_v14, 5  ;;  %v2389_v11 = vor.u32 %v2388_v45, %v7097_v55  ;;  %v2408_v42 = vrot.slane %v2406_v15, 5  ;;  %v2416_v7 = vshll.u32 %v7103_v4, 16  ;;  %v7124_v45 = vld [vmem:[%s6110_s25 + $0xc8] sm:$0x1] }
  0xb1   : > { %v2403_v51 = vor.u32 %v2402_v34, %v2399_v39  ;;  %v2412_v52 = vrot.slane %v2410_v59, 4  ;;  %v2421_v54 = vshrl.u32 %v5166_v33, 16  ;;  %v2356_v46 = vrot.slane %v2355_v18, 4 }
  0xb2   : > { %5782 = vmatmul.mubr.msk.bf16.gmra.mxu0 %vm687_vm3, %v6957_v37  ;;  %v2366_v38 = vrot.slane %v2365_v56, 4  ;;  %v2424_v2 = vshll.u32 %v5166_v33, 16  ;;  %v2430_v37 = vshll.u32 %v7112_v22, 16  ;;  %v2380_v24 = vrot.slane %v2379_v26, 4 }
  0xb3   : > { %5785 = vmatprep.mubr.msk.bf16.mxu0 %vm687_vm3, %v6959_v29  ;;  %v2394_v14 = vrot.slane %v2392_v19, 5  ;;  %v2413_v36 = vor.u32 %v2412_v52, %v2408_v42  ;;  %v2423_v15 = vrot.slane %v2421_v54, 4  ;;  %v2390_v34 = vrot.slane %v2389_v11, 4 }
  0xb4   : > { %v2426_v29 = vrot.slane %v2424_v2, 5  ;;  %v7127_v39 = vrot.slane %v2430_v37, 5  ;;  %v2434_v56 = vshrl.u32 %v7112_v22, 16  ;;  %v8829_v26 = vsel %vm6154_vm4, %v7013_v17, %v6999_v6 }
  0xb5   : > { %5748 = vmatmul.mubr.msk.bf16.gmra.mxu1 %vm687_vm3, %v5999_v16  ;;  %v8830_v16 = vsel %vm6154_vm4, %v6997_v23, %v6939_v58  ;;  %v2404_v19 = vrot.slane %v2403_v51, 4  ;;  %v2414_v33 = vrot.slane %v2413_v36, 4  ;;  %v2418_v2 = vrot.slane %v2416_v7, 5  ;;  %v6001_v23 = vld [vmem:[%s6110_s25 + $0x60] sm:$0xff]  }
  0xb6   : > { %5751 = vmatprep.mubr.msk.bf16.mxu1 %vm687_vm3, %v6000_v57  ;;  %v5178_v18 = vcombine.low %v8830_v16, %v8829_v26  ;;  %v8831_v59 = vsel %vm6154_vm4, %v7024_v53, %v7026_v13  ;;  %v8832_v6 = vsel %vm6154_vm4, %v7022_v25, %v6955_v60  ;;  %v2427_v57 = vor.u32 %v2426_v29, %v2423_v15  ;;  %v5204_v13 = vld [vmem:[%s6110_s25 + $0x24] sm:$0xe]  ;;  %v5207_v26 = vld [vmem:[%s6110_s25 + $0x48] sm:$0xe] }
  0xb7   : > { %v5179_v17 = vcombine.low %v8832_v6, %v8831_v59  ;;  %v2436_v11 = vrot.slane %v2434_v56, 4  ;;  %v2440_v58 = vshll.u32 %v7124_v45, 16  ;;  %v8833_v36 = vsel %vm6154_vm4, %v7028_v10, %v6978_v63  ;;  %v6002_v63 = vld [vmem:[%s6110_s25 + $0x6c] sm:$0xff]   ;;  %v5208_v6 = vld [vmem:[%s6110_s25 + $0x54] sm:$0xe] }
  0xb8   : > { %v5180_v51 = vcombine.low %v8833_v36, %v2323_v20  ;;  %v2337_v53 = vsel %vm6154_vm4, %v7100_v12, %v7042_v3  ;;  %v2347_v60 = vsel %vm6154_vm4, %v2342_v43, %v7087_v48  ;;  %v2361_v25 = vsel %vm6154_vm4, %v2356_v46, %v7077_v9  ;;  %v7180_v12 = vld [vmem:[%s6110_s25 + $0xc] sm:$0xe] }
  0xb9   : > { %v2371_v10 = vsel %vm6154_vm4, %v2366_v38, %v2370_v32  ;;  %v2385_v3 = vsel %vm6154_vm4, %v2380_v24, %v7097_v55  ;;  %v2395_v20 = vsel %vm6154_vm4, %v2390_v34, %v2394_v14  ;;  %v2437_v48 = vor.u32 %v2436_v11, %v7127_v39  ;;  %v5205_v55 = vld [vmem:[%s6110_s25 + $0x30] sm:$0xe]  ;;  %v5206_v14 = vld [vmem:[%s6110_s25 + $0x3c] sm:$0xe] }
  0xba   : > { %5786 = vmatmul.mubr.msk.bf16.gmra.mxu0 %vm687_vm3, %v7011_v62  ;;  %v2409_v62 = vsel %vm6154_vm4, %v2404_v19, %v2408_v42  ;;  %v2419_v38 = vsel %vm6154_vm4, %v2414_v33, %v2418_v2  ;;  %v7187_v9 = vrot.slane %v2427_v57, 4  ;;  %v2804_v46 = vrot.slane %v6671_v49, 5  ;;  %v6003_v57 = vld [vmem:[%s6110_s25 + $0x78] sm:$0xff]  }
  0xbb   : > { %5789 = vmatprep.mubr.msk.bf16.mxu0 %vm687_vm3, %v5178_v18  ;;  %v7191_v43 = vcombine.low %v2337_v53, %v2347_v60  ;;  %v7193_v32 = vrot.slane %v2437_v48, 4  ;;  %v7195_v52 = vrot.slane %v2440_v58, 5  ;;  %v5220_v7 = vrot.slane %v5204_v13, 9  ;;  %v6004_v53 = vld [vmem:[%s6110_s25 + $0x84] sm:$0xff]   ;;  %v5209_v13 = vld [vmem:[%s6110_s25 + $0x60] sm:$0xe] }
  0xbc   : > { %v7198_v54 = vcombine.low %v2361_v25, %v2371_v10  ;;  %v7200_v42 = vcombine.low %v2385_v3, %v2395_v20  ;;  %v5218_v37 = vrot.slane %v7180_v12, 9  ;;  %v2818_v24 = vrot.slane %v6720_v44, 5  ;;  %v6010_v49 = vld [vmem:[%s6110_s25 + $0x18] sm:$0xff]  }
  0xbd   : > { %5752 = vmatmul.mubr.msk.bf16.gmra.mxu1 %vm687_vm3, %v6001_v23  ;;  %v7206_v15 = vcombine.low %v2409_v62, %v2419_v38  ;;  %v2807_v34 = vrot.slane %v6707_v47, 5  ;;  %v2821_v29 = vrot.slane %v6735_v21, 5  ;;  %v5221_v56 = vrot.slane %v5205_v55, 9  ;;  %v5211_v55 = vld [vmem:[%s6110_s25 + $0x78] sm:$0xe] }
  0xbe   : > { %5755 = vmatprep.mubr.msk.bf16.mxu1 %vm687_vm3, %v6002_v63  ;;  %v2433_v16 = vsel %vm6154_vm4, %v7187_v9, %v7127_v39  ;;  %v7217_v44 = vrot.slane %v2804_v46, 4  ;;  %v7221_v18 = vsel %vm6440_vm7, %v5220_v7, %v2818_v24  ;;  %v2820_v19 = vrot.slane %v2818_v24, 4 }
  0xbf   : > { %v2443_v21 = vsel %vm6154_vm4, %v7193_v32, %v7195_v52  ;;  %v2825_v33 = vrot.slane %v6758_v5, 5  ;;  %v2828_v2 = vrot.slane %v6766_v41, 5  ;;  %v5222_v59 = vrot.slane %v5206_v14, 9  ;;  %v6009_v52 = vld [vmem:[%s6110_s25 + $0xc0] sm:$0xff]  }
  0xc0   : > { %v7233_v11 = vsel %vm6440_vm7, %v2820_v19, %v2821_v29  ;;  %v2832_v58 = vrot.slane %v6775_v61, 5  ;;  %v2835_v23 = vrot.slane %v6827_v50, 5  ;;  %v5223_v36 = vrot.slane %v5207_v26, 9  ;;  %v5212_v19 = vld [vmem:[%s6110_s25 + $0x84] sm:$0xe] }
  0xc1   : > { %v5237_v5 = vcombine.low %v7221_v18, %v7233_v11  ;;  %v7243_v41 = vsel %vm6440_vm7, %v5221_v56, %v2825_v33  ;;  %v2827_v60 = vrot.slane %v2825_v33, 4  ;;  %v2839_v25 = vrot.slane %v6793_v1, 5 }
  0xc2   : > { %5790 = vmatmul.mubr.msk.bf16.gmra.mxu0 %vm687_vm3, %v5179_v17  ;;  %v7250_v61 = vsel %vm6440_vm7, %v5222_v59, %v2832_v58  ;;  %v2834_v50 = vrot.slane %v2832_v58, 4  ;;  %v2842_v17 = vrot.slane %v6841_v8, 5  ;;  %v5224_v63 = vrot.slane %v5208_v6, 9  ;;  %v8834_v59 = vld [vmem:[#allocation4_spill] sm:$0xff] }
  0xc3   : > { %5793 = vmatprep.mubr.msk.bf16.mxu0 %vm687_vm3, %v5180_v51  ;;  %v7255_v10 = vsel %vm6440_vm7, %v2827_v60, %v2828_v2  ;;  %v7259_v3 = vsel %vm6440_vm7, %v5223_v36, %v2839_v25  ;;  %v2841_v1 = vrot.slane %v2839_v25, 4  ;;  %v2846_v20 = vrot.slane %v6836_v40, 5  ;;  %v5210_v51 = vld [vmem:[%s6110_s25 + $0x6c] sm:$0xe]  ;;  %v6005_v58 = vld [vmem:[%s6110_s25 + $0x90] sm:$0xff]  }
  0xc4   : > { %v5238_v48 = vcombine.low %v7243_v41, %v7255_v10  ;;  %v7268_v8 = vsel %vm6440_vm7, %v2834_v50, %v2835_v23  ;;  %v2849_v62 = vrot.slane %v6858_v35, 5  ;;  %v5225_v38 = vrot.slane %v5209_v13, 9  ;;  %v8835_v36 = vld [vmem:[#allocation3_spill] sm:$0xff]  ;;  %v5213_v60 = vld [vmem:[%s6110_s25 + $0x90] sm:$0xe]  ;;  %v8836_v50 = vld [vmem:[#allocation6_spill] sm:$0xff] }
  0xc5   : > { %5756 = vmatmul.mubr.msk.bf16.gmra.mxu1 %vm687_vm3, %v6003_v57  ;;  %v5239_v40 = vcombine.low %v7250_v61, %v7268_v8  ;;  %v7277_v7 = vsel %vm6440_vm7, %v2841_v1, %v2842_v17  ;;  %v7281_v24 = vsel %vm6440_vm7, %v5224_v63, %v2846_v20  ;;  %v2848_v14 = vrot.slane %v2846_v20, 4 }
  0xc6   : > { %5759 = vmatprep.mubr.msk.bf16.mxu1 %vm687_vm3, %v6004_v53  ;;  %v5240_v35 = vcombine.low %v7259_v3, %v7277_v7  ;;  %v2853_v29 = vrot.slane %v6871_v28, 5  ;;  %v2856_v56 = vrot.slane %v6893_v30, 5  ;;  %v5226_v26 = vrot.slane %v5210_v51, 9  ;;  %v8837_v51 = vld [vmem:[#allocation5_spill] sm:$0xff]  ;;  %v5344_v3 = vld [vmem:[%s6110_s25 + $0x48] sm:$0xf] }
  0xc7   : > { %v7290_v33 = vsel %vm6440_vm7, %v2848_v14, %v2849_v62  ;;  %v2860_v2 = vrot.slane %v6890_v27, 5  ;;  %v2863_v6 = vrot.slane %v8834_v59, 5  ;;  %v5227_v57 = vrot.slane %v5211_v55, 9  ;;  %v6006_v27 = vld [vmem:[%s6110_s25 + $0x9c] sm:$0xff]   ;;  %v8845_v55 = vld [vmem:[#allocation15_spill] sm:$0xff] }
  0xc8   : > { %v5241_v23 = vcombine.low %v7281_v24, %v7290_v33  ;;  %v7299_v28 = vsel %vm6440_vm7, %v5225_v38, %v2853_v29  ;;  %v2855_v30 = vrot.slane %v2853_v29, 4  ;;  %v2867_v53 = vrot.slane %v8835_v36, 5  ;;  %v5214_v38 = vld [vmem:[%s6110_s25 + $0x9c] sm:$0xe]  ;;  %v8840_v36 = vld [vmem:[#allocation12_spill] sm:$0xff] }
  0xc9   : > { %v7308_v25 = vsel %vm6440_vm7, %v5226_v26, %v2860_v2  ;;  %v2862_v13 = vrot.slane %v2860_v2, 4  ;;  %v2870_v17 = vrot.slane %v8836_v50, 5  ;;  %v5228_v63 = vrot.slane %v5212_v19, 9  ;;  %v5215_v26 = vld [vmem:[%s6110_s25 + $0xa8] sm:$0xe] }
  0xca   : > { %5794 = vmatmul.mubr.msk.bf16.gmra.mxu0 %vm687_vm3, %v7191_v43  ;;  %v7315_v1 = vsel %vm6440_vm7, %v2855_v30, %v2856_v56  ;;  %v7319_v43 = vsel %vm6440_vm7, %v5227_v57, %v2867_v53  ;;  %v2869_v20 = vrot.slane %v2867_v53, 4  ;;  %v2874_v62 = vrot.slane %v8837_v51, 5  ;;  %v5217_v57 = vld [vmem:[%s6110_s25 + $0xc0] sm:$0xe]  ;;  %v6007_v19 = vld [vmem:[%s6110_s25 + $0xa8] sm:$0xff]  }
  0xcb   : > { %5797 = vmatprep.mubr.msk.bf16.mxu0 %vm687_vm3, %v7198_v54  ;;  %v7327_v14 = vsel %vm6440_vm7, %v2862_v13, %v2863_v6  ;;  %v8838_v54 = vld [vmem:[#allocation8_spill] sm:$0xff]  ;;  %v5229_v56 = vrot.slane %v5213_v60, 9  ;;  %v2884_v53 = vrot.slane %v8840_v36, 5  ;;  %v5230_v60 = vrot.slane %v5214_v38, 9  ;;  %v8843_v38 = vld [vmem:[#allocation13_spill] sm:$0xff] }
  0xcc   : > { %v2877_v29 = vrot.slane %v8838_v54, 5  ;;  %v7336_v2 = vsel %vm6440_vm7, %v2869_v20, %v2870_v17  ;;  %v7340_v59 = vsel %vm6440_vm7, %v5228_v63, %v2874_v62  ;;  %v2876_v6 = vrot.slane %v2874_v62, 4  ;;  %v5216_v13 = vld [vmem:[%s6110_s25 + $0xb4] sm:$0xe]  ;;  %v8841_v17 = vld [vmem:[#allocation10_spill] sm:$0xff] }
  0xcd   : > { %5760 = vmatmul.mubr.msk.bf16.gmra.mxu1 %vm687_vm3, %v6005_v58  ;;  %v8839_v58 = vld [vmem:[#allocation7_spill] sm:$0xff]  ;;  %v2888_v63 = vrot.slane %v8841_v17, 5  ;;  %v8842_v20 = vld [vmem:[#allocation2_spill] sm:$0xff]  ;;  %v5231_v62 = vrot.slane %v5215_v26, 9  ;;  %v2895_v36 = vrot.slane %v8843_v38, 5  ;;  %v5232_v26 = vrot.slane %v5216_v13, 9 }
  0xce   : > { %5763 = vmatprep.mubr.msk.bf16.mxu1 %vm687_vm3, %v6006_v27  ;;  %v2881_v30 = vrot.slane %v8839_v58, 5  ;;  %v7350_v50 = vsel %vm6440_vm7, %v2876_v6, %v2877_v29  ;;  %v2891_v51 = vrot.slane %v8842_v20, 5  ;;  %v8844_v17 = vld [vmem:[#allocation14_spill] sm:$0xff]  ;;  %v6008_v27 = vld [vmem:[%s6110_s25 + $0xb4] sm:$0xff]   ;;  %v2808_v39 = vsel %vm6440_vm7, %v7217_v44, %v2807_v34  ;;  %v7567_v7 = vld [vmem:[%s6110_s25 + $0x4c] sm:$0xf] }
  0xcf   : > { %v7365_v29 = vsel %vm6440_vm7, %v5230_v60, %v2888_v63  ;;  %v2890_v6 = vrot.slane %v2888_v63, 4  ;;  %v2898_v20 = vrot.slane %v8844_v17, 5  ;;  %v2897_v38 = vrot.slane %v2895_v36, 4  ;;  %v6027_v44 = vld [vmem:[%s6110_s25 + $0x20] sm:$0x1] }
  0xd0   : > { %v7358_v54 = vsel %vm6440_vm7, %v5229_v56, %v2881_v30  ;;  %v2883_v58 = vrot.slane %v2881_v30, 4  ;;  %v7377_v30 = vsel %vm6440_vm7, %v5231_v62, %v2895_v36  ;;  %v2902_v60 = vrot.slane %v8845_v55, 5 }
  0xd1   : > { %v5233_v63 = vrot.slane %v5217_v57, 9  ;;  %v7393_v55 = vsel %vm6440_vm7, %v2897_v38, %v2898_v20  ;;  %v2909_v57 = vrot.slane %v7112_v22, 5  ;;  %v2805_v22 = vsel %vm6440_vm7, %v5218_v37, %v2804_v46  ;;  %v6012_v38 = vld [vmem:[%s6110_s25 + $0x30] sm:$0xff]  }
  0xd2   : > { %5798 = vmatmul.mubr.msk.bf16.gmra.mxu0 %vm687_vm3, %v7200_v42  ;;  %v7373_v56 = vsel %vm6440_vm7, %v2883_v58, %v2884_v53  ;;  %v7386_v42 = vsel %vm6440_vm7, %v2890_v6, %v2891_v51  ;;  %v2905_v53 = vrot.slane %v7103_v4, 5  ;;  %v2904_v58 = vrot.slane %v2902_v60, 4 }
  0xd3   : > { %5801 = vmatprep.mubr.msk.bf16.mxu0 %vm687_vm3, %v7206_v15  ;;  %v7397_v15 = vsel %vm6440_vm7, %v5232_v26, %v2902_v60  ;;  %v2912_v51 = vrot.slane %v7124_v45, 5  ;;  %v5203_v45 = vld [vmem:[%s6110_s25 + $0x18] sm:$0xe]  ;;  %v7437_v9 = vsel %vm6440_vm7, %v5233_v63, %v2909_v57  ;;  %v2911_v46 = vrot.slane %v2909_v57, 4  ;;  %v6011_v26 = vld [vmem:[%s6110_s25 + $0x24] sm:$0xff]  }
  0xd4   : > { %v7425_v32 = vsel %vm6440_vm7, %v2904_v58, %v2905_v53  ;;  %v5219_v37 = vrot.slane %v5203_v45, 9  ;;  %v5235_v34 = vcombine.low %v2805_v22, %v2808_v39  ;;  %v8846_v60 = vld [vmem:[#allocation9_spill] sm:$0xff] }
  0xd5   : > { %5764 = vmatmul.mubr.msk.bf16.gmra.mxu1 %vm687_vm3, %v6007_v19  ;;  %v5185_v19 = vcombine.low %v2433_v16, %v2443_v21  ;;  %v7442_v47 = vsel %vm6440_vm7, %v2911_v46, %v2912_v51  ;;  %v2814_v21 = vrot.slane %v6027_v44, 5  ;;  %v4571_v53 = vsel %vm736_vm0, %v8846_v60, 0  ;;  %v5332_v63 = vld [vmem:[%s6110_s25 + $0x18] sm:$0xf]  ;;  %v5333_v57 = vld [vmem:[%s6110_s25 + $0x1c] sm:$0xf] }
  0xd6   : > { %5767 = vmatprep.mubr.msk.bf16.mxu1 %vm687_vm3, %v6008_v27  ;;  %v6026_v27 = vld [vmem:[%s6110_s25 + $0x1c] sm:$0xf]  ;;  %v5335_v51 = vld [vmem:[%s6110_s25 + $0x24] sm:$0xf]  ;;  %v3619_v45 = vshrl.u32 %v5332_v63, 16  ;;  %v3628_v39 = vshll.u32 %v5333_v57, 16 }
  0xd7   : > { %v2811_v36 = vrot.slane %v6026_v27, 5  ;;  %v3622_v27 = vshll.u32 %v5332_v63, 16  ;;  %v3643_v46 = vshrl.u32 %v5335_v51, 16  ;;  %v6014_v44 = vld [vmem:[%s6110_s25 + $0x48] sm:$0xff]   ;;  %v5413_v60 = vld [vmem:[%s6110_s25 + $0x18] sm:$0xe] }
  0xd8   : > { %v7483_v63 = vld [vmem:[%s6110_s25 + $0x2c] sm:$0x1] }
  0xd9   : > { %v2813_v16 = vrot.slane %v2811_v36, 4  ;;  %v2812_v17 = vsel %vm6440_vm7, %v5219_v37, %v2811_v36  ;;  %v7467_v36 = vld [vmem:[%s6110_s25 + $0x28] sm:$0xf]  ;;  %v6013_v37 = vld [vmem:[%s6110_s25 + $0x3c] sm:$0xff]   ;;  %v3645_v18 = vrot.slane %v3643_v46, 4 }
  0xda   : > { %5802 = vmatmul.mubr.msk.bf16.gmra.mxu0 %vm687_vm3, %v5185_v19  ;;  %v8847_v19 = vld [vmem:[#allocation11_spill] sm:$0xff] }
  0xdb   : > { %5841 = vmatprep.mubr.msk.bf16.mxu0 %vm687_vm3, %v6010_v49  ;;  %v2815_v20 = vsel %vm6440_vm7, %v2813_v16, %v2814_v21  ;;  %v4101_v22 = vsel %vm736_vm0, %v8847_v19, 0  ;;  %v3632_v49 = vshrl.u32 %v5333_v57, 16  ;;  %v3656_v16 = vshrl.u32 %v7467_v36, 16  ;;  %v5334_v21 = vld [vmem:[%s6110_s25 + $0x20] sm:$0x1] }
  0xdc   : > { %v5236_v58 = vcombine.low %v2812_v17, %v2815_v20  ;;  %v3621_v17 = vrot.slane %v3619_v45, 4  ;;  %v3624_v20 = vrot.slane %v3622_v27, 5  ;;  %v5338_v19 = vld [vmem:[%s6110_s25 + $0x30] sm:$0xf]  ;;  %v3638_v45 = vshll.u32 %v5334_v21, 16 }
  0xdd   : > { %5768 = vmatmul.mubr.msk.bf16.gmra.mxu1 %vm687_vm3, %v6009_v52  ;;  %v3646_v52 = vshll.u32 %v5335_v51, 16  ;;  %v3658_v51 = vrot.slane %v3656_v16, 4  ;;  %v5429_v27 = vrot.slane %v5413_v60, 9  ;;  %v4365_v46 = vrot.slane %v5334_v21, 5  ;;  %v5414_v16 = vld [vmem:[%s6110_s25 + $0x24] sm:$0xe] }
  0xde   : > { %5807 = vmatprep.mubr.msk.bf16.mxu1 %vm687_vm3, %v5235_v34  ;;  %v3652_v34 = vshll.u32 %v7467_v36, 16  ;;  %v6015_v21 = vld [vmem:[%s6110_s25 + $0x54] sm:$0xff]   ;;  %v3670_v10 = vshll.u32 %v5338_v19, 16  ;;  %v6016_v60 = vld [vmem:[%s6110_s25 + $0x60] sm:$0xff]  }
  0xdf   : > { %v3648_v11 = vrot.slane %v3646_v52, 5  ;;  %v3662_v52 = vshll.u32 %v7483_v63, 16 }
  0xe2   : > { %5842 = vmatmul.mubr.msk.bf16.vlgmr.msra.gmra.mxu0 %vm687_vm3, %v6011_v26  ;;  %v7479_v26 = vrot.slane %v3628_v39, 5 }
  0xe3   : > { %5908 = vmatpush3.bf16.msra.mxu0 %v4571_v53  ;;  %5845 = vmatprep.mubr.msk.bf16.mxu0 %vm687_vm3, %v6012_v38  ;;  %v3634_v38 = vrot.slane %v3632_v49, 4  ;;  %v4362_v53 = vrot.slane %v5333_v57, 5  ;;  %v7493_v57 = vld [vmem:[%s6110_s25 + $0x34] sm:$0xf] }
  0xe5   : > { %5808 = vmatmul.mubr.msk.bf16.vlgmr.msra.gmra.mxu1 %vm687_vm3, %v5236_v58  ;;  %v7488_v58 = vrot.slane %v3652_v34, 5  ;;  %v3635_v39 = vor.u32 %v3634_v38, %v7479_v26  ;;  %v4364_v49 = vrot.slane %v4362_v53, 4  ;;  %v3649_v34 = vor.u32 %v3648_v11, %v3645_v18 }
  0xe6   : > { %5874 = vmatpush3.bf16.msra.mxu1 %v4101_v22  ;;  %5811 = vmatprep.mubr.msk.bf16.mxu1 %vm687_vm3, %v5237_v5  ;;  %v7486_v5 = vpop.f32.mrf.mxu0  ;;  %v3625_v22 = vor.u32 %v3624_v20, %v3621_v17  ;;  %v3667_v17 = vshrl.u32 %v5338_v19, 16  ;;  %v3680_v38 = vshrl.u32 %v7493_v57, 16  ;;  %v7518_v61 = vsel %vm6440_vm7, %v5429_v27, %v4362_v53  ;;  %v5341_v19 = vld [vmem:[%s6110_s25 + $0x3c] sm:$0xf] }
  0xe7   : > { %v3659_v41 = vor.u32 %v3658_v51, %v7488_v58  ;;  %v3636_v8 = vrot.slane %v3635_v39, 4  ;;  %v3664_v11 = vrot.slane %v3662_v52, 5  ;;  %v5430_v51 = vrot.slane %v5414_v16, 9  ;;  %v7532_v39 = vld [vmem:[%s6110_s25 + $0x38] sm:$0x1] }
  0xe8   : > { %v7510_v20 = vpop.f32.mrf.mxu0  ;;  %v3626_v18 = vrot.slane %v3625_v22, 4  ;;  %v3650_v12 = vrot.slane %v3649_v34, 4  ;;  %v4372_v22 = vrot.slane %v7483_v63, 5  ;;  %v3682_v52 = vrot.slane %v3680_v38, 4 }
  0xe9   : > { %v3660_v27 = vrot.slane %v3659_v41, 4  ;;  %v3691_v34 = vshrl.u32 %v5341_v19, 16  ;;  %v3694_v16 = vshll.u32 %v5341_v19, 16  ;;  %v7545_v41 = vld [vmem:[%s6110_s25 + $0x40] sm:$0xf] }
  0xea   : > { %5846 = vmatmul.mubr.msk.bf16.gmra.mxu0 %vm687_vm3, %v6013_v37  ;;  %v7529_v53 = vpop.f32.mrf.mxu0  ;;  %v3631_v63 = vsel %vm6154_vm4, %v3626_v18, %v7479_v26  ;;  %v3655_v26 = vsel %vm6154_vm4, %v3650_v12, %v7488_v58  ;;  %v5415_v18 = vld [vmem:[%s6110_s25 + $0x30] sm:$0xe]  ;;  %v3700_v24 = vshll.u32 %v7545_v41, 16  ;;  %v3704_v33 = vshrl.u32 %v7545_v41, 16 }
  0xeb   : > { %5849 = vmatprep.mubr.msk.bf16.mxu0 %vm687_vm3, %v6014_v44  ;;  %v7501_v37 = vpop.f32.mrf.mxu1  ;;  %v4369_v44 = vrot.slane %v7467_v36, 5  ;;  %v3640_v36 = vrot.slane %v3638_v45, 5  ;;  %v3669_v45 = vrot.slane %v3667_v17, 4  ;;  %v3665_v58 = vsel %vm6154_vm4, %v3660_v27, %v3664_v11 }
  0xec   : > { %8848 = vst [vmem:[#allocation4_spill] sm:$0xff] %v7501_v37  ;;  %v7574_v12 = vpop.f32.mrf.mxu0  ;;  %v3696_v19 = vrot.slane %v3694_v16, 5  ;;  %v3728_v11 = vshrl.u32 %v7567_v7, 16 }
  0xed   : > { %5812 = vmatmul.mubr.msk.bf16.gmra.mxu1 %vm687_vm3, %v5238_v48  ;;  %v3676_v48 = vshll.u32 %v7493_v57, 16  ;;  %v7525_v6 = vpop.f32.mrf.mxu1  ;;  %v4371_v4 = vrot.slane %v4369_v44, 4  ;;  %v3641_v17 = vsel %vm6154_vm4, %v3636_v8, %v3640_v36  ;;  %v4376_v36 = vrot.slane %v7493_v57, 5  ;;  %v6018_v8 = vld [vmem:[%s6110_s25 + $0x78] sm:$0xff]  }
  0xee   : > { %5815 = vmatprep.mubr.msk.bf16.mxu1 %vm687_vm3, %v5239_v40  ;;  %v7522_v40 = vsel %vm6440_vm7, %v4364_v49, %v4365_v46  ;;  %8849 = vst [vmem:[#allocation3_spill] sm:$0xff] %v7525_v6  ;;  %v3672_v49 = vrot.slane %v3670_v10, 5  ;;  %v7588_v27 = vcombine.low %v3631_v63, %v3641_v17  ;;  %v7590_v57 = vcombine.low %v3655_v26, %v3665_v58  ;;  %v7604_v17 = vld [vmem:[%s6110_s25 + $0x58] sm:$0xf]  ;;  %v7610_v58 = vld [vmem:[%s6110_s25 + $0x44] sm:$0x1] }
  0xef   : > { %v7534_v46 = vrot.slane %v3676_v48, 5  ;;  %v7551_v10 = vpop.f32.mrf.mxu1  ;;  %v7558_v48 = vsel %vm6440_vm7, %v5430_v51, %v4369_v44  ;;  %v7562_v38 = vsel %vm6440_vm7, %v4371_v4, %v4372_v22  ;;  %v3693_v51 = vrot.slane %v3691_v34, 4  ;;  %v5347_v34 = vld [vmem:[%s6110_s25 + $0x54] sm:$0xf] }
  0xf0   : > { %8850 = vst [vmem:[#allocation6_spill] sm:$0xff] %v7551_v10  ;;  %v3673_v44 = vor.u32 %v3672_v49, %v3669_v45  ;;  %v3718_v22 = vshll.u32 %v5344_v3, 16  ;;  %v4378_v13 = vrot.slane %v4376_v36, 4  ;;  %v4379_v63 = vrot.slane %v7532_v39, 5  ;;  %v5416_v49 = vld [vmem:[%s6110_s25 + $0x3c] sm:$0xe] }
  0xf1   : > { %v3683_v4 = vor.u32 %v3682_v52, %v7534_v46  ;;  %v7586_v45 = vpop.f32.mrf.mxu1  ;;  %v5431_v52 = vrot.slane %v5415_v18, 9  ;;  %v3697_v18 = vor.u32 %v3696_v19, %v3693_v51  ;;  %v8853_v6 = vcombine.low %v7299_v28, %v7315_v1 }
  0xf2   : > { %5850 = vmatmul.mubr.msk.bf16.gmra.mxu0 %vm687_vm3, %v6015_v21  ;;  %v3724_v21 = vshll.u32 %v7567_v7, 16  ;;  %8851 = vst [vmem:[#allocation5_spill] sm:$0xff] %v7586_v45  ;;  %v3720_v45 = vrot.slane %v3718_v22, 5  ;;  %v3739_v51 = vshrl.u32 %v5347_v34, 16  ;;  %v3742_v19 = vshll.u32 %v5347_v34, 16 }
  0xf3   : > { %5853 = vmatprep.mubr.msk.bf16.mxu0 %vm687_vm3, %v6016_v60  ;;  %v3686_v60 = vshll.u32 %v7532_v39, 16  ;;  %v7607_v26 = vrot.slane %v3683_v4, 4  ;;  %v3730_v39 = vrot.slane %v3728_v11, 4  ;;  %v7645_v22 = vsel %vm6440_vm7, %v4378_v13, %v4379_v63 }
  0xf4   : > { %v7615_v10 = vrot.slane %v3724_v21, 5  ;;  %v8855_v21 = vcombine.low %v7308_v25, %v7327_v14  ;;  %v4383_v25 = vrot.slane %v7545_v41, 5  ;;  %v6020_v14 = vld [vmem:[%s6110_s25 + $0x90] sm:$0xff]   ;;  %v5432_v1 = vrot.slane %v5416_v49, 9  ;;  %v5350_v41 = vld [vmem:[%s6110_s25 + $0x60] sm:$0xf] }
  0xf5   : > { %5816 = vmatmul.mubr.msk.bf16.gmra.mxu1 %vm687_vm3, %v5240_v35  ;;  %v6017_v35 = vld [vmem:[%s6110_s25 + $0x6c] sm:$0xff]   ;;  %v7600_v62 = vrot.slane %v3686_v60, 5  ;;  %v3741_v37 = vrot.slane %v3739_v51, 4 }
  0xf6   : > { %5819 = vmatprep.mubr.msk.bf16.mxu1 %vm687_vm3, %v5241_v23  ;;  %v3715_v23 = vshrl.u32 %v5344_v3, 16  ;;  %v7598_v3 = vrot.slane %v3673_v44, 4  ;;  %v3706_v44 = vrot.slane %v3704_v33, 4  ;;  %v3752_v33 = vshrl.u32 %v7604_v17, 16 }
  0xf7   : > { %v7596_v16 = vpop.f32.mrf.mxu0  ;;  %v3731_v13 = vor.u32 %v3730_v39, %v7615_v10  ;;  %v4390_v39 = vrot.slane %v7567_v7, 5  ;;  %v8859_v7 = vcombine.low %v7319_v43, %v7336_v2  ;;  %v8861_v43 = vcombine.low %v7340_v59, %v7350_v50  ;;  %v6021_v2 = vld [vmem:[%s6110_s25 + $0x9c] sm:$0xff]  }
  0xf8   : > { %8852 = vst [vmem:[#allocation8_spill] sm:$0xff] %v7596_v16  ;;  %v3717_v60 = vrot.slane %v3715_v23, 4  ;;  %v6019_v23 = vld [vmem:[%s6110_s25 + $0x84] sm:$0xff]   ;;  %v7672_v16 = vld [vmem:[%s6110_s25 + $0x5c] sm:$0x1]  ;;  %v4397_v59 = vrot.slane %v7604_v17, 5 }
  0xf9   : > { %v7633_v28 = vpop.f32.mrf.mxu0 }
  0xfa   : > { %5854 = vmatmul.mubr.msk.bf16.gmra.mxu0 %vm687_vm3, %v6017_v35  ;;  %v7612_v35 = vrot.slane %v3700_v24, 5  ;;  %v3748_v24 = vshll.u32 %v7604_v17, 16  ;;  %8856 = vst [vmem:[#allocation12_spill] sm:$0xff] %v7633_v28  ;;  %v3744_v28 = vrot.slane %v3742_v19, 5 }
  0xfb   : > { %5857 = vmatprep.mubr.msk.bf16.mxu0 %vm687_vm3, %v6018_v8  ;;  %v7621_v4 = vpop.f32.mrf.mxu1  ;;  %v7624_v8 = vld [vmem:[%s6110_s25 + $0x50] sm:$0x1]  ;;  %v7665_v49 = vpop.f32.mrf.mxu0 }
  0xfc   : > { %8854 = vst [vmem:[#allocation7_spill] sm:$0xff] %v7621_v4  ;;  %v3707_v34 = vor.u32 %v3706_v44, %v7612_v35  ;;  %v7655_v4 = vrot.slane %v3697_v18, 4  ;;  %v7662_v11 = vrot.slane %v3748_v24, 5  ;;  %v3754_v44 = vrot.slane %v3752_v33, 4  ;;  %8858 = vst [vmem:[#allocation2_spill] sm:$0xff] %v7665_v49 }
  0xfd   : > { %5820 = vmatmul.mubr.msk.bf16.gmra.mxu1 %vm687_vm3, %v8853_v6  ;;  %v7641_v6 = vsel %vm6440_vm7, %v5431_v52, %v4376_v36  ;;  %v3721_v36 = vor.u32 %v3720_v45, %v3717_v60  ;;  %v3734_v52 = vshll.u32 %v7624_v8, 16  ;;  %v7660_v63 = vpop.f32.mrf.mxu1  ;;  %v4385_v18 = vrot.slane %v4383_v25, 4  ;;  %v5417_v24 = vld [vmem:[%s6110_s25 + $0x48] sm:$0xe] }
  0xfe   : > { %5823 = vmatprep.mubr.msk.bf16.mxu1 %vm687_vm3, %v8855_v21  ;;  %v3710_v21 = vshll.u32 %v7610_v58, 16  ;;  %8857 = vst [vmem:[#allocation10_spill] sm:$0xff] %v7660_v63  ;;  %v4386_v60 = vrot.slane %v7610_v58, 5  ;;  %v3708_v51 = vrot.slane %v3707_v34, 4  ;;  %v3763_v33 = vshrl.u32 %v5350_v41, 16 }
  0xff   : > { %v7678_v63 = vsel %vm6440_vm7, %v5432_v1, %v4383_v25  ;;  %v3722_v45 = vrot.slane %v3721_v36, 4  ;;  %v3732_v49 = vrot.slane %v3731_v13, 4  ;;  %v3736_v58 = vrot.slane %v3734_v52, 5  ;;  %v7693_v36 = vld [vmem:[%s6110_s25 + $0x64] sm:$0xf]  ;;  %v7700_v13 = vpop.f32.mrf.mxu0 }
 0x100   : > { %v3712_v19 = vrot.slane %v3710_v21, 5  ;;  %v3703_v34 = vsel %vm6154_vm4, %v7655_v4, %v7612_v35  ;;  %v3745_v21 = vor.u32 %v3744_v28, %v3741_v37  ;;  %v3755_v1 = vor.u32 %v3754_v44, %v7662_v11  ;;  %8862 = vst [vmem:[#allocation14_spill] sm:$0xff] %v7700_v13  ;;  %v5418_v28 = vld [vmem:[%s6110_s25 + $0x54] sm:$0xe]  ;;  %v6025_v13 = vld [vmem:[%s6110_s25 + $0xcc] sm:$0xff]  }
 0x101   : > { %v3758_v25 = vshll.u32 %v7672_v16, 16  ;;  %v7704_v52 = vsel %vm6440_vm7, %v4385_v18, %v4386_v60  ;;  %v5433_v35 = vrot.slane %v5417_v24, 9  ;;  %v4392_v37 = vrot.slane %v4390_v39, 4 }
 0x102   : > { %5858 = vmatmul.mubr.msk.bf16.gmra.mxu0 %vm687_vm3, %v6019_v23  ;;  %v3766_v23 = vshll.u32 %v5350_v41, 16  ;;  %v4393_v4 = vrot.slane %v7624_v8, 5  ;;  %v6022_v41 = vld [vmem:[%s6110_s25 + $0xa8] sm:$0xff]   ;;  %v3713_v44 = vsel %vm6154_vm4, %v3708_v51, %v3712_v19  ;;  %v3765_v50 = vrot.slane %v3763_v33, 4 }
 0x103   : > { %5861 = vmatprep.mubr.msk.bf16.mxu0 %vm687_vm3, %v6020_v14  ;;  %v7684_v14 = vpop.f32.mrf.mxu1  ;;  %v3737_v18 = vsel %vm6154_vm4, %v3732_v49, %v3736_v58  ;;  %v3772_v60 = vshll.u32 %v7693_v36, 16  ;;  %v3776_v8 = vshrl.u32 %v7693_v36, 16  ;;  %v3756_v51 = vrot.slane %v3755_v1, 4  ;;  %v7722_v33 = vld [vmem:[%s6110_s25 + $0x68] sm:$0x1] }
 0x104   : > { %8860 = vst [vmem:[#allocation13_spill] sm:$0xff] %v7684_v14  ;;  %v3746_v14 = vrot.slane %v3745_v21, 4  ;;  %v3760_v17 = vrot.slane %v3758_v25, 5  ;;  %v5434_v19 = vrot.slane %v5418_v28, 9  ;;  %v8865_v49 = vsel %vm6154_vm4, %v7607_v26, %v7600_v62  ;;  %v5353_v25 = vld [vmem:[%s6110_s25 + $0x6c] sm:$0xf] }
 0x105   : > { %5824 = vmatmul.mubr.msk.bf16.gmra.mxu1 %vm687_vm3, %v8859_v7  ;;  %v3768_v7 = vrot.slane %v3766_v23, 5  ;;  %v7719_v24 = vpop.f32.mrf.mxu1  ;;  %v7743_v21 = vsel %vm6440_vm7, %v5433_v35, %v4390_v39  ;;  %v7747_v1 = vsel %vm6440_vm7, %v4392_v37, %v4393_v4  ;;  %v7750_v62 = vcombine.low %v3703_v34, %v3713_v44  ;;  %v5419_v4 = vld [vmem:[%s6110_s25 + $0x60] sm:$0xe]  ;;  %v5359_v44 = vld [vmem:[%s6110_s25 + $0x84] sm:$0xf] }
 0x106   : > { %5827 = vmatprep.mubr.msk.bf16.mxu1 %vm687_vm3, %v8861_v43  ;;  %v3727_v43 = vsel %vm6154_vm4, %v3722_v45, %v7615_v10  ;;  %8863 = vst [vmem:[#allocation15_spill] sm:$0xff] %v7719_v24  ;;  %v8866_v45 = vsel %vm6154_vm4, %v7598_v3, %v7534_v46  ;;  %v4399_v46 = vrot.slane %v4397_v59, 4  ;;  %v4400_v3 = vrot.slane %v7672_v16, 5 }
 0x107   : > { %v7737_v23 = vcombine.low %v8866_v45, %v8865_v49  ;;  %8867 = vst [vmem:[#allocation11_spill] sm:$0xff] %v7750_v62  ;;  %v3769_v26 = vor.u32 %v3768_v7, %v3765_v50  ;;  %v7757_v28 = vcombine.low %v3727_v43, %v3737_v18  ;;  %v7759_v39 = vrot.slane %v3772_v60, 5 }
 0x108   : > { %v7725_v10 = vpop.f32.mrf.mxu0  ;;  %v7761_v35 = vrot.slane %v3776_v8, 4  ;;  %v3782_v37 = vshll.u32 %v7722_v33, 16  ;;  %v8869_v34 = vcombine.low %v7358_v54, %v7373_v56  ;;  %v3751_v50 = vsel %vm6154_vm4, %v3746_v14, %v7662_v11  ;;  %v5356_v54 = vld [vmem:[%s6110_s25 + $0x78] sm:$0xf] }
 0x109   : > { %8864 = vst [vmem:[#allocation9_spill] sm:$0xff] %v7725_v10  ;;  %8868 = vst [vmem:[#allocation16_spill] sm:$0xff] %v7757_v28  ;;  %v3761_v7 = vsel %vm6154_vm4, %v3756_v51, %v3760_v17  ;;  %v7781_v43 = vsel %vm6440_vm7, %v5434_v19, %v4397_v59  ;;  %v8871_v56 = vcombine.low %v7365_v29, %v7386_v42  ;;  %v3787_v60 = vshrl.u32 %v5353_v25, 16  ;;  %v7793_v51 = vld [vmem:[%s6110_s25 + $0x7c] sm:$0xf]  ;;  %v6024_v59 = vld [vmem:[%s6110_s25 + $0xc0] sm:$0xff]  }
 0x10a   : > { %5862 = vmatmul.mubr.msk.bf16.gmra.mxu0 %vm687_vm3, %v6021_v2  ;;  %v7755_v2 = vld [vmem:[%s6110_s25 + $0x70] sm:$0xf]  ;;  %v7788_v18 = vpop.f32.mrf.mxu0  ;;  %v3790_v8 = vshll.u32 %v5353_v25, 16  ;;  %v7798_v17 = vsel %vm6440_vm7, %v4399_v46, %v4400_v3  ;;  %v7800_v29 = vrot.slane %v3769_v26, 4  ;;  %v5435_v42 = vrot.slane %v5419_v4, 9 }
 0x10b   : > { %5865 = vmatprep.mubr.msk.bf16.mxu0 %vm687_vm3, %v6022_v41  ;;  %v6023_v41 = vld [vmem:[%s6110_s25 + $0xb4] sm:$0xff]   ;;  %8872 = vst [vmem:[#allocation18_spill] sm:$0xff] %v7788_v18  ;;  %v3796_v11 = vshll.u32 %v7755_v2, 16  ;;  %v3800_v14 = vshrl.u32 %v7755_v2, 16  ;;  %v4404_v19 = vrot.slane %v7693_v36, 5  ;;  %v7803_v49 = vcombine.low %v3751_v50, %v3761_v7 }
 0x10c   : > { %v3779_v45 = vor.u32 %v7761_v35, %v7759_v39  ;;  %v7807_v25 = vrot.slane %v3782_v37, 5  ;;  %v3811_v46 = vshrl.u32 %v5356_v54, 16  ;;  %v3814_v3 = vshll.u32 %v5356_v54, 16  ;;  %v7819_v4 = vld [vmem:[%s6110_s25 + $0x88] sm:$0xf]  ;;  %v7822_v35 = vpop.f32.mrf.mxu0 }
 0x10d   : > { %5828 = vmatmul.mubr.msk.bf16.gmra.mxu1 %vm687_vm3, %v8869_v34  ;;  %v7769_v16 = vpop.f32.mrf.mxu1  ;;  %8873 = vst [vmem:[#allocation19_spill] sm:$0xff] %v7803_v49  ;;  %v4407_v34 = vrot.slane %v7722_v33, 5  ;;  %v3820_v36 = vshll.u32 %v7793_v51, 16  ;;  %v3824_v26 = vshrl.u32 %v7793_v51, 16  ;;  %8875 = vst [vmem:[#allocation21_spill] sm:$0xff] %v7822_v35  ;;  %v3789_v33 = vrot.slane %v3787_v60, 4 }
 0x10e   : > { %8870 = vst [vmem:[#allocation17_spill] sm:$0xff] %v7769_v16  ;;  %5831 = vmatprep.mubr.msk.bf16.mxu1 %vm687_vm3, %v8871_v56  ;;  %v7811_v56 = vld [vmem:[%s6110_s25 + $0x74] sm:$0x1]  ;;  %v3792_v37 = vrot.slane %v3790_v8, 5  ;;  %v7824_v50 = vrot.slane %v3796_v11, 5  ;;  %v3802_v7 = vrot.slane %v3800_v14, 4  ;;  %v8876_v54 = vcombine.low %v7377_v30, %v7393_v55  ;;  %v7852_v49 = vpop.f32.mrf.mxu0 }
 0x10f   : > { %v7814_v58 = vpop.f32.mrf.mxu1  ;;  %v4406_v16 = vrot.slane %v4404_v19, 4  ;;  %v7837_v60 = vld [vmem:[%s6110_s25 + $0x80] sm:$0x1]  ;;  %v7840_v8 = vld [vmem:[%s6110_s25 + $0x6c] sm:$0xe]  ;;  %v3835_v11 = vshrl.u32 %v5359_v44, 16 }
 0x110   : > { %8874 = vst [vmem:[#allocation20_spill] sm:$0xff] %v7814_v58  ;;  %v7833_v58 = vsel %vm6440_vm7, %v5435_v42, %v4404_v19  ;;  %v3838_v14 = vshll.u32 %v5359_v44, 16  ;;  %v3848_v24 = vshrl.u32 %v7819_v4, 16  ;;  %v3813_v19 = vrot.slane %v3811_v46, 4  ;;  %8878 = vst [vmem:[#allocation23_spill] sm:$0xff] %v7852_v49 }
 0x111   : > { %v7848_v42 = vpop.f32.mrf.mxu1  ;;  %v3816_v35 = vrot.slane %v3814_v3, 5  ;;  %v7850_v18 = vrot.slane %v3820_v36, 5  ;;  %v3826_v10 = vrot.slane %v3824_v26, 4  ;;  %v8879_v44 = vcombine.low %v7397_v15, %v7425_v32  ;;  %v7871_v32 = vld [vmem:[%s6110_s25 + $0x8c] sm:$0x1] }
 0x112   : > { %5866 = vmatmul.mubr.msk.bf16.gmra.mxu0 %vm687_vm3, %v6023_v41  ;;  %v3806_v41 = vshll.u32 %v7811_v56, 16  ;;  %8877 = vst [vmem:[#allocation22_spill] sm:$0xff] %v7848_v42  ;;  %v3793_v30 = vor.u32 %v3792_v37, %v3789_v33  ;;  %v3803_v55 = vor.u32 %v3802_v7, %v7824_v50  ;;  %v3830_v46 = vshll.u32 %v7837_v60, 16  ;;  %v5421_v33 = vld [vmem:[%s6110_s25 + $0x78] sm:$0xe] }
 0x113   : > { %5869 = vmatprep.mubr.msk.bf16.mxu0 %vm687_vm3, %v6024_v59  ;;  %v3844_v59 = vshll.u32 %v7819_v4, 16  ;;  %v7862_v3 = vrot.slane %v3779_v45, 4  ;;  %v7866_v36 = vsel %vm6440_vm7, %v4406_v16, %v4407_v34  ;;  %v5436_v26 = vrot.slane %v7840_v8, 9  ;;  %v7876_v42 = vpop.f32.mrf.mxu1  ;;  %v5362_v8 = vld [vmem:[%s6110_s25 + $0x90] sm:$0xf] }
 0x114   : > { %v4418_v15 = vrot.slane %v7793_v51, 5  ;;  %v3837_v37 = vrot.slane %v3835_v11, 4  ;;  %v3840_v7 = vrot.slane %v3838_v14, 5  ;;  %8880 = vst [vmem:[#allocation24_spill] sm:$0xff] %v7876_v42  ;;  %v3808_v45 = vrot.slane %v3806_v41, 5 }
 0x115   : > { %5832 = vmatmul.mubr.msk.bf16.gmra.mxu1 %vm687_vm3, %v8876_v54  ;;  %v4411_v54 = vrot.slane %v7755_v2, 5  ;;  %v7874_v2 = vrot.slane %v3844_v59, 5  ;;  %v4414_v49 = vrot.slane %v7811_v56, 5  ;;  %v3817_v16 = vor.u32 %v3816_v35, %v3813_v19  ;;  %v7885_v59 = vld [vmem:[%s6110_s25 + $0x94] sm:$0xf] }
 0x116   : > { %5835 = vmatprep.mubr.msk.bf16.mxu1 %vm687_vm3, %v8879_v44  ;;  %v3850_v44 = vrot.slane %v3848_v24, 4  ;;  %v3827_v34 = vor.u32 %v3826_v10, %v7850_v18  ;;  %v3794_v51 = vrot.slane %v3793_v30, 4  ;;  %v3804_v11 = vrot.slane %v3803_v55, 4 }
 0x117   : > { %v4413_v62 = vrot.slane %v4411_v54, 4  ;;  %v3832_v14 = vrot.slane %v3830_v46, 5  ;;  %v8881_v24 = vcombine.low %v7518_v61, %v7522_v40  ;;  %v5437_v56 = vrot.slane %v5421_v33, 9 }
 0x118   : > { %v4420_v35 = vrot.slane %v4418_v15, 4  ;;  %v4421_v10 = vrot.slane %v7837_v60, 5  ;;  %v3854_v41 = vshll.u32 %v7871_v32, 16  ;;  %v3851_v30 = vor.u32 %v3850_v44, %v7874_v2 }
 0x119   : > { %v3859_v55 = vshrl.u32 %v5362_v8, 16  ;;  %v3862_v46 = vshll.u32 %v5362_v8, 16  ;;  %v8883_v61 = vcombine.low %v7437_v9, %v7442_v47  ;;  %v3818_v40 = vrot.slane %v3817_v16, 4 }
 0x11a   : > { %v7881_v28 = vpop.f32.mrf.mxu0  ;;  %5870 = vmatmul.mubr.msk.bf16.gmra.mxu0 %vm687_vm3, %v6025_v13  ;;  %v3841_v13 = vor.u32 %v3840_v7, %v3837_v37  ;;  %v3828_v33 = vrot.slane %v3827_v34, 4  ;;  %v3868_v60 = vshll.u32 %v7885_v59, 16  ;;  %v3785_v37 = vsel %vm6154_vm4, %v7862_v3, %v7807_v25 }
 0x11b   : > { %5909 = vmatprep.mubr.msk.bf16.mxu0 %vm687_vm3, %v8881_v24  ;;  %v3872_v24 = vshrl.u32 %v7885_v59, 16  ;;  %v3799_v9 = vsel %vm6154_vm4, %v3794_v51, %v7824_v50  ;;  %v7917_v47 = vsel %vm6440_vm7, %v5436_v26, %v4411_v54  ;;  %v7921_v7 = vsel %vm6440_vm7, %v4413_v62, %v4414_v49  ;;  %v5422_v54 = vld [vmem:[%s6110_s25 + $0x84] sm:$0xe]  ;;  %v8922_v31 = vld [vmem:[#allocation24_spill] sm:$0xff] }
 0x11c   : > { %v7893_v19 = vpop.f32.mrf.mxu0  ;;  %v7929_v25 = vsel %vm6440_vm7, %v5437_v56, %v4418_v15  ;;  %v7933_v50 = vsel %vm6440_vm7, %v4420_v35, %v4421_v10  ;;  %v3856_v3 = vrot.slane %v3854_v41, 5  ;;  %v3842_v62 = vrot.slane %v3841_v13, 4  ;;  %v7957_v13 = vld [vmem:[%s6110_s25 + $0x98] sm:$0x1] }
 0x11d   : > { %8882 = vst [vmem:[#allocation25_spill] sm:$0xff] %v7893_v19  ;;  %v7896_v42 = vpop.f32.mrf.mxu1  ;;  %5836 = vmatmul.mubr.msk.bf16.gmra.mxu1 %vm687_vm3, %v8883_v61  ;;  %v3852_v49 = vrot.slane %v3851_v30, 4  ;;  %v3861_v16 = vrot.slane %v3859_v55, 4  ;;  %v3864_v34 = vrot.slane %v3862_v46, 5  ;;  %v3823_v15 = vsel %vm6154_vm4, %v3818_v40, %v7850_v18  ;;  %v5365_v30 = vld [vmem:[%s6110_s25 + $0x9c] sm:$0xf] }
 0x11e   : > { %v7904_v19 = vpop.f32.mrf.mxu0  ;;  %5875 = vmatprep.mubr.msk.bf16.mxu1 %vm687_vm3, %v7588_v27  ;;  %v3809_v27 = vsel %vm6154_vm4, %v3804_v11, %v3808_v45  ;;  %v3833_v45 = vsel %vm6154_vm4, %v3828_v33, %v3832_v14  ;;  %v7945_v51 = vrot.slane %v3868_v60, 5  ;;  %v3874_v11 = vrot.slane %v3872_v24, 4  ;;  %v7988_v24 = vld [vmem:[%s6110_s25 + $0xa0] sm:$0xf] }
 0x11f   : > { %v7923_v44 = vpop.f32.mrf.mxu1  ;;  %v8884_v35 = vcombine.low %v7558_v48, %v7562_v38  ;;  %v5451_v10 = vcombine.low %v7781_v43, %v7798_v17  ;;  %v5452_v41 = vcombine.low %v7833_v58, %v7866_v36  ;;  %v5438_v18 = vrot.slane %v5422_v54, 9 }
 0x120   : > { %v7936_v26 = vpop.f32.mrf.mxu0  ;;  %v4425_v14 = vrot.slane %v7819_v4, 5  ;;  %v8885_v48 = vcombine.low %v7641_v6, %v7645_v22  ;;  %v8886_v38 = vsel %vm6154_vm4, %v7800_v29, %v7759_v39  ;;  %v7973_v61 = vcombine.low %v3799_v9, %v3809_v27  ;;  %v5423_v29 = vld [vmem:[%s6110_s25 + $0x90] sm:$0xe]  ;;  %v8893_v4 = vld [vmem:[#allocation2_spill] sm:$0xff] }
 0x121   : > { %v7938_v8 = vpop.f32.mrf.mxu1  ;;  %v7971_v46 = vcombine.low %v8886_v38, %v3785_v37  ;;  %v7979_v60 = vcombine.low %v3823_v15, %v3833_v45  ;;  %v3847_v6 = vsel %vm6154_vm4, %v3842_v62, %v7874_v2  ;;  %v3857_v22 = vsel %vm6154_vm4, %v3852_v49, %v3856_v3 }
 0x122   : > { %v5707_v56 = vpop.f32.mrf.mxu0  ;;  %5910 = vmatmul.mubr.msk.bf16.vlgmr.msra.gmra.mxu0 %vm687_vm3, %v8884_v35  ;;  %v3865_v39 = vor.u32 %v3864_v34, %v3861_v16  ;;  %v3875_v9 = vor.u32 %v3874_v11, %v7945_v51  ;;  %v3878_v27 = vshll.u32 %v7957_v13, 16  ;;  %v3883_v54 = vshrl.u32 %v5365_v30, 16 }
 0x123   : > { %v7960_v55 = vpop.f32.mrf.mxu1  ;;  %5913 = vmatprep.mubr.msk.bf16.mxu0 %vm687_vm3, %v8885_v48  ;;  %v3886_v15 = vshll.u32 %v5365_v30, 16  ;;  %v7999_v3 = vsel %vm6440_vm7, %v5438_v18, %v4425_v14  ;;  %v4427_v62 = vrot.slane %v4425_v14, 4  ;;  %v4428_v49 = vrot.slane %v7871_v32, 5 }
 0x124   : > { %v1491_v33 = vpop.f32.mrf.mxu0  ;;  %v5439_v16 = vrot.slane %v5423_v29, 9  ;;  %v4432_v34 = vrot.slane %v7885_v59, 5  ;;  %v3892_v11 = vshll.u32 %v7988_v24, 16  ;;  %v3896_v35 = vshrl.u32 %v7988_v24, 16 }
 0x125   : > { %v5673_v37 = vpop.f32.mrf.mxu1  ;;  %5876 = vmatmul.mubr.msk.bf16.vlgmr.msra.gmra.mxu1 %vm687_vm3, %v7590_v57  ;;  %v8008_v48 = vcombine.low %v3847_v6, %v3857_v22  ;;  %v8010_v18 = vrot.slane %v3865_v39, 4  ;;  %v3876_v32 = vrot.slane %v3875_v9, 4  ;;  %v3880_v38 = vrot.slane %v3878_v27, 5  ;;  %v5368_v22 = vld [vmem:[%s6110_s25 + $0xa8] sm:$0xf] }
 0x126   : > { %v1075_v45 = vadd.f32 %v5673_v37, %v7486_v5  ;;  %v5708_v2 = vpop.f32.mrf.mxu0  ;;  %5879 = vmatprep.mubr.msk.bf16.mxu1 %vm687_vm3, %v7737_v23  ;;  %v3885_v29 = vrot.slane %v3883_v54, 4  ;;  %v3888_v59 = vrot.slane %v3886_v15, 5  ;;  %v4435_v6 = vrot.slane %v7957_v13, 5  ;;  %v8036_v27 = vld [vmem:[%s6110_s25 + $0xac] sm:$0xf] }
 0x127   : > { %v1066_v57 = vpop.f32.mrf.mxu1  ;;  %v3898_v9 = vrot.slane %v3896_v35, 4  ;;  %v8890_v35 = vld [vmem:[#allocation8_spill] sm:$0xff] }
 0x128   : > { %v8005_v5 = vadd.f32 %v5707_v56, %v1075_v45  ;;  %v1067_v23 = vadd.f32 %v1066_v57, %v7510_v20  ;;  %v1494_v30 = vpop.f32.mrf.mxu0  ;;  %v8887_v45 = vcombine.low %v7678_v63, %v7704_v52  ;;  %v8021_v20 = vsel %vm6440_vm7, %v4427_v62, %v4428_v49  ;;  %v5424_v62 = vld [vmem:[%s6110_s25 + $0x9c] sm:$0xe] }
 0x129   : > { %v5674_v14 = vpop.f32.mrf.mxu1  ;;  %v4434_v63 = vrot.slane %v4432_v34, 4  ;;  %v8033_v52 = vrot.slane %v3892_v11, 5  ;;  %v4439_v49 = vrot.slane %v7988_v24, 5  ;;  %v3916_v24 = vshll.u32 %v8036_v27, 16 }
 0x12a   : > { %v8012_v37 = vadd.f32 %v1491_v33, %v1067_v23  ;;  %v1078_v40 = vadd.f32 %v5674_v14, %v7529_v53  ;;  %v5711_v56 = vpop.f32.mrf.mxu0  ;;  %5914 = vmatmul.mubr.msk.bf16.gmra.mxu0 %vm687_vm3, %v8887_v45  ;;  %v8888_v33 = vcombine.low %v7743_v21, %v7747_v1  ;;  %v8031_v53 = vsel %vm6440_vm7, %v5439_v16, %v4432_v34  ;;  %v5367_v1 = vld [vmem:[%s6110_s25 + $0xa4] sm:$0x1]  ;;  %v8889_v16 = vld [vmem:[#allocation11_spill] sm:$0xff] }
 0x12b   : > { %v1069_v39 = vpop.f32.mrf.mxu1  ;;  %v3871_v21 = vsel %vm6154_vm4, %v8010_v18, %v7945_v51  ;;  %v3907_v34 = vshrl.u32 %v5368_v22, 16  ;;  %v8891_v51 = vld [vmem:[#allocation16_spill] sm:$0xff]  ;;  %v3920_v18 = vshrl.u32 %v8036_v27, 16 }
 0x12c   : > { %5917 = vmatprep.mubr.msk.bf16.mxu0 %vm687_vm3, %v8888_v33  ;;  %v8038_v54 = vadd.f32 %v5708_v2, %v1078_v40  ;;  %v1070_v13 = vadd.f32 %v1069_v39, %v7574_v12  ;;  %v1507_v15 = vpop.f32.mrf.mxu0  ;;  %v3881_v40 = vsel %vm6154_vm4, %v3876_v32, %v3880_v38  ;;  %v3889_v2 = vor.u32 %v3888_v59, %v3885_v29  ;;  %v8892_v59 = vld [vmem:[#allocation12_spill] sm:$0xff] }
 0x12d   : > { %v5677_v57 = vpop.f32.mrf.mxu1  ;;  %5880 = vmatmul.mubr.msk.bf16.gmra.mxu1 %vm687_vm3, %v8889_v16  ;;  %v3910_v12 = vshll.u32 %v5368_v22, 16  ;;  %v8061_v39 = vsel %vm6440_vm7, %v4434_v63, %v4435_v6  ;;  %v3899_v32 = vor.u32 %v3898_v9, %v8033_v52  ;;  %v3902_v38 = vshll.u32 %v5367_v1, 16 }
 0x12e   : > { %v8052_v11 = vadd.f32 %v1494_v30, %v1070_v13  ;;  %v1091_v23 = vadd.f32 %v5677_v57, %v8890_v35  ;;  %v5712_v14 = vpop.f32.mrf.mxu0  ;;  %5883 = vmatprep.mubr.msk.bf16.mxu1 %vm687_vm3, %v8891_v51  ;;  %v5440_v30 = vrot.slane %v5424_v62, 9  ;;  %v4441_v13 = vrot.slane %v4439_v49, 4 }
 0x12f   : > { %v1082_v45 = vpop.f32.mrf.mxu1  ;;  %v4442_v57 = vrot.slane %v5367_v1, 5  ;;  %v8069_v51 = vrot.slane %v3889_v2, 4  ;;  %v3909_v6 = vrot.slane %v3907_v34, 4  ;;  %v3912_v63 = vrot.slane %v3910_v12, 5  ;;  %v8079_v1 = vld [vmem:[%s6110_s25 + $0xb0] sm:$0x1] }
 0x130   : > { %v8064_v29 = vadd.f32 %v5711_v56, %v1091_v23  ;;  %v1083_v22 = vadd.f32 %v1082_v45, %v8892_v59  ;;  %v1510_v33 = vpop.f32.mrf.mxu0  ;;  %v8081_v23 = vrot.slane %v3916_v24, 5  ;;  %v3922_v2 = vrot.slane %v3920_v18, 4  ;;  %v8894_v12 = vld [vmem:[#allocation14_spill] sm:$0xff] }
 0x131   : > { %v5678_v16 = vpop.f32.mrf.mxu1  ;;  %v8091_v43 = vrot.slane %v3899_v32, 4  ;;  %v8093_v17 = vrot.slane %v3902_v38, 5  ;;  %v8101_v58 = vsel %vm6440_vm7, %v5440_v30, %v4439_v49  ;;  %v8105_v36 = vsel %vm6440_vm7, %v4441_v13, %v4442_v57  ;;  %v8117_v30 = vld [vmem:[%s6110_s25 + $0xb8] sm:$0xf] }
 0x132   : > { %v8071_v9 = vadd.f32 %v1507_v15, %v1083_v22  ;;  %v1094_v62 = vadd.f32 %v5678_v16, %v8893_v4  ;;  %v5715_v56 = vpop.f32.mrf.mxu0  ;;  %5918 = vmatmul.mubr.msk.bf16.gmra.mxu0 %vm687_vm3, %v5451_v10  ;;  %v8087_v15 = vcombine.low %v3871_v21, %v3881_v40  ;;  %v5425_v10 = vld [vmem:[%s6110_s25 + $0xa8] sm:$0xe]  ;;  %v3913_v32 = vor.u32 %v3912_v63, %v3909_v6  ;;  %v8896_v22 = vld [vmem:[#allocation9_spill] sm:$0xff] }
 0x133   : > { %v1085_v45 = vpop.f32.mrf.mxu1  ;;  %5921 = vmatprep.mubr.msk.bf16.mxu0 %vm687_vm3, %v5452_v41  ;;  %v5371_v41 = vld [vmem:[%s6110_s25 + $0xb4] sm:$0xf]  ;;  %v8895_v40 = vld [vmem:[#allocation19_spill] sm:$0xff]  ;;  %v3926_v38 = vshll.u32 %v8079_v1, 16  ;;  %v4446_v49 = vrot.slane %v8036_v27, 5  ;;  %v3923_v16 = vor.u32 %v3922_v2, %v8081_v23  ;;  %v3905_v27 = vsel %vm6154_vm4, %v8091_v43, %v8093_v17 }
 0x134   : > { %v8096_v34 = vadd.f32 %v5712_v14, %v1094_v62  ;;  %v1086_v24 = vadd.f32 %v1085_v45, %v8894_v12  ;;  %v1523_v18 = vpop.f32.mrf.mxu0  ;;  %v5441_v62 = vrot.slane %v5425_v10, 9  ;;  %v3931_v6 = vshrl.u32 %v5371_v41, 16 }
 0x135   : > { %v5681_v21 = vpop.f32.mrf.mxu1  ;;  %5884 = vmatmul.mubr.msk.bf16.gmra.mxu1 %vm687_vm3, %v8895_v40  ;;  %v3934_v63 = vshll.u32 %v5371_v41, 16  ;;  %v3940_v2 = vshll.u32 %v8117_v30, 16  ;;  %v3944_v10 = vshrl.u32 %v8117_v30, 16  ;;  %v5374_v40 = vld [vmem:[%s6110_s25 + $0xc0] sm:$0xf]  ;;  %v3914_v4 = vrot.slane %v3913_v32, 4 }
 0x136   : > { %v8119_v59 = vadd.f32 %v1510_v33, %v1086_v24  ;;  %v1107_v13 = vadd.f32 %v5681_v21, %v8896_v22  ;;  %v5716_v57 = vpop.f32.mrf.mxu0  ;;  %5887 = vmatprep.mubr.msk.bf16.mxu1 %vm687_vm3, %v7971_v46  ;;  %v8898_v24 = vld [vmem:[#allocation18_spill] sm:$0xff]  ;;  %v3928_v43 = vrot.slane %v3926_v38, 5  ;;  %v4448_v17 = vrot.slane %v4446_v49, 4 }
 0x137   : > { %v1098_v45 = vpop.f32.mrf.mxu1  ;;  %v4449_v33 = vrot.slane %v8079_v1, 5  ;;  %v8147_v14 = vsel %vm6440_vm7, %v5441_v62, %v4446_v49  ;;  %v8150_v32 = vld [vmem:[%s6110_s25 + $0xc4] sm:$0xf]  ;;  %v8902_v1 = vcombine.low %v7929_v25, %v7933_v50  ;;  %v8162_v62 = vrot.slane %v3940_v2, 5 }
 0x138   : > { %v8131_v12 = vadd.f32 %v5715_v56, %v1107_v13  ;;  %v1099_v21 = vadd.f32 %v1098_v45, %v8898_v24  ;;  %v1526_v46 = vpop.f32.mrf.mxu0  ;;  %v8900_v56 = vld [vmem:[#allocation21_spill] sm:$0xff]  ;;  %v8901_v45 = vcombine.low %v7917_v47, %v7921_v7  ;;  %v3924_v24 = vrot.slane %v3923_v16, 4  ;;  %v8903_v16 = vld [vmem:[#allocation23_spill] sm:$0xff] }
 0x139   : > { %v5682_v22 = vpop.f32.mrf.mxu1  ;;  %v3955_v47 = vshrl.u32 %v5374_v40, 16  ;;  %v3958_v7 = vshll.u32 %v5374_v40, 16  ;;  %v3919_v25 = vsel %vm6154_vm4, %v3914_v4, %v8081_v23  ;;  %v8171_v50 = vsel %vm6440_vm7, %v4448_v17, %v4449_v33  ;;  %v5426_v40 = vld [vmem:[%s6110_s25 + $0xb4] sm:$0xe] }
 0x13a   : > { %8897 = vst [vmem:[#allocation11_spill] sm:$0xff] %v8131_v12  ;;  %v8138_v35 = vadd.f32 %v1523_v18, %v1099_v21  ;;  %v1110_v41 = vadd.f32 %v5682_v22, %v8900_v56  ;;  %v5719_v13 = vpop.f32.mrf.mxu0  ;;  %5922 = vmatmul.mubr.msk.bf16.gmra.mxu0 %vm687_vm3, %v8901_v45  ;;  %v8157_v18 = vld [vmem:[%s6110_s25 + $0xbc] sm:$0x1]  ;;  %v3933_v21 = vrot.slane %v3931_v6, 4  ;;  %v3936_v22 = vrot.slane %v3934_v63, 5 }
 0x13b   : > { %v1101_v38 = vpop.f32.mrf.mxu1  ;;  %5925 = vmatprep.mubr.msk.bf16.mxu0 %vm687_vm3, %v8902_v1  ;;  %v3968_v6 = vshrl.u32 %v8150_v32, 16  ;;  %v3950_v23 = vshll.u32 %v8157_v18, 16  ;;  %v4453_v17 = vrot.slane %v8117_v30, 5  ;;  %v8904_v1 = vld [vmem:[#allocation25_spill] sm:$0xff] }
 0x13c   : > { %8899 = vst [vmem:[#allocation8_spill] sm:$0xff] %v8138_v35  ;;  %v8159_v56 = vadd.f32 %v5716_v57, %v1110_v41  ;;  %v1102_v45 = vadd.f32 %v1101_v38, %v8903_v16  ;;  %v1539_v49 = vpop.f32.mrf.mxu0  ;;  %v3946_v35 = vrot.slane %v3944_v10, 4  ;;  %v3964_v57 = vshll.u32 %v8150_v32, 16 }
 0x13d   : > { %v5685_v12 = vpop.f32.mrf.mxu1  ;;  %5888 = vmatmul.mubr.msk.bf16.gmra.mxu1 %vm687_vm3, %v7973_v61  ;;  %v3929_v61 = vsel %vm6154_vm4, %v3924_v24, %v3928_v43  ;;  %v3937_v33 = vor.u32 %v3936_v22, %v3933_v21  ;;  %v3957_v41 = vrot.slane %v3955_v47, 4  ;;  %v3960_v38 = vrot.slane %v3958_v7, 5 }
 0x13e   : > { %v8175_v63 = vadd.f32 %v1526_v46, %v1102_v45  ;;  %v1123_v2 = vadd.f32 %v5685_v12, %v7881_v28  ;;  %v5720_v10 = vpop.f32.mrf.mxu0  ;;  %5891 = vmatprep.mubr.msk.bf16.mxu1 %vm687_vm3, %v7979_v60  ;;  %v8905_v60 = vsel %vm6154_vm4, %v8069_v51, %v8033_v52  ;;  %v3947_v24 = vor.u32 %v3946_v35, %v8162_v62 }
 0x13f   : > { %v1114_v4 = vpop.f32.mrf.mxu1  ;;  %v8193_v43 = vcombine.low %v8905_v60, %v3905_v27  ;;  %v8196_v30 = vcombine.low %v3919_v25, %v3929_v61  ;;  %v8200_v22 = vrot.slane %v3964_v57, 5  ;;  %v3970_v47 = vrot.slane %v3968_v6, 4  ;;  %v5376_v27 = vld [vmem:[%s6110_s25 + $0xc8] sm:$0x1] }
 0x140   : > { %v8185_v46 = vadd.f32 %v5719_v13, %v1123_v2  ;;  %v1115_v28 = vadd.f32 %v1114_v4, %v8904_v1  ;;  %v1542_v12 = vpop.f32.mrf.mxu0  ;;  %v5458_v13 = vcombine.low %v8147_v14, %v8171_v50  ;;  %v8906_v52 = vcombine.low %v7999_v3, %v8021_v20  ;;  %v5377_v14 = vld [vmem:[%s6110_s25 + $0xcc] sm:$0xf]  ;;  %v8221_v20 = vld [vmem:[%s6110_s25 + $0xd0] sm:$0xf]  ;;  %v5427_v4 = vld [vmem:[%s6110_s25 + $0xc0] sm:$0xe] }
 0x141   : > { %v5686_v21 = vpop.f32.mrf.mxu1  ;;  %v8209_v35 = vrot.slane %v3950_v23, 5  ;;  %v5442_v51 = vrot.slane %v5426_v40, 9  ;;  %v8907_v50 = vcombine.low %v8031_v53, %v8061_v39  ;;  %v4456_v57 = vrot.slane %v8157_v18, 5 }
 0x142   : > { %v8202_v7 = vadd.f32 %v1539_v49, %v1115_v28  ;;  %v1126_v16 = vadd.f32 %v5686_v21, %v7904_v19  ;;  %v5723_v45 = vpop.f32.mrf.mxu0  ;;  %5926 = vmatmul.mubr.msk.bf16.gmra.mxu0 %vm687_vm3, %v8906_v52  ;;  %v8217_v49 = vrot.slane %v3937_v33, 4  ;;  %v4455_v19 = vrot.slane %v4453_v17, 4 }
 0x143   : > { %v1117_v25 = vpop.f32.mrf.mxu1  ;;  %5929 = vmatprep.mubr.msk.bf16.mxu0 %vm687_vm3, %v8907_v50  ;;  %v3961_v3 = vor.u32 %v3960_v38, %v3957_v41  ;;  %v8226_v23 = vrot.slane %v3947_v24, 4  ;;  %v4460_v53 = vrot.slane %v8150_v32, 5  ;;  %v3971_v33 = vor.u32 %v3970_v47, %v8200_v22 }
 0x144   : > { %v8223_v6 = vadd.f32 %v5720_v10, %v1126_v16  ;;  %v1118_v2 = vadd.f32 %v1117_v25, %v7936_v26  ;;  %v1555_v61 = vpop.f32.mrf.mxu0  ;;  %v3974_v18 = vshll.u32 %v5376_v27, 16  ;;  %v3979_v40 = vshrl.u32 %v5377_v14, 16  ;;  %v8910_v10 = vld [vmem:[#allocation4_spill] sm:$0xff]  ;;  %v8911_v16 = vld [vmem:[#allocation3_spill] sm:$0xff] }
 0x145   : > { %v5689_v39 = vpop.f32.mrf.mxu1  ;;  %5892 = vmatmul.mubr.msk.bf16.gmra.mxu1 %vm687_vm3, %v8008_v48  ;;  %v3982_v41 = vshll.u32 %v5377_v14, 16  ;;  %v3988_v28 = vshll.u32 %v8221_v20, 16  ;;  %v3992_v32 = vshrl.u32 %v8221_v20, 16  ;;  %v4454_v48 = vsel %vm6440_vm7, %v5442_v51, %v4453_v17  ;;  %v8912_v17 = vld [vmem:[#allocation6_spill] sm:$0xff] }
 0x146   : > { %8908 = vst [vmem:[#allocation16_spill] sm:$0xff] %v8223_v6  ;;  %v8233_v38 = vadd.f32 %v1542_v12, %v1118_v2  ;;  %v1139_v1 = vadd.f32 %v5689_v39, %v8910_v10  ;;  %v5724_v26 = vpop.f32.mrf.mxu0  ;;  %5895 = vmatprep.mubr.msk.bf16.mxu1 %vm687_vm3, %v8087_v15  ;;  %v4457_v24 = vsel %vm6440_vm7, %v4455_v19, %v4456_v57  ;;  %v3962_v21 = vrot.slane %v3961_v3, 4 }
 0x147   : > { %v1130_v60 = vpop.f32.mrf.mxu1  ;;  %v5443_v12 = vrot.slane %v5427_v4, 9  ;;  %v4462_v25 = vrot.slane %v4460_v53, 4  ;;  %v4463_v15 = vrot.slane %v5376_v27, 5  ;;  %v3972_v2 = vrot.slane %v3971_v33, 4  ;;  %v5379_v33 = vld [vmem:[%s6110_s25 + $0xd4] sm:$0x1] }
 0x148   : > { %8909 = vst [vmem:[#allocation12_spill] sm:$0xff] %v8233_v38  ;;  %v8244_v47 = vadd.f32 %v5723_v45, %v1139_v1  ;;  %v1131_v52 = vadd.f32 %v1130_v60, %v8911_v16  ;;  %v1558_v14 = vpop.f32.mrf.mxu0  ;;  %v3976_v39 = vrot.slane %v3974_v18, 5  ;;  %v3981_v10 = vrot.slane %v3979_v40, 4  ;;  %v8914_v18 = vld [vmem:[#allocation5_spill] sm:$0xff] }
 0x149   : > { %v5690_v50 = vpop.f32.mrf.mxu1  ;;  %v3984_v38 = vrot.slane %v3982_v41, 5  ;;  %v8913_v45 = vcombine.low %v8101_v58, %v8105_v36  ;;  %v8254_v57 = vrot.slane %v3988_v28, 5  ;;  %v3994_v27 = vrot.slane %v3992_v32, 4 }
 0x14a   : > { %v8247_v6 = vadd.f32 %v1555_v61, %v1131_v52  ;;  %v1142_v51 = vadd.f32 %v5690_v50, %v8912_v17  ;;  %v5727_v19 = vpop.f32.mrf.mxu0  ;;  %v3943_v61 = vsel %vm6154_vm4, %v8217_v49, %v8162_v62  ;;  %v3953_v4 = vsel %vm6154_vm4, %v8226_v23, %v8209_v35  ;;  %v5428_v62 = vld [vmem:[%s6110_s25 + $0xcc] sm:$0xe] }
 0x14b   : > { %5930 = vmatmul.mubr.msk.bf16.gmra.mxu0 %vm687_vm3, %v8913_v45  ;;  %v1133_v3 = vpop.f32.mrf.mxu1  ;;  %v4467_v58 = vrot.slane %v8221_v20, 5  ;;  %v4464_v1 = vsel %vm6440_vm7, %v4462_v25, %v4463_v15  ;;  %v5459_v35 = vcombine.low %v4454_v48, %v4457_v24  ;;  %v3967_v20 = vsel %vm6154_vm4, %v3962_v21, %v8200_v22  ;;  %v8916_v25 = vld [vmem:[#allocation10_spill] sm:$0xff] }
 0x14c   : > { %5933 = vmatprep.mubr.msk.bf16.mxu0 %vm687_vm3, %v5458_v13  ;;  %v8267_v36 = vadd.f32 %v5724_v26, %v1142_v51  ;;  %v1134_v40 = vadd.f32 %v1133_v3, %v8914_v18  ;;  %v1571_v41 = vpop.f32.mrf.mxu0  ;;  %v4461_v13 = vsel %vm6440_vm7, %v5443_v12, %v4460_v53  ;;  %v3977_v23 = vsel %vm6154_vm4, %v3972_v2, %v3976_v39  ;;  %v8915_v53 = vld [vmem:[#allocation7_spill] sm:$0xff] }
 0x14d   : > { %v5693_v49 = vpop.f32.mrf.mxu1  ;;  %5896 = vmatmul.mubr.msk.bf16.gmra.mxu1 %vm687_vm3, %v8193_v43  ;;  %v3985_v26 = vor.u32 %v3984_v38, %v3981_v10  ;;  %v3995_v12 = vor.u32 %v3994_v27, %v8254_v57  ;;  %v3998_v43 = vshll.u32 %v5379_v33, 16  ;;  %v5460_v24 = vcombine.low %v4461_v13, %v4464_v1 }
 0x14e   : > { %v8282_v28 = vadd.f32 %v1558_v14, %v1134_v40  ;;  %v1155_v32 = vadd.f32 %v5693_v49, %v8915_v53  ;;  %v5728_v60 = vpop.f32.mrf.mxu0  ;;  %5899 = vmatprep.mubr.msk.bf16.mxu1 %vm687_vm3, %v8196_v30  ;;  %v5444_v16 = vrot.slane %v5428_v62, 9  ;;  %v4469_v52 = vrot.slane %v4467_v58, 4  ;;  %v8917_v30 = vld [vmem:[#allocation13_spill] sm:$0xff] }
 0x14f   : > { %v1146_v48 = vpop.f32.mrf.mxu1  ;;  %v4470_v22 = vrot.slane %v5379_v33, 5  ;;  %v5394_v50 = vcombine.low %v3943_v61, %v3953_v4  ;;  %v5395_v2 = vcombine.low %v3967_v20, %v3977_v23  ;;  %v3986_v39 = vrot.slane %v3985_v26, 4  ;;  %v8918_v33 = vld [vmem:[#allocation15_spill] sm:$0xff]  ;;  %v8919_v62 = vld [vmem:[#allocation17_spill] sm:$0xff]  ;;  %v8920_v26 = vld [vmem:[#allocation20_spill] sm:$0xff] }
 0x150   : > { %v8288_v21 = vadd.f32 %v5727_v19, %v1155_v32  ;;  %v1147_v38 = vadd.f32 %v1146_v48, %v8916_v25  ;;  %v1574_v14 = vpop.f32.mrf.mxu0  ;;  %v3996_v45 = vrot.slane %v3995_v12, 4  ;;  %v4000_v27 = vrot.slane %v3998_v43, 5  ;;  %v8921_v43 = vld [vmem:[#allocation22_spill] sm:$0xff] }
 0x151   : > { %v5694_v15 = vpop.f32.mrf.mxu1  ;;  %v4468_v19 = vsel %vm6440_vm7, %v5444_v16, %v4467_v58  ;;  %v4471_v61 = vsel %vm6440_vm7, %v4469_v52, %v4470_v22  ;;  %v3991_v13 = vsel %vm6154_vm4, %v3986_v39, %v8254_v57 }
 0x152   : > { %v8291_v10 = vadd.f32 %v1571_v41, %v1147_v38  ;;  %v1158_v17 = vadd.f32 %v5694_v15, %v8917_v30  ;;  %v5731_v51 = vpop.f32.mrf.mxu0  ;;  %v4001_v0 = vsel %vm6154_vm4, %v3996_v45, %v4000_v27 }
 0x153   : > { %5934 = vmatmul.mubr.msk.bf16.gmra.mxu0 %vm687_vm3, %v5459_v35  ;;  %v1149_v3 = vpop.f32.mrf.mxu1  ;;  %v5461_v35 = vcombine.low %v4468_v19, %v4471_v61  ;;  %v5396_v12 = vcombine.low %v3991_v13, %v4001_v0 }
 0x154   : > { %5937 = vmatprep.mubr.msk.bf16.mxu0 %vm687_vm3, %v5460_v24  ;;  %v8300_v4 = vadd.f32 %v5728_v60, %v1158_v17  ;;  %v1150_v18 = vadd.f32 %v1149_v3, %v8918_v33  ;;  %v1587_v40 = vpop.f32.mrf.mxu0 }
 0x155   : > { %v5697_v41 = vpop.f32.mrf.mxu1  ;;  %5900 = vmatmul.mubr.msk.bf16.gmra.mxu1 %vm687_vm3, %v5394_v50 }
 0x156   : > { %v8307_v1 = vadd.f32 %v1574_v14, %v1150_v18  ;;  %v1171_v49 = vadd.f32 %v5697_v41, %v8919_v62  ;;  %v5732_v58 = vpop.f32.mrf.mxu0  ;;  %5903 = vmatprep.mubr.msk.bf16.mxu1 %vm687_vm3, %v5395_v2 }
 0x157   : > { %v1162_v20 = vpop.f32.mrf.mxu1 }
 0x158   : > { %v8313_v23 = vadd.f32 %v5731_v51, %v1171_v49  ;;  %v1163_v53 = vadd.f32 %v1162_v20, %v8920_v26  ;;  %v1590_v32 = vpop.f32.mrf.mxu0 }
 0x159   : > { %v5698_v60 = vpop.f32.mrf.mxu1 }
 0x15a   : > { %v8316_v57 = vadd.f32 %v1587_v40, %v1163_v53  ;;  %v1174_v48 = vadd.f32 %v5698_v60, %v8921_v43  ;;  %v5735_v24 = vpop.f32.mrf.mxu0 }
 0x15b   : > { %5938 = vmatmul.mubr.msk.bf16.gmra.mxu0 %vm687_vm3, %v5461_v35  ;;  %v1165_v16 = vpop.f32.mrf.mxu1 }
 0x15c   : > { %v8320_v52 = vadd.f32 %v5732_v58, %v1174_v48  ;;  %v1166_v22 = vadd.f32 %v1165_v16, %v8922_v31  ;;  %v1603_v25 = vpop.f32.mrf.mxu0 }
 0x15d   : > { %v5701_v38 = vpop.f32.mrf.mxu1  ;;  %5904 = vmatmul.mubr.msk.bf16.gmra.mxu1 %vm687_vm3, %v5396_v12 }
 0x15e   : > { %v8324_v14 = vadd.f32 %v1590_v32, %v1166_v22  ;;  %v1187_v15 = vadd.f32 %v5701_v38, %v7896_v42  ;;  %v5736_v50 = vpop.f32.mrf.mxu0 }
 0x15f   : > { %v1178_v2 = vpop.f32.mrf.mxu1 }
 0x160   : > { %v8327_v39 = vadd.f32 %v5735_v24, %v1187_v15  ;;  %v1179_v30 = vadd.f32 %v1178_v2, %v7923_v44  ;;  %v1606_v17 = vpop.f32.mrf.mxu0 }
 0x161   : > { %v5702_v51 = vpop.f32.mrf.mxu1 }
 0x162   : > { %v8330_v45 = vadd.f32 %v1603_v25, %v1179_v30  ;;  %v1190_v27 = vadd.f32 %v5702_v51, %v7938_v8  ;;  %v5775_v3 = vpop.f32.mrf.mxu0  ;;  %v8923_v30 = vld [vmem:[#allocation11_spill] sm:$0xff] }
 0x163   : > { %v1181_v19 = vpop.f32.mrf.mxu1 }
 0x164   : > { %v8333_v61 = vadd.f32 %v5736_v50, %v1190_v27  ;;  %v1182_v33 = vadd.f32 %v1181_v19, %v7960_v55  ;;  %v2579_v18 = vpop.f32.mrf.mxu0 }
 0x165   : > { %v5741_v42 = vpop.f32.mrf.mxu1 }
 0x166   : > { %v8336_v40 = vadd.f32 %v1606_v17, %v1182_v33  ;;  %v1982_v41 = vadd.f32 %v5741_v42, %v8005_v5  ;;  %v5776_v13 = vpop.f32.mrf.mxu0 }
 0x167   : > { %v1853_v44 = vpop.f32.mrf.mxu1 }
 0x168   : > { %v8339_v62 = vadd.f32 %v5775_v3, %v1982_v41  ;;  %v1980_v49 = vadd.f32 %v1853_v44, %v8012_v37  ;;  %v2582_v58 = vpop.f32.mrf.mxu0  ;;  %v8924_v3 = vld [vmem:[#allocation8_spill] sm:$0xff] }
 0x169   : > { %v5742_v8 = vpop.f32.mrf.mxu1 }
 0x16a   : > { %v8342_v0 = vadd.f32 %v2579_v18, %v1980_v49  ;;  %v1983_v35 = vadd.f32 %v5742_v8, %v8038_v54  ;;  %v5779_v20 = vpop.f32.mrf.mxu0 }
 0x16b   : > { %v1856_v55 = vpop.f32.mrf.mxu1 }
 0x16c   : > { %v8345_v26 = vadd.f32 %v5776_v13, %v1983_v35  ;;  %v1981_v53 = vadd.f32 %v1856_v55, %v8052_v11  ;;  %v2595_v32 = vpop.f32.mrf.mxu0 }
 0x16d   : > { %v5745_v5 = vpop.f32.mrf.mxu1 }
 0x16e   : > { %v8348_v60 = vadd.f32 %v2582_v58, %v1981_v53  ;;  %v1986_v12 = vadd.f32 %v5745_v5, %v8064_v29  ;;  %v5780_v43 = vpop.f32.mrf.mxu0 }
 0x16f   : > { %v1869_v37 = vpop.f32.mrf.mxu1 }
 0x170   : > { %v8351_v48 = vadd.f32 %v5779_v20, %v1986_v12  ;;  %v1984_v24 = vadd.f32 %v1869_v37, %v8071_v9  ;;  %v2598_v16 = vpop.f32.mrf.mxu0 }
 0x171   : > { %v5746_v54 = vpop.f32.mrf.mxu1 }
 0x172   : > { %v8354_v31 = vadd.f32 %v2595_v32, %v1984_v24  ;;  %v1987_v22 = vadd.f32 %v5746_v54, %v8096_v34  ;;  %v5783_v25 = vpop.f32.mrf.mxu0  ;;  %v8926_v54 = vld [vmem:[#allocation12_spill] sm:$0xff] }
 0x173   : > { %v1872_v11 = vpop.f32.mrf.mxu1 }
 0x174   : > { %v8357_v38 = vadd.f32 %v5780_v43, %v1987_v22  ;;  %v1985_v15 = vadd.f32 %v1872_v11, %v8119_v59  ;;  %v2611_v50 = vpop.f32.mrf.mxu0  ;;  %v8925_v43 = vld [vmem:[#allocation16_spill] sm:$0xff] }
 0x175   : > { %v5749_v29 = vpop.f32.mrf.mxu1 }
 0x176   : > { %v8360_v2 = vadd.f32 %v2598_v16, %v1985_v15  ;;  %v1990_v17 = vadd.f32 %v5749_v29, %v8923_v30  ;;  %v5784_v51 = vpop.f32.mrf.mxu0 }
 0x177   : > { %v1885_v9 = vpop.f32.mrf.mxu1 }
 0x178   : > { %v8363_v27 = vadd.f32 %v5783_v25, %v1990_v17  ;;  %v1988_v19 = vadd.f32 %v1885_v9, %v8924_v3  ;;  %v2614_v33 = vpop.f32.mrf.mxu0 }
 0x179   : > { %v5750_v34 = vpop.f32.mrf.mxu1 }
 0x17a   : > { %v8366_v18 = vadd.f32 %v2611_v50, %v1988_v19  ;;  %v1991_v42 = vadd.f32 %v5750_v34, %v8159_v56  ;;  %v5787_v41 = vpop.f32.mrf.mxu0 }
 0x17b   : > { %v1888_v59 = vpop.f32.mrf.mxu1 }
 0x17c   : > { %v8369_v13 = vadd.f32 %v5784_v51, %v1991_v42  ;;  %v1989_v44 = vadd.f32 %v1888_v59, %v8175_v63  ;;  %v2627_v49 = vpop.f32.mrf.mxu0 }
 0x17d   : > { %v5753_v58 = vpop.f32.mrf.mxu1 }
 0x17e   : > { %v8372_v8 = vadd.f32 %v2614_v33, %v1989_v44  ;;  %v1994_v35 = vadd.f32 %v5753_v58, %v8185_v46  ;;  %v5788_v20 = vpop.f32.mrf.mxu0 }
 0x17f   : > { %v1901_v55 = vpop.f32.mrf.mxu1 }
 0x180   : > { %v8375_v53 = vadd.f32 %v5787_v41, %v1994_v35  ;;  %v1992_v32 = vadd.f32 %v1901_v55, %v8202_v7  ;;  %v2630_v5 = vpop.f32.mrf.mxu0 }
 0x181   : > { %v5754_v56 = vpop.f32.mrf.mxu1 }
 0x182   : > { %v8378_v12 = vadd.f32 %v2627_v49, %v1992_v32  ;;  %v1995_v37 = vadd.f32 %v5754_v56, %v8925_v43  ;;  %v5791_v24 = vpop.f32.mrf.mxu0 }
 0x183   : > { %v1904_v63 = vpop.f32.mrf.mxu1 }
 0x184   : > { %v8381_v16 = vadd.f32 %v5788_v20, %v1995_v37  ;;  %v1993_v22 = vadd.f32 %v1904_v63, %v8926_v54  ;;  %v2643_v25 = vpop.f32.mrf.mxu0 }
 0x185   : > { %v5757_v46 = vpop.f32.mrf.mxu1 }
 0x186   : > { %v8384_v11 = vadd.f32 %v2630_v5, %v1993_v22  ;;  %v1998_v15 = vadd.f32 %v5757_v46, %v8244_v47  ;;  %v5792_v50 = vpop.f32.mrf.mxu0 }
 0x187   : > { %v1917_v7 = vpop.f32.mrf.mxu1 }
 0x188   : > { %v8387_v29 = vadd.f32 %v5791_v24, %v1998_v15  ;;  %v1996_v30 = vadd.f32 %v1917_v7, %v8247_v6  ;;  %v2646_v17 = vpop.f32.mrf.mxu0 }
 0x189   : > { %v5758_v51 = vpop.f32.mrf.mxu1 }
 0x18a   : > { %v8390_v9 = vadd.f32 %v2643_v25, %v1996_v30  ;;  %v1999_v3 = vadd.f32 %v5758_v51, %v8267_v36  ;;  %v5795_v19 = vpop.f32.mrf.mxu0 }
 0x18b   : > { %v1920_v33 = vpop.f32.mrf.mxu1 }
 0x18c   : > { %v8393_v34 = vadd.f32 %v5792_v50, %v1999_v3  ;;  %v1997_v42 = vadd.f32 %v1920_v33, %v8282_v28  ;;  %v2659_v41 = vpop.f32.mrf.mxu0 }
 0x18d   : > { %v5761_v47 = vpop.f32.mrf.mxu1 }
 0x18e   : > { %8927 = vst [vmem:[#allocation2_spill] sm:$0xff] %v8393_v34  ;;  %v8396_v59 = vadd.f32 %v2646_v17, %v1997_v42  ;;  %v2002_v44 = vadd.f32 %v5761_v47, %v8288_v21  ;;  %v5796_v49 = vpop.f32.mrf.mxu0 }
 0x18f   : > { %v1933_v6 = vpop.f32.mrf.mxu1 }
 0x190   : > { %8928 = vst [vmem:[#allocation14_spill] sm:$0xff] %v8396_v59  ;;  %v8399_v58 = vadd.f32 %v5795_v19, %v2002_v44  ;;  %v2000_v35 = vadd.f32 %v1933_v6, %v8291_v10  ;;  %v2662_v20 = vpop.f32.mrf.mxu0 }
 0x191   : > { %v5762_v36 = vpop.f32.mrf.mxu1 }
 0x192   : > { %8929 = vst [vmem:[#allocation19_spill] sm:$0xff] %v8399_v58  ;;  %v8402_v55 = vadd.f32 %v2659_v41, %v2000_v35  ;;  %v2003_v32 = vadd.f32 %v5762_v36, %v8300_v4  ;;  %v5799_v5 = vpop.f32.mrf.mxu0 }
 0x193   : > { %v1936_v28 = vpop.f32.mrf.mxu1 }
 0x194   : > { %8930 = vst [vmem:[#allocation9_spill] sm:$0xff] %v8402_v55  ;;  %v8405_v56 = vadd.f32 %v5796_v49, %v2003_v32  ;;  %v2001_v43 = vadd.f32 %v1936_v28, %v8307_v1  ;;  %v2675_v37 = vpop.f32.mrf.mxu0 }
 0x195   : > { %v5765_v21 = vpop.f32.mrf.mxu1 }
 0x196   : > { %8931 = vst [vmem:[#allocation18_spill] sm:$0xff] %v8405_v56  ;;  %v8408_v24 = vadd.f32 %v2662_v20, %v2001_v43  ;;  %v2006_v63 = vadd.f32 %v5765_v21, %v8313_v23  ;;  %v5800_v54 = vpop.f32.mrf.mxu0 }
 0x197   : > { %v1949_v10 = vpop.f32.mrf.mxu1 }
 0x198   : > { %8932 = vst [vmem:[#allocation21_spill] sm:$0xff] %v8408_v24  ;;  %v8411_v22 = vadd.f32 %v5799_v5, %v2006_v63  ;;  %v2004_v25 = vadd.f32 %v1949_v10, %v8316_v57  ;;  %v2678_v46 = vpop.f32.mrf.mxu0 }
 0x199   : > { %v5766_v4 = vpop.f32.mrf.mxu1 }
 0x19a   : > { %8933 = vst [vmem:[#allocation23_spill] sm:$0xff] %v8411_v22  ;;  %v8414_v15 = vadd.f32 %v2675_v37, %v2004_v25  ;;  %v2007_v50 = vadd.f32 %v5766_v4, %v8320_v52  ;;  %v5803_v7 = vpop.f32.mrf.mxu0 }
 0x19b   : > { %v1952_v1 = vpop.f32.mrf.mxu1 }
 0x19c   : > { %8934 = vst [vmem:[#allocation25_spill] sm:$0xff] %v8414_v15  ;;  %v8417_v30 = vadd.f32 %v5800_v54, %v2007_v50  ;;  %v2005_v17 = vadd.f32 %v1952_v1, %v8324_v14  ;;  %v2691_v51 = vpop.f32.mrf.mxu0 }
 0x19d   : > { %v5769_v23 = vpop.f32.mrf.mxu1 }
 0x19e   : > { %8935 = vst [vmem:[#allocation4_spill] sm:$0xff] %v8417_v30  ;;  %v8420_v3 = vadd.f32 %v2678_v46, %v2005_v17  ;;  %v2010_v19 = vadd.f32 %v5769_v23, %v8327_v39  ;;  %v5804_v33 = vpop.f32.mrf.mxu0 }
 0x19f   : > { %v1965_v57 = vpop.f32.mrf.mxu1 }
 0x1a0   : > { %8936 = vst [vmem:[#allocation3_spill] sm:$0xff] %v8420_v3  ;;  %v8423_v42 = vadd.f32 %v5803_v7, %v2010_v19  ;;  %v2008_v41 = vadd.f32 %v1965_v57, %v8330_v45  ;;  %v2694_v47 = vpop.f32.mrf.mxu0 }
 0x1a1   : > { %v5770_v52 = vpop.f32.mrf.mxu1 }
 0x1a2   : > { %8937 = vst [vmem:[#allocation6_spill] sm:$0xff] %v8423_v42  ;;  %v8426_v44 = vadd.f32 %v2691_v51, %v2008_v41  ;;  %v2011_v49 = vadd.f32 %v5770_v52, %v8333_v61  ;;  %v8429_v6 = vpop.f32.mrf.mxu0 }
 0x1a3   : > { %v1968_v14 = vpop.f32.mrf.mxu1 }
 0x1a4   : > { %8938 = vst [vmem:[#allocation5_spill] sm:$0xff] %v8426_v44  ;;  %v8431_v35 = vadd.f32 %v5804_v33, %v2011_v49  ;;  %v2009_v20 = vadd.f32 %v1968_v14, %v8336_v40  ;;  %v8434_v39 = vpop.f32.mrf.mxu0 }
 0x1a5   : > { %v5809_v36 = vpop.f32.mrf.mxu1 }
 0x1a6   : > { %8939 = vst [vmem:[#allocation7_spill] sm:$0xff] %v8431_v35  ;;  %v8436_v32 = vadd.f32 %v2694_v47, %v2009_v20  ;;  %v8438_v5 = vpop.f32.mrf.mxu0 }
 0x1a7   : > { %v3049_v45 = vpop.f32.mrf.mxu1 }
 0x1a8   : > { %8940 = vst [vmem:[#allocation10_spill] sm:$0xff] %v8436_v32  ;;  %v8440_v28 = vpop.f32.mrf.mxu0 }
 0x1a9   : > { %v5810_v43 = vpop.f32.mrf.mxu1 }
 0x1aa   : > { %v8442_v37 = vpop.f32.mrf.mxu0 }
 0x1ab   : > { %v8444_v61 = vpop.f32.mrf.mxu1 }
 0x1ac   : > { %v8446_v21 = vpop.f32.mrf.mxu0 }
 0x1ad   : > { %v8448_v63 = vpop.f32.mrf.mxu1 }
 0x1ae   : > { %v8450_v40 = vpop.f32.mrf.mxu0 }
 0x1af   : > { %v8452_v54 = vpop.f32.mrf.mxu1 }
 0x1b0   : > { %v8454_v10 = vpop.f32.mrf.mxu0 }
 0x1b1   : > { %v8456_v25 = vpop.f32.mrf.mxu1 }
 0x1b2   : > { %v8458_v46 = vpop.f32.mrf.mxu0 }
 0x1b3   : > { %v8460_v4 = vpop.f32.mrf.mxu1 }
 0x1b4   : > { %v8462_v50 = vpop.f32.mrf.mxu0 }
 0x1b5   : > { %v8464_v7 = vpop.f32.mrf.mxu1 }
 0x1b6   : > { %v8466_v1 = vpop.f32.mrf.mxu0 }
 0x1b7   : > { %v8468_v17 = vpop.f32.mrf.mxu1 }
 0x1b8   : > { %v8470_v51 = vpop.f32.mrf.mxu0 }
 0x1b9   : > { %v8472_v23 = vpop.f32.mrf.mxu1 }
 0x1ba   : > { %v8474_v19 = vpop.f32.mrf.mxu0 }
 0x1bb   : > { %v8476_v33 = vpop.f32.mrf.mxu1 }
 0x1bc   : > { %v8478_v57 = vpop.f32.mrf.mxu0 }
 0x1bd   : > { %v8480_v41 = vpop.f32.mrf.mxu1 }
 0x1be   : > { %v8482_v47 = vpop.f32.mrf.mxu0 }
 0x1bf   : > { %v8484_v52 = vpop.f32.mrf.mxu1 }
 0x1c0   : > { %v8486_v49 = vpop.f32.mrf.mxu0 }
 0x1c1   : > { %v8488_v14 = vpop.f32.mrf.mxu1 }
 0x1c2   : > { %v8490_v20 = vpop.f32.mrf.mxu0 }
 0x1c3   : > { %8941 = vst [vmem:[#allocation13_spill] sm:$0xff] %v8490_v20  ;;  %v8492_v32 = vpop.f32.mrf.mxu1 }
 0x1c4   : > { %v8494_v35 = vpop.f32.mrf.mxu0 }
 0x1c5   : > { %8942 = vst [vmem:[#allocation15_spill] sm:$0xff] %v8494_v35  ;;  %v8496_v44 = vpop.f32.mrf.mxu1 }
 0x1c6   : > { %v8498_v42 = vpop.f32.mrf.mxu0 }
 0x1c7   : > { %8943 = vst [vmem:[#allocation17_spill] sm:$0xff] %v8498_v42  ;;  %v8500_v3 = vpop.f32.mrf.mxu1 }
 0x1c8   : > { %v8502_v30 = vpop.f32.mrf.mxu0 }
 0x1c9   : > { %8944 = vst [vmem:[#allocation20_spill] sm:$0xff] %v8502_v30  ;;  %v8504_v15 = vpop.f32.mrf.mxu1 }
 0x1ca   : > { %8945 = vst [vmem:[#allocation22_spill] sm:$0xff] %v8504_v15  ;;  %v8506_v22 = vpop.f32.mrf.mxu0 }
 0x1cb   : > { %8946 = vst [vmem:[#allocation24_spill] sm:$0xff] %v8506_v22  ;;  %v8508_v24 = vpop.f32.mrf.mxu1 }
 0x1cc   : > { %8947 = vst [vmem:[#allocation11_spill] sm:$0xff] %v8508_v24  ;;  %v8510_v56 = vpop.f32.mrf.mxu0 }
 0x1cd   : > { %8948 = vst [vmem:[#allocation8_spill] sm:$0xff] %v8510_v56  ;;  %v8512_v55 = vpop.f32.mrf.mxu1 }
 0x1ce   : > { %8949 = vst [vmem:[#allocation16_spill] sm:$0xff] %v8512_v55  ;;  %v8514_v58 = vpop.f32.mrf.mxu0 }
 0x1cf   : > { %8950 = vst [vmem:[#allocation12_spill] sm:$0xff] %v8514_v58  ;;  %v8516_v59 = vpop.f32.mrf.mxu1 }
 0x1d0   : > { %8951 = vst [vmem:[#allocation26_spill] sm:$0xff] %v8516_v59  ;;  %v8518_v35 = vpop.f32.mrf.mxu0 }
 0x1d1   : > { %8952 = vst [vmem:[#allocation27_spill] sm:$0xff] %v8518_v35  ;;  %v8520_v42 = vpop.f32.mrf.mxu1 }
 0x1d2   : > { %8953 = vst [vmem:[#allocation28_spill] sm:$0xff] %v8520_v42  ;;  %v8522_v34 = vpop.f32.mrf.mxu0 }
 0x1d3   : > { %8954 = vst [vmem:[#allocation29_spill] sm:$0xff] %v8522_v34  ;;  %v8524_v30 = vpop.f32.mrf.mxu1 }
 0x1d4   : > { %8955 = vst [vmem:[#allocation30_spill] sm:$0xff] %v8524_v30  ;;  %v8526_v15 = vpop.f32.mrf.mxu0 }
 0x1d5   : > { %8956 = vst [vmem:[#allocation31_spill] sm:$0xff] %v8526_v15  ;;  %v8528_v22 = vpop.f32.mrf.mxu1 }
 0x1d6   : > { %8957 = vst [vmem:[#allocation32_spill] sm:$0xff] %v8528_v22  ;;  %v8530_v24 = vpop.f32.mrf.mxu0 }
 0x1d7   : > { %8958 = vst [vmem:[#allocation33_spill] sm:$0xff] %v8530_v24  ;;  %v8532_v56 = vpop.f32.mrf.mxu1  ;;  %v3178_v24 = vadd.f32 %v5809_v36, %v8339_v62  ;;  %v3177_v62 = vadd.f32 %v8444_v61, %v8348_v60  ;;  %v3180_v60 = vadd.f32 %v8452_v54, %v8354_v31  ;;  %v3183_v31 = vadd.f32 %v8456_v25, %v8357_v38 }
 0x1d8   : > { %8959 = vst [vmem:[#allocation34_spill] sm:$0xff] %v8532_v56  ;;  %v8534_v55 = vpop.f32.mrf.mxu0  ;;  %v3186_v25 = vadd.f32 %v8464_v7, %v8363_v27 }
 0x1d9   : > { %8960 = vst [vmem:[#allocation35_spill] sm:$0xff] %v8534_v55  ;;  %v8536_v58 = vpop.f32.mrf.mxu1 }
 0x1da   : > { %8961 = vst [vmem:[#allocation36_spill] sm:$0xff] %v8536_v58  ;;  %v8538_v59 = vpop.f32.mrf.mxu0  ;;  %v3176_v58 = vadd.f32 %v3049_v45, %v8342_v0  ;;  %v3182_v0 = vadd.f32 %v8448_v63, %v8351_v48  ;;  %v8569_v45 = vld [vmem:[%s8735_s2] ss:$0 sm:$0xff] }
 0x1db   : > { %8962 = vst [vmem:[#allocation37_spill] sm:$0xff] %v8538_v59  ;;  %v8540_v35 = vpop.f32.mrf.mxu1 }
 0x1dc   : > { %8963 = vst [vmem:[#allocation38_spill] sm:$0xff] %v8540_v35  ;;  %v8542_v42 = vpop.f32.mrf.mxu0 }
 0x1dd   : > { %8964 = vst [vmem:[#allocation39_spill] sm:$0xff] %v8542_v42  ;;  %v8544_v34 = vpop.f32.mrf.mxu1  ;;  %v3540_v42 = vadd.f32 %v8429_v6, %v3178_v24 }
 0x1de   : > { %8965 = vst [vmem:[#allocation40_spill] sm:$0xff] %v8544_v34  ;;  %v8546_v15 = vpop.f32.mrf.mxu0  ;;  %v3179_v34 = vadd.f32 %v5810_v43, %v8345_v26 }
 0x1df   : > { %8966 = vst [vmem:[#allocation41_spill] sm:$0xff] %v8546_v15  ;;  %v8548_v22 = vpop.f32.mrf.mxu1  ;;  %v3538_v15 = vadd.f32 %v8434_v39, %v3176_v58 }
 0x1e0   : > { %v8551_v56 = vpop.f32.mrf.mxu0  ;;  %v3541_v26 = vadd.f32 %v8438_v5, %v3179_v34 }
 0x1e1   : > { %8967 = vst [vmem:[#allocation42_spill] sm:$0xff] %v8551_v56  ;;  %v8553_v55 = vpop.f32.mrf.mxu1 }
 0x1e2   : > { %v5911_v59 = vpop.f32.mrf.mxu0 }
 0x1e3   : > { %v8556_v30 = vpop.f32.mrf.mxu1 }
 0x1e4   : > { %v4607_v35 = vpop.f32.mrf.mxu0 }
 0x1e5   : > { %v5877_v20 = vpop.f32.mrf.mxu1 }
 0x1e6   : > { %v4266_v36 = vadd.f32 %v5877_v20, %v3540_v42  ;;  %v5912_v56 = vpop.f32.mrf.mxu0  ;;  %v3539_v42 = vadd.f32 %v8440_v28, %v3177_v62  ;;  %v3542_v28 = vadd.f32 %v8446_v21, %v3180_v60 }
 0x1e7   : > { %v4137_v24 = vpop.f32.mrf.mxu1 }
 0x1e8   : > { %v4736_v6 = vadd.f32 %v5911_v59, %v4266_v36  ;;  %v4264_v43 = vadd.f32 %v4137_v24, %v3538_v15  ;;  %v4610_v58 = vpop.f32.mrf.mxu0  ;;  %v3544_v15 = vadd.f32 %v8442_v37, %v3182_v0 }
 0x1e9   : > { %v5878_v48 = vpop.f32.mrf.mxu1 }
 0x1ea   : > { %v4775_v39 = vadd.f32 %v8569_v45, %v4736_v6  ;;  %v4734_v61 = vadd.f32 %v4607_v35, %v4264_v43  ;;  %v4267_v34 = vadd.f32 %v5878_v48, %v3541_v26  ;;  %v5915_v59 = vpop.f32.mrf.mxu0  ;;  %v3181_v35 = vadd.f32 %v8460_v4, %v8360_v2 }
 0x1eb   : > { %v4140_v5 = vpop.f32.mrf.mxu1  ;;  %v3184_v4 = vadd.f32 %v8468_v17, %v8366_v18 }
 0x1ec   : > { %4807 = vst [vmem:[%s8577_s19 + $0x10] sm:$0xff] %v4775_v39  ;;  %v4773_v63 = vadd.f32 %v8569_v45, %v4734_v61  ;;  %v4737_v54 = vadd.f32 %v5912_v56, %v4267_v34  ;;  %v4265_v20 = vadd.f32 %v4140_v5, %v3539_v42  ;;  %v4623_v36 = vpop.f32.mrf.mxu0  ;;  %v3545_v56 = vadd.f32 %v8450_v40, %v3183_v31 }
 0x1ed   : > { %v5881_v62 = vpop.f32.mrf.mxu1  ;;  %v3548_v42 = vadd.f32 %v8458_v46, %v3186_v25  ;;  %v3187_v61 = vadd.f32 %v8472_v23, %v8369_v13  ;;  %v3185_v5 = vadd.f32 %v8476_v33, %v8372_v8  ;;  %v3190_v23 = vadd.f32 %v8480_v41, %v8375_v53 }
 0x1ee   : > { %4805 = vst [vmem:[%s8577_s19] sm:$0xff] %v4773_v63  ;;  %v4776_v37 = vadd.f32 %v8569_v45, %v4737_v54  ;;  %v4735_v0 = vadd.f32 %v4610_v58, %v4265_v20  ;;  %v4270_v24 = vadd.f32 %v5881_v62, %v3544_v15  ;;  %v5916_v38 = vpop.f32.mrf.mxu0  ;;  %v3543_v58 = vadd.f32 %v8454_v10, %v3181_v35 }
 0x1ef   : > { %v4153_v26 = vpop.f32.mrf.mxu1  ;;  %v3549_v20 = vadd.f32 %v8466_v1, %v3187_v61  ;;  %v3188_v33 = vadd.f32 %v8484_v52, %v8378_v12  ;;  %v3547_v35 = vadd.f32 %v8470_v51, %v3185_v5  ;;  %v8969_v61 = vld [vmem:[#allocation2_spill] sm:$0xff] }
 0x1f0   : > { %4808 = vst [vmem:[%s8577_s19 + $0x18] sm:$0xff] %v4776_v37  ;;  %v4774_v21 = vadd.f32 %v8569_v45, %v4735_v0  ;;  %v4740_v6 = vadd.f32 %v5915_v59, %v4270_v24  ;;  %v4268_v43 = vadd.f32 %v4153_v26, %v3542_v28  ;;  %v4626_v2 = vpop.f32.mrf.mxu0  ;;  %v3546_v59 = vadd.f32 %v8462_v50, %v3184_v4  ;;  %v8972_v5 = vld [vmem:[#allocation14_spill] sm:$0xff] }
 0x1f1   : > { %v5882_v60 = vpop.f32.mrf.mxu1  ;;  %v3552_v0 = vadd.f32 %v8474_v19, %v3190_v23  ;;  %v3550_v26 = vadd.f32 %v8478_v57, %v3188_v33 }
 0x1f2   : > { %4806 = vst [vmem:[%s8577_s19 + $0x8] sm:$0xff] %v4774_v21  ;;  %v4779_v27 = vadd.f32 %v8569_v45, %v4740_v6  ;;  %v4738_v7 = vadd.f32 %v4623_v36, %v4268_v43  ;;  %v4271_v48 = vadd.f32 %v5882_v60, %v3545_v56  ;;  %v5919_v40 = vpop.f32.mrf.mxu0  ;;  %v3189_v21 = vadd.f32 %v8492_v32, %v8384_v11 }
 0x1f3   : > { %v4156_v39 = vpop.f32.mrf.mxu1  ;;  %v3192_v32 = vadd.f32 %v8500_v3, %v8390_v9 }
 0x1f4   : > { %4811 = vst [vmem:[%s8577_s19 + $0x30] sm:$0xff] %v4779_v27  ;;  %v4777_v18 = vadd.f32 %v8569_v45, %v4738_v7  ;;  %v4741_v17 = vadd.f32 %v5916_v38, %v4271_v48  ;;  %v4269_v34 = vadd.f32 %v4156_v39, %v3543_v58  ;;  %v4639_v10 = vpop.f32.mrf.mxu0  ;;  %v3191_v38 = vadd.f32 %v8488_v14, %v8381_v16 }
 0x1f5   : > { %v5885_v15 = vpop.f32.mrf.mxu1  ;;  %v3194_v14 = vadd.f32 %v8496_v44, %v8387_v29  ;;  %v3551_v7 = vadd.f32 %v8486_v49, %v3189_v21 }
 0x1f6   : > { %4809 = vst [vmem:[%s8577_s19 + $0x20] sm:$0xff] %v4777_v18  ;;  %v4780_v46 = vadd.f32 %v8569_v45, %v4741_v17  ;;  %v4739_v31 = vadd.f32 %v4626_v2, %v4269_v34  ;;  %v4274_v63 = vadd.f32 %v5885_v15, %v3548_v42  ;;  %v5920_v13 = vpop.f32.mrf.mxu0  ;;  %v3553_v4 = vadd.f32 %v8482_v47, %v3191_v38  ;;  %v8970_v18 = vld [vmem:[#allocation22_spill] sm:$0xff]  ;;  %v8979_v38 = vld [vmem:[#allocation20_spill] sm:$0xff] }
 0x1f7   : > { %v4169_v54 = vpop.f32.mrf.mxu1  ;;  %v3195_v17 = vadd.f32 %v8970_v18, %v8969_v61  ;;  %v8988_v18 = vld [vmem:[#allocation12_spill] sm:$0xff] }
 0x1f8   : > { %4812 = vst [vmem:[%s8577_s19 + $0x38] sm:$0xff] %v4780_v46  ;;  %v4778_v50 = vadd.f32 %v8569_v45, %v4739_v31  ;;  %v4744_v36 = vadd.f32 %v5919_v40, %v4274_v63  ;;  %v4272_v28 = vadd.f32 %v4169_v54, %v3546_v59  ;;  %v4642_v8 = vpop.f32.mrf.mxu0  ;;  %v8968_v40 = vld [vmem:[#allocation13_spill] sm:$0xff]  ;;  %v8973_v46 = vld [vmem:[#allocation11_spill] sm:$0xff] }
 0x1f9   : > { %v5886_v62 = vpop.f32.mrf.mxu1  ;;  %v3556_v42 = vadd.f32 %v8968_v40, %v3194_v14  ;;  %v3193_v31 = vadd.f32 %v8973_v46, %v8972_v5  ;;  %v8986_v40 = vld [vmem:[#allocation23_spill] sm:$0xff] }
 0x1fa   : > { %4810 = vst [vmem:[%s8577_s19 + $0x28] sm:$0xff] %v4778_v50  ;;  %v4783_v53 = vadd.f32 %v8569_v45, %v4744_v36  ;;  %v4742_v41 = vadd.f32 %v4639_v10, %v4272_v28  ;;  %v4275_v37 = vadd.f32 %v5886_v62, %v3549_v20  ;;  %v5923_v1 = vpop.f32.mrf.mxu0  ;;  %v8971_v10 = vld [vmem:[#allocation15_spill] sm:$0xff]  ;;  %v8975_v50 = vld [vmem:[#allocation16_spill] sm:$0xff] }
 0x1fb   : > { %v4172_v24 = vpop.f32.mrf.mxu1  ;;  %v3554_v59 = vadd.f32 %v8971_v10, %v3192_v32  ;;  %v8974_v20 = vld [vmem:[#allocation19_spill] sm:$0xff]  ;;  %v8984_v32 = vld [vmem:[#allocation21_spill] sm:$0xff] }
 0x1fc   : > { %4815 = vst [vmem:[%s8577_s19 + $0x50] sm:$0xff] %v4783_v53  ;;  %v4781_v12 = vadd.f32 %v8569_v45, %v4742_v41  ;;  %v4745_v52 = vadd.f32 %v5920_v13, %v4275_v37  ;;  %v4273_v25 = vadd.f32 %v4172_v24, %v3547_v35  ;;  %v4655_v51 = vpop.f32.mrf.mxu0  ;;  %v3198_v36 = vadd.f32 %v8975_v50, %v8974_v20  ;;  %v8977_v37 = vld [vmem:[#allocation9_spill] sm:$0xff]  ;;  %v8991_v46 = vld [vmem:[#allocation27_spill] sm:$0xff] }
 0x1fd   : > { %v5889_v56 = vpop.f32.mrf.mxu1  ;;  %v8989_v10 = vld [vmem:[#allocation25_spill] sm:$0xff] }
 0x1fe   : > { %4813 = vst [vmem:[%s8577_s19 + $0x40] sm:$0xff] %v4781_v12  ;;  %v4784_v19 = vadd.f32 %v8569_v45, %v4745_v52  ;;  %v4743_v6 = vadd.f32 %v4642_v8, %v4273_v25  ;;  %v4278_v43 = vadd.f32 %v5889_v56, %v3552_v0  ;;  %v5924_v16 = vpop.f32.mrf.mxu0  ;;  %v8976_v8 = vld [vmem:[#allocation17_spill] sm:$0xff]  ;;  %v3555_v12 = vadd.f32 %v8979_v38, %v3193_v31  ;;  %v8980_v56 = vld [vmem:[#allocation24_spill] sm:$0xff]  ;;  %v8997_v38 = vld [vmem:[#allocation38_spill] sm:$0xff] }
 0x1ff   : > { %v4185_v2 = vpop.f32.mrf.mxu1  ;;  %v3557_v33 = vadd.f32 %v8976_v8, %v3195_v17  ;;  %v3560_v21 = vadd.f32 %v8980_v56, %v3198_v36  ;;  %v8992_v20 = vld [vmem:[#allocation29_spill] sm:$0xff]  ;;  %v8994_v8 = vld [vmem:[#allocation36_spill] sm:$0xff]  ;;  %v8998_v56 = vld [vmem:[#allocation6_spill] sm:$0xff] }
 0x200   : > { %4816 = vst [vmem:[%s8577_s19 + $0x58] sm:$0xff] %v4784_v19  ;;  %v4782_v57 = vadd.f32 %v8569_v45, %v4743_v6  ;;  %v4748_v60 = vadd.f32 %v5923_v1, %v4278_v43  ;;  %v4276_v58 = vadd.f32 %v4185_v2, %v3550_v26  ;;  %v4658_v11 = vpop.f32.mrf.mxu0  ;;  %v8978_v1 = vld [vmem:[#allocation26_spill] sm:$0xff]  ;;  %v8982_v43 = vld [vmem:[#allocation28_spill] sm:$0xff] }
 0x201   : > { %v5890_v27 = vpop.f32.mrf.mxu1  ;;  %v3196_v0 = vadd.f32 %v8978_v1, %v8977_v37  ;;  %v8981_v6 = vld [vmem:[#allocation18_spill] sm:$0xff]  ;;  %v8995_v37 = vld [vmem:[#allocation31_spill] sm:$0xff] }
 0x202   : > { %4814 = vst [vmem:[%s8577_s19 + $0x48] sm:$0xff] %v4782_v57  ;;  %v4787_v29 = vadd.f32 %v8569_v45, %v4748_v60  ;;  %v4746_v44 = vadd.f32 %v4655_v51, %v4276_v58  ;;  %v4279_v48 = vadd.f32 %v5890_v27, %v3553_v4  ;;  %v5927_v47 = vpop.f32.mrf.mxu0  ;;  %v8983_v60 = vld [vmem:[#allocation8_spill] sm:$0xff]  ;;  %v8985_v27 = vld [vmem:[#allocation30_spill] sm:$0xff] }
 0x203   : > { %v4188_v39 = vpop.f32.mrf.mxu1  ;;  %v3558_v58 = vadd.f32 %v8983_v60, %v3196_v0  ;;  %v9001_v60 = vld [vmem:[#allocation5_spill] sm:$0xff] }
 0x204   : > { %4819 = vst [vmem:[%s8577_s19 + $0x70] sm:$0xff] %v4787_v29  ;;  %v4785_v9 = vadd.f32 %v8569_v45, %v4746_v44  ;;  %v4749_v3 = vadd.f32 %v5924_v16, %v4279_v48  ;;  %v4277_v34 = vadd.f32 %v4188_v39, %v3551_v7  ;;  %v4671_v49 = vpop.f32.mrf.mxu0  ;;  %v3199_v16 = vadd.f32 %v8982_v43, %v8981_v6  ;;  %v9000_v43 = vld [vmem:[#allocation33_spill] sm:$0xff] }
 0x205   : > { %v5893_v15 = vpop.f32.mrf.mxu1  ;;  %v3197_v7 = vadd.f32 %v8985_v27, %v8984_v32  ;;  %v9002_v32 = vld [vmem:[#allocation35_spill] sm:$0xff] }
 0x206   : > { %4817 = vst [vmem:[%s8577_s19 + $0x60] sm:$0xff] %v4785_v9  ;;  %v4788_v63 = vadd.f32 %v8569_v45, %v4749_v3  ;;  %v4747_v13 = vadd.f32 %v4658_v11, %v4277_v34  ;;  %v4282_v23 = vadd.f32 %v5893_v15, %v3556_v42  ;;  %v5928_v54 = vpop.f32.mrf.mxu0  ;;  %v8987_v42 = vld [vmem:[#allocation32_spill] sm:$0xff]  ;;  %v3561_v17 = vadd.f32 %v8988_v18, %v3199_v16 }
 0x207   : > { %v4201_v28 = vpop.f32.mrf.mxu1  ;;  %v3202_v39 = vadd.f32 %v8987_v42, %v8986_v40  ;;  %v3559_v31 = vadd.f32 %v8991_v46, %v3197_v7 }
 0x208   : > { %4820 = vst [vmem:[%s8577_s19 + $0x78] sm:$0xff] %v4788_v63  ;;  %v4786_v62 = vadd.f32 %v8569_v45, %v4747_v13  ;;  %v4752_v35 = vadd.f32 %v5927_v47, %v4282_v23  ;;  %v4280_v53 = vadd.f32 %v4201_v28, %v3554_v59  ;;  %v4674_v41 = vpop.f32.mrf.mxu0  ;;  %v8990_v59 = vld [vmem:[#allocation34_spill] sm:$0xff]  ;;  %v8993_v28 = vld [vmem:[#allocation4_spill] sm:$0xff] }
 0x209   : > { %v5894_v24 = vpop.f32.mrf.mxu1  ;;  %v3200_v15 = vadd.f32 %v8990_v59, %v8989_v10  ;;  %v3564_v50 = vadd.f32 %v8992_v20, %v3202_v39  ;;  %v9004_v39 = vld [vmem:[#allocation7_spill] sm:$0xff]  ;;  %v9006_v10 = vld [vmem:[#allocation10_spill] sm:$0xff] }
 0x20a   : > { %4818 = vst [vmem:[%s8577_s19 + $0x68] sm:$0xff] %v4786_v62  ;;  %v4791_v52 = vadd.f32 %v8569_v45, %v4752_v35  ;;  %v4750_v25 = vadd.f32 %v4671_v49, %v4280_v53  ;;  %v4283_v51 = vadd.f32 %v5894_v24, %v3557_v33  ;;  %v3203_v33 = vadd.f32 %v8994_v8, %v8993_v28  ;;  %v8996_v24 = vld [vmem:[#allocation3_spill] sm:$0xff] }
 0x20b   : > { %v5931_v26 = vpop.f32.mrf.mxu0  ;;  %v4204_v19 = vpop.f32.mrf.mxu1  ;;  %v3562_v1 = vadd.f32 %v8995_v37, %v3200_v15  ;;  %v3205_v59 = vadd.f32 %v8556_v30, %v9006_v10 }
 0x20c   : > { %4823 = vst [vmem:[%s8577_s19 + $0x90] sm:$0xff] %v4791_v52  ;;  %v4789_v14 = vadd.f32 %v8569_v45, %v4750_v25  ;;  %v4753_v2 = vadd.f32 %v5928_v54, %v4283_v51  ;;  %v4281_v4 = vadd.f32 %v4204_v19, %v3555_v12  ;;  %v3201_v12 = vadd.f32 %v8997_v38, %v8996_v24 }
 0x20d   : > { %v4687_v57 = vpop.f32.mrf.mxu0  ;;  %v5897_v11 = vpop.f32.mrf.mxu1  ;;  %v3565_v16 = vadd.f32 %v9000_v43, %v3203_v33 }
 0x20e   : > { %4821 = vst [vmem:[%s8577_s19 + $0x80] sm:$0xff] %v4789_v14  ;;  %v4792_v29 = vadd.f32 %v8569_v45, %v4753_v2  ;;  %v4751_v44 = vadd.f32 %v4674_v41, %v4281_v4  ;;  %v4286_v48 = vadd.f32 %v5897_v11, %v3560_v21  ;;  %v8999_v21 = vld [vmem:[#allocation40_spill] sm:$0xff]  ;;  %v3563_v27 = vadd.f32 %v9002_v32, %v3201_v12 }
 0x20f   : > { %v5932_v47 = vpop.f32.mrf.mxu0  ;;  %v4217_v61 = vpop.f32.mrf.mxu1  ;;  %v3206_v19 = vadd.f32 %v8999_v21, %v8998_v56 }
 0x210   : > { %4824 = vst [vmem:[%s8577_s19 + $0x98] sm:$0xff] %v4792_v29  ;;  %v4790_v9 = vadd.f32 %v8569_v45, %v4751_v44  ;;  %v4756_v3 = vadd.f32 %v5931_v26, %v4286_v48  ;;  %v4284_v34 = vadd.f32 %v4217_v61, %v3558_v58  ;;  %v3204_v58 = vadd.f32 %v8548_v22, %v9001_v60 }
 0x211   : > { %v4690_v49 = vpop.f32.mrf.mxu0  ;;  %v5898_v5 = vpop.f32.mrf.mxu1  ;;  %v3207_v61 = vadd.f32 %v8553_v55, %v9004_v39 }
 0x212   : > { %4822 = vst [vmem:[%s8577_s19 + $0x88] sm:$0xff] %v4790_v9  ;;  %v4795_v63 = vadd.f32 %v8569_v45, %v4756_v3  ;;  %v4754_v13 = vadd.f32 %v4687_v57, %v4284_v34  ;;  %v4287_v23 = vadd.f32 %v5898_v5, %v3561_v17  ;;  %v9005_v9 = vld [vmem:[#allocation39_spill] sm:$0xff] }
 0x213   : > { %v5935_v54 = vpop.f32.mrf.mxu0  ;;  %v4220_v36 = vpop.f32.mrf.mxu1  ;;  %v3566_v3 = vadd.f32 %v9005_v9, %v3204_v58 }
 0x214   : > { %4827 = vst [vmem:[%s8577_s19 + $0xb0] sm:$0xff] %v4795_v63  ;;  %v4793_v62 = vadd.f32 %v8569_v45, %v4754_v13  ;;  %v4757_v35 = vadd.f32 %v5932_v47, %v4287_v23  ;;  %v4285_v53 = vadd.f32 %v4220_v36, %v3559_v31  ;;  %v9003_v47 = vld [vmem:[#allocation37_spill] sm:$0xff]  ;;  %v9008_v36 = vld [vmem:[#allocation42_spill] sm:$0xff] }
 0x215   : > { %v4703_v41 = vpop.f32.mrf.mxu0  ;;  %v5901_v0 = vpop.f32.mrf.mxu1  ;;  %v3568_v40 = vadd.f32 %v9003_v47, %v3206_v19  ;;  %v9007_v31 = vld [vmem:[#allocation41_spill] sm:$0xff]  ;;  %v3567_v30 = vadd.f32 %v9008_v36, %v3205_v59 }
 0x216   : > { %4825 = vst [vmem:[%s8577_s19 + $0xa0] sm:$0xff] %v4793_v62  ;;  %v4796_v52 = vadd.f32 %v8569_v45, %v4757_v35  ;;  %v4755_v25 = vadd.f32 %v4690_v49, %v4285_v53  ;;  %v4290_v51 = vadd.f32 %v5901_v0, %v3564_v50  ;;  %v3569_v63 = vadd.f32 %v9007_v31, %v3207_v61 }
 0x217   : > { %v5936_v26 = vpop.f32.mrf.mxu0  ;;  %v4233_v6 = vpop.f32.mrf.mxu1 }
 0x218   : > { %4828 = vst [vmem:[%s8577_s19 + $0xb8] sm:$0xff] %v4796_v52  ;;  %v4794_v14 = vadd.f32 %v8569_v45, %v4755_v25  ;;  %v4760_v2 = vadd.f32 %v5935_v54, %v4290_v51  ;;  %v4288_v4 = vadd.f32 %v4233_v6, %v3562_v1 }
 0x219   : > { %v4706_v57 = vpop.f32.mrf.mxu0  ;;  %v5902_v11 = vpop.f32.mrf.mxu1 }
 0x21a   : > { %4826 = vst [vmem:[%s8577_s19 + $0xa8] sm:$0xff] %v4794_v14  ;;  %v4799_v7 = vadd.f32 %v8569_v45, %v4760_v2  ;;  %v4758_v29 = vadd.f32 %v4703_v41, %v4288_v4  ;;  %v4291_v44 = vadd.f32 %v5902_v11, %v3565_v16 }
 0x21b   : > { %v5939_v48 = vpop.f32.mrf.mxu0  ;;  %v4236_v42 = vpop.f32.mrf.mxu1 }
 0x21c   : > { %4831 = vst [vmem:[%s8577_s19 + $0xd0] sm:$0xff] %v4799_v7  ;;  %v4797_v22 = vadd.f32 %v8569_v45, %v4758_v29  ;;  %v4761_v18 = vadd.f32 %v5936_v26, %v4291_v44  ;;  %v4289_v17 = vadd.f32 %v4236_v42, %v3563_v27 }
 0x21d   : > { %v5905_v34 = vpop.f32.mrf.mxu1  ;;  %v4719_v49 = vpop.f32.mrf.mxu0 }
 0x21e   : > { %4829 = vst [vmem:[%s8577_s19 + $0xc0] sm:$0xff] %v4797_v22  ;;  %v4800_v15 = vadd.f32 %v8569_v45, %v4761_v18  ;;  %v4759_v5 = vadd.f32 %v4706_v57, %v4289_v17  ;;  %v4294_v46 = vadd.f32 %v5905_v34, %v3568_v40 }
 0x21f   : > { %v4249_v55 = vpop.f32.mrf.mxu1  ;;  %v5940_v50 = vpop.f32.mrf.mxu0 }
 0x220   : > { %4832 = vst [vmem:[%s8577_s19 + $0xd8] sm:$0xff] %v4800_v15  ;;  %v4798_v13 = vadd.f32 %v8569_v45, %v4759_v5  ;;  %v4764_v23 = vadd.f32 %v5939_v48, %v4294_v46  ;;  %v4292_v54 = vadd.f32 %v4249_v55, %v3566_v3 }
 0x221   : > { %v5906_v20 = vpop.f32.mrf.mxu1  ;;  %v4722_v37 = vpop.f32.mrf.mxu0 }
 0x222   : > { %4830 = vst [vmem:[%s8577_s19 + $0xc8] sm:$0xff] %v4798_v13  ;;  %v4803_v28 = vadd.f32 %v8569_v45, %v4764_v23  ;;  %v4762_v8 = vadd.f32 %v4719_v49, %v4292_v54  ;;  %v4295_v33 = vadd.f32 %v5906_v20, %v3569_v63 }
 0x223   : > { %v4252_v62 = vpop.f32.mrf.mxu1 }
 0x224   : > { %4835 = vst [vmem:[%s8577_s19 + $0xf0] sm:$0xff] %v4803_v28  ;;  %v4801_v35 = vadd.f32 %v8569_v45, %v4762_v8  ;;  %v4765_v53 = vadd.f32 %v5940_v50, %v4295_v33  ;;  %v4293_v41 = vadd.f32 %v4252_v62, %v3567_v30 }
 0x226   : > { %4833 = vst [vmem:[%s8577_s19 + $0xe0] sm:$0xff] %v4801_v35  ;;  %v4804_v1 = vadd.f32 %v8569_v45, %v4765_v53  ;;  %v4763_v0 = vadd.f32 %v4722_v37, %v4293_v41 }
 0x228   : > { %4836 = vst [vmem:[%s8577_s19 + $0xf8] sm:$0xff] %v4804_v1  ;;  %v4802_v24 = vadd.f32 %v8569_v45, %v4763_v0 }
 0x22a   : > { %4834 = vst [vmem:[%s8577_s19 + $0xe8] sm:$0xff] %v4802_v24 }
 0x22b PF: > { %s13_s14 = sadd.s32 1, %s6050_s14   ;;  %s9009_s12 = smov %s6046_s13 }
 0x22c   : > { %p10_p5 = scmp.ge.s32.totalorder %s13_s14, 4   ;;  %s9010_s13 = smov %s9012_s15 }
 0x22e   :  { %12 = sbr.rel (!%p10_p5) target bundleno = 2 (0x2), region = 73 }

</bundles_post_ra>
